<compile_context>
chip_gen: v7x
topology: tpu7x:2x2x1
jax: 0.10.0
libtpu: 0.0.40
codegen_flags: <defaults>
</compile_context>

<pallas_src>
import functools
import math

import jax
import jax.numpy as jnp
from jax.experimental import pallas as pl
from jax.experimental.pallas import tpu as pltpu

BN_EPS = 1e-5
BN_SCALE = 1.0 / math.sqrt(1.0 + BN_EPS)


def _round_up(x, m):
    return (x + m - 1) // m * m


# ----------------------------------------------------------------------------
# Fused kernel: Bt batch elements per grid step run the full network + loss.
# ----------------------------------------------------------------------------
def _tcn_ae_fused_kernel(x_ref, wpack_ref, recon_ref, sse_ref, *, program):
    """program: static tuple of ops
         ("block", shifts, has_downsample, param_metas) — one TemporalBlock
         ("linear", (w_meta, b_meta))                    — one Linear head
       param_meta = (row_offset, rows, cols) into the packed weight buffer.
       Conv weights are pre-flattened to (A*Cin, Cout) with zero-contribution
       taps (shift >= T) already removed and the BN eval scale folded in.
    """
    x = x_ref[...]                              # (Bt, T, F), channels-last
    Bt, T, _ = x.shape

    def param(meta):
        r0, rows, cols = meta
        return wpack_ref[r0:r0 + rows, :cols]

    def matmul2d(h3, w, b):
        """(Bt,T,Cin) @ (Cin,Cout) + (1,Cout) -> (Bt,T,Cout): one MXU pass."""
        cin = h3.shape[-1]
        y = jnp.dot(h3.reshape(Bt * T, cin), w,
                    preferred_element_type=jnp.float32) + b
        return y.reshape(Bt, T, w.shape[-1])

    def causal_conv(h3, w, b, shifts):
        """Dilated causal conv as one matmul; tap gather done in registers."""
        cin = h3.shape[-1]
        pad = shifts[0]                          # shifts are descending
        hp = (jnp.concatenate(
                  [jnp.zeros((Bt, pad, cin), jnp.float32), h3], axis=1)
              if pad > 0 else h3)
        taps = [hp[:, pad - s:pad - s + T, :] for s in shifts]
        xcat = taps[0] if len(taps) == 1 else jnp.concatenate(taps, axis=-1)
        return matmul2d(xcat, w, b)              # (Bt, T, Cout)

    h = x
    for op in program:
        if op[0] == "block":
            _, shifts, has_down, metas = op
            w1, b1, w2, b2 = param(metas[0]), param(metas[1]), param(metas[2]), param(metas[3])
            if has_down:                         # 1x1-conv residual branch
                res = matmul2d(h, param(metas[4]), param(metas[5]))
            else:                                # identity residual: no matmul
                res = h
            # conv1 -> chomp -> relu -> BN(eval, folded) -> dropout(identity)
            a = jnp.maximum(causal_conv(h, w1, b1, shifts), 0.0)
            # conv2 -> chomp -> relu -> BN(eval, folded) -> dropout(identity)
            a = jnp.maximum(causal_conv(a, w2, b2, shifts), 0.0)
            h = jnp.maximum(a + res, 0.0)
        else:                                    # Linear head
            _, (wm, bm) = op
            h = matmul2d(h, param(wm), param(bm))

    recon_ref[...] = h
    d = (h - x).reshape(Bt * T, -1)
    # Per-step squared error; the B//Bt-element sum + divide happens outside
    # (cross-step accumulation would race across a "parallel" grid axis).
    sse_ref[...] = jnp.sum(d * d).reshape(1, 1, 1)


# ----------------------------------------------------------------------------
# Trace-time parameter packing: flatten active taps, fold the BN eval scale,
# drop identity residuals, and pack everything into ONE aligned VMEM buffer.
# ----------------------------------------------------------------------------
def _prepare_params(params, T, K):
    """Returns (wpack, static_program)."""
    arrays, metas_all = [], []
    row_off = 0

    def add(arr):
        nonlocal row_off
        rows, cols = arr.shape
        meta = (row_off, rows, cols)
        arrays.append(arr)
        metas_all.append(meta)
        row_off += _round_up(rows, 8)            # 8-aligned row offsets
        return meta

    program = []

    def add_block(blk, dilation):
        w1, b1, w2, b2, wd, bd = blk
        _, cin, cout = w1.shape
        # Active taps: shift (K-1-j)*dilation < T (inactive ones are a prefix).
        js = [j for j in range(K) if (K - 1 - j) * dilation < T]
        j0 = js[0]
        n_taps = len(js)
        shifts = tuple((K - 1 - j) * dilation for j in js)   # descending
        # Fold BN eval scale (positive, applied after ReLU) into conv w/b.
        pm = [add((w1[j0:] * BN_SCALE).reshape(n_taps * cin, cout)),
              add(b1 * BN_SCALE),
              add((w2[j0:] * BN_SCALE).reshape(n_taps * cout, cout)),
              add(b2 * BN_SCALE)]
        has_down = wd is not None
        if has_down:
            pm.append(add(wd))
            pm.append(add(bd))
        program.append(("block", shifts, has_down, tuple(pm)))

    for i, blk in enumerate(params["enc_blocks"]):
        add_block(blk, 2 ** i)
    lw, lb = params["enc_out"]
    program.append(("linear", (add(lw), add(lb))))
    for i, blk in enumerate(params["dec_blocks"]):
        add_block(blk, 2 ** i)
    lw, lb = params["dec_out"]
    program.append(("linear", (add(lw), add(lb))))

    col_pad = _round_up(max(a.shape[1] for a in arrays), 128)  # lane-aligned
    total_rows = _round_up(max(row_off, 8), 8)
    wpack = jnp.zeros((total_rows, col_pad), jnp.float32)
    for arr, (r0, rows, cols) in zip(arrays, metas_all):
        wpack = wpack.at[r0:r0 + rows, :cols].set(arr.astype(jnp.float32))
    return wpack, tuple(program)


# ----------------------------------------------------------------------------
# Full forward: one pallas_call for everything.
# ----------------------------------------------------------------------------
def tcn_ae_forward(params, x, *, kernel_size, batch_tile=None):
    B, T, F = x.shape
    wpack, program = _prepare_params(params, T, kernel_size)

    # Choose per-step batch tile: fatten the MXU M dimension while keeping
    # >= 2 grid steps (v7x megacore) and modest per-step activations.
    if batch_tile is None:
        batch_tile = 1
        for bt in range(1, B + 1):
            if B % bt != 0:
                continue
            if B > 1 and B // bt < 2:
                continue
            if bt * T > 1024:
                continue
            batch_tile = bt
    Bt = batch_tile
    G = B // Bt

    kern = functools.partial(_tcn_ae_fused_kernel, program=program)

    # Advisory cost estimate (flops ~ 2*B*T*rows*cols per packed weight).
    flops = 0
    max_rows = 1
    for op in program:
        metas = op[3] if op[0] == "block" else op[1]
        for (_, rows, cols) in metas:
            flops += 2 * B * T * rows * cols
            max_rows = max(max_rows, rows)
    bytes_accessed = 4 * (wpack.size + 3 * B * T * F)
    cost = pl.CostEstimate(flops=int(flops), transcendentals=0,
                           bytes_accessed=int(bytes_accessed))

    # Explicit VMEM budget (safe on v7x's 64 MiB as well as v5e/v6e's 128 MiB).
    vmem_est = 4 * (wpack.size + 8 * Bt * T * max(max_rows, F))
    vmem_limit = int(min(max(2 * vmem_est, 16 << 20), 48 << 20))

    recon, sse = pl.pallas_call(
        kern,
        out_shape=(jax.ShapeDtypeStruct((B, T, F), jnp.float32),
                   jax.ShapeDtypeStruct((G, 1, 1), jnp.float32)),
        grid=(G,),
        in_specs=[pl.BlockSpec((Bt, T, F), lambda g: (g, 0, 0)),
                  pl.BlockSpec(wpack.shape, lambda g: (0, 0))],
        out_specs=(pl.BlockSpec((Bt, T, F), lambda g: (g, 0, 0)),
                   pl.BlockSpec((1, 1, 1), lambda g: (g, 0, 0))),
        compiler_params=pltpu.CompilerParams(
            dimension_semantics=("parallel",),   # v7x: split batch over 2 TCs
            vmem_limit_bytes=vmem_limit),
        cost_estimate=cost,
    )(x, wpack)

    loss = jnp.sum(sse) / float(B * T * F)       # tiny G-element reduction
    return loss, recon


# ----------------------------------------------------------------------------
# Pure-JAX reference (same eval-mode semantics, BN scale NOT folded) for a
# correctness check of the fused kernel.
# ----------------------------------------------------------------------------
def tcn_ae_reference(params, x, *, kernel_size):
    T = x.shape[1]

    def conv(v, w, b, dilation):
        acc = None
        for j in range(kernel_size):
            s = (kernel_size - 1 - j) * dilation
            if s >= T:
                continue
            shifted = jnp.pad(v, ((0, 0), (s, 0), (0, 0)))[:, :T, :]
            t = jnp.einsum("btc,co->bto", shifted, w[j])
            acc = t if acc is None else acc + t
        return acc + b

    def block(hh, blk, dilation):
        w1, b1, w2, b2, wd, bd = blk
        res = hh if wd is None else jnp.einsum("btc,co->bto", hh, wd) + bd
        a = jnp.maximum(conv(hh, w1, b1, dilation), 0.0) * BN_SCALE
        a = jnp.maximum(conv(a, w2, b2, dilation), 0.0) * BN_SCALE
        return jnp.maximum(a + res, 0.0)

    hh = x
    for i, blk in enumerate(params["enc_blocks"]):
        hh = block(hh, blk, 2 ** i)
    lw, lb = params["enc_out"]
    hh = jnp.einsum("btc,ce->bte", hh, lw) + lb
    for i, blk in enumerate(params["dec_blocks"]):
        hh = block(hh, blk, 2 ** i)
    lw, lb = params["dec_out"]
    recon = jnp.einsum("btc,cf->btf", hh, lw) + lb
    loss = jnp.mean((recon - x) ** 2)
    return loss, recon


# ----------------------------------------------------------------------------
# Parameter init (deterministic, synthetic — matches module __init__ shapes).
# Conv weights stored tap-major (K, Cin, Cout); PyTorch stores (Cout, Cin, K).
# ----------------------------------------------------------------------------
def _uniform(key, shape, bound):
    return jax.random.uniform(key, shape, jnp.float32, minval=-bound, maxval=bound)


def _init_block(key, in_ch, out_ch, K):
    ks = jax.random.split(key, 6)
    w1 = 0.01 * jax.random.normal(ks[0], (K, in_ch, out_ch), jnp.float32)
    b1 = _uniform(ks[1], (1, out_ch), 1.0 / math.sqrt(in_ch * K))
    w2 = 0.01 * jax.random.normal(ks[2], (K, out_ch, out_ch), jnp.float32)
    b2 = _uniform(ks[3], (1, out_ch), 1.0 / math.sqrt(out_ch * K))
    if in_ch != out_ch:        # downsample 1x1 conv
        wd = 0.01 * jax.random.normal(ks[4], (in_ch, out_ch), jnp.float32)
        bd = _uniform(ks[5], (1, out_ch), 1.0 / math.sqrt(in_ch))
    else:                      # identity residual (no parameters, no matmul)
        wd, bd = None, None
    return (w1, b1, w2, b2, wd, bd)


def _init_stack(key, in_dim, out_dim, hidden_dim, num_layers, K):
    keys = jax.random.split(key, num_layers + 2)
    blocks = []
    for i in range(num_layers):
        in_ch = in_dim if i == 0 else hidden_dim
        blocks.append(_init_block(keys[i], in_ch, hidden_dim, K))
    bound = 1.0 / math.sqrt(hidden_dim)
    lw = _uniform(keys[-2], (hidden_dim, out_dim), bound)
    lb = _uniform(keys[-1], (1, out_dim), bound)
    return blocks, (lw, lb)


def init_tcn_ae(key, n_features, emb_dim, hidden_dim, num_layers, kernel_size):
    ke, kd = jax.random.split(key)
    enc_blocks, enc_out = _init_stack(ke, n_features, emb_dim, hidden_dim,
                                      num_layers, kernel_size)
    dec_blocks, dec_out = _init_stack(kd, emb_dim, n_features, hidden_dim,
                                      num_layers, kernel_size)
    return {"enc_blocks": enc_blocks, "enc_out": enc_out,
            "dec_blocks": dec_blocks, "dec_out": dec_out}


if __name__ == "__main__":
    B, T = 4, 16
    n_features, emb_dim, hidden_dim = 4, 8, 32
    num_layers, kernel_size = 3, 5
    dropout = 0.2   # identity in the eval-mode forward implemented here

    key = jax.random.PRNGKey(0)
    key, xk, pk = jax.random.split(key, 3)
    x = jax.random.normal(xk, (B, T, n_features), dtype=jnp.float32)
    params = init_tcn_ae(pk, n_features, emb_dim, hidden_dim, num_layers,
                         kernel_size)

    fwd = jax.jit(functools.partial(tcn_ae_forward, kernel_size=kernel_size))
    loss, recon = fwd(params, x)
    jax.block_until_ready((loss, recon))

    assert recon.shape == (B, T, n_features)
    assert loss.shape == ()

    # Correctness check against a pure-JAX reference of the same eval forward.
    ref_loss, ref_recon = jax.jit(
        functools.partial(tcn_ae_reference, kernel_size=kernel_size))(params, x)
    jax.block_until_ready((ref_loss, ref_recon))
    assert bool(jnp.allclose(recon, ref_recon, rtol=1e-4, atol=1e-4)), "recon mismatch"
    assert bool(jnp.allclose(loss, ref_loss, rtol=1e-4, atol=1e-5)), "loss mismatch"

    print("KERNEL_OK")
</pallas_src>

<mosaic_0001>
module attributes {stable_mosaic.version = 11 : i64} {
  func.func @_tcn_ae_fused_kernel(%arg0: i32, %arg1: memref<2x16x4xf32, #tpu.memory_space<vmem>>, %arg2: memref<1744x128xf32, #tpu.memory_space<vmem>>, %arg3: memref<2x16x4xf32, #tpu.memory_space<vmem>>, %arg4: memref<1x1x1xf32, #tpu.memory_space<vmem>>) attributes {dimension_semantics = [#tpu.dimension_semantics<parallel>], iteration_bounds = array<i64: 2>, scalar_prefetch = 0 : i64, scratch_operands = 0 : i64, tpu.core_type = #tpu.core_type<tc>, window_params = [{transform_indices = @transform_0, window_bounds = array<i64: 2, 16, 4>}, {pipeline_mode = #tpu.pipeline_mode<synchronous>, transform_indices = @transform_1, window_bounds = array<i64: 1744, 128>}, {transform_indices = @transform_2, window_bounds = array<i64: 2, 16, 4>}, {transform_indices = @transform_3, window_bounds = array<i64: 1, 1, 1>}]} {
    %c0 = arith.constant 0 : index
    %c0_0 = arith.constant 0 : index
    %c0_1 = arith.constant 0 : index
    %0 = vector.load %arg1[%c0, %c0_0, %c0_1] : memref<2x16x4xf32, #tpu.memory_space<vmem>>, vector<2x16x4xf32>
    %c0_2 = arith.constant 0 : index
    %c0_3 = arith.constant 0 : index
    %1 = vector.load %arg2[%c0_2, %c0_3] : memref<1744x128xf32, #tpu.memory_space<vmem>>, vector<20x32xf32>
    %c24 = arith.constant 24 : index
    %c0_4 = arith.constant 0 : index
    %2 = vector.load %arg2[%c24, %c0_4] : memref<1744x128xf32, #tpu.memory_space<vmem>>, vector<1x32xf32>
    %c32 = arith.constant 32 : index
    %c0_5 = arith.constant 0 : index
    %3 = vector.load %arg2[%c32, %c0_5] : memref<1744x128xf32, #tpu.memory_space<vmem>>, vector<160x32xf32>
    %c192 = arith.constant 192 : index
    %c0_6 = arith.constant 0 : index
    %4 = vector.load %arg2[%c192, %c0_6] : memref<1744x128xf32, #tpu.memory_space<vmem>>, vector<1x32xf32>
    %c200 = arith.constant 200 : index
    %c0_7 = arith.constant 0 : index
    %5 = vector.load %arg2[%c200, %c0_7] : memref<1744x128xf32, #tpu.memory_space<vmem>>, vector<4x32xf32>
    %c208 = arith.constant 208 : index
    %c0_8 = arith.constant 0 : index
    %6 = vector.load %arg2[%c208, %c0_8] : memref<1744x128xf32, #tpu.memory_space<vmem>>, vector<1x32xf32>
    %7 = vector.shape_cast %0 : vector<2x16x4xf32> to vector<32x4xf32>
    %cst = arith.constant dense<0.000000e+00> : vector<32x32xf32>
    %8 = tpu.matmul %7, %5, %cst {dimension_numbers = #tpu.dot_dimension_numbers<[1], [0], [0], [1], [0, 0, 1, 1], [], []>} : vector<32x4xf32>, vector<4x32xf32>, vector<32x32xf32> -> vector<32x32xf32>
    %9 = vector.broadcast %6 : vector<1x32xf32> to vector<32x32xf32>
    %10 = arith.addf %8, %9 : vector<32x32xf32>
    %11 = vector.shape_cast %10 : vector<32x32xf32> to vector<2x16x32xf32>
    %cst_9 = arith.constant 0.000000e+00 : f32
    %12 = vector.broadcast %cst_9 : f32 to vector<2x4x4xf32>
    %13 = tpu.concatenate %12, %0 in 1 : vector<2x4x4xf32>, vector<2x16x4xf32> -> vector<2x20x4xf32>
    %14 = vector.extract_strided_slice %13 {offsets = [0, 0, 0], sizes = [2, 16, 4], strides = [1, 1, 1]} : vector<2x20x4xf32> to vector<2x16x4xf32>
    %15 = vector.extract_strided_slice %13 {offsets = [0, 1, 0], sizes = [2, 16, 4], strides = [1, 1, 1]} : vector<2x20x4xf32> to vector<2x16x4xf32>
    %16 = vector.extract_strided_slice %13 {offsets = [0, 2, 0], sizes = [2, 16, 4], strides = [1, 1, 1]} : vector<2x20x4xf32> to vector<2x16x4xf32>
    %17 = vector.extract_strided_slice %13 {offsets = [0, 3, 0], sizes = [2, 16, 4], strides = [1, 1, 1]} : vector<2x20x4xf32> to vector<2x16x4xf32>
    %18 = vector.extract_strided_slice %13 {offsets = [0, 4, 0], sizes = [2, 16, 4], strides = [1, 1, 1]} : vector<2x20x4xf32> to vector<2x16x4xf32>
    %19 = tpu.concatenate %14, %15, %16, %17, %18 in 2 : vector<2x16x4xf32>, vector<2x16x4xf32>, vector<2x16x4xf32>, vector<2x16x4xf32>, vector<2x16x4xf32> -> vector<2x16x20xf32>
    %20 = vector.shape_cast %19 : vector<2x16x20xf32> to vector<32x20xf32>
    %cst_10 = arith.constant dense<0.000000e+00> : vector<32x32xf32>
    %21 = tpu.matmul %20, %1, %cst_10 {dimension_numbers = #tpu.dot_dimension_numbers<[1], [0], [0], [1], [0, 0, 1, 1], [], []>} : vector<32x20xf32>, vector<20x32xf32>, vector<32x32xf32> -> vector<32x32xf32>
    %22 = vector.broadcast %2 : vector<1x32xf32> to vector<32x32xf32>
    %23 = arith.addf %21, %22 : vector<32x32xf32>
    %24 = vector.shape_cast %23 : vector<32x32xf32> to vector<2x16x32xf32>
    %cst_11 = arith.constant 0.000000e+00 : f32
    %25 = vector.broadcast %cst_11 : f32 to vector<2x16x32xf32>
    %26 = arith.maximumf %24, %25 : vector<2x16x32xf32>
    %cst_12 = arith.constant 0.000000e+00 : f32
    %27 = vector.broadcast %cst_12 : f32 to vector<2x4x32xf32>
    %28 = tpu.concatenate %27, %26 in 1 : vector<2x4x32xf32>, vector<2x16x32xf32> -> vector<2x20x32xf32>
    %29 = vector.extract_strided_slice %28 {offsets = [0, 0, 0], sizes = [2, 16, 32], strides = [1, 1, 1]} : vector<2x20x32xf32> to vector<2x16x32xf32>
    %30 = vector.extract_strided_slice %28 {offsets = [0, 1, 0], sizes = [2, 16, 32], strides = [1, 1, 1]} : vector<2x20x32xf32> to vector<2x16x32xf32>
    %31 = vector.extract_strided_slice %28 {offsets = [0, 2, 0], sizes = [2, 16, 32], strides = [1, 1, 1]} : vector<2x20x32xf32> to vector<2x16x32xf32>
    %32 = vector.extract_strided_slice %28 {offsets = [0, 3, 0], sizes = [2, 16, 32], strides = [1, 1, 1]} : vector<2x20x32xf32> to vector<2x16x32xf32>
    %33 = vector.extract_strided_slice %28 {offsets = [0, 4, 0], sizes = [2, 16, 32], strides = [1, 1, 1]} : vector<2x20x32xf32> to vector<2x16x32xf32>
    %34 = tpu.concatenate %29, %30, %31, %32, %33 in 2 : vector<2x16x32xf32>, vector<2x16x32xf32>, vector<2x16x32xf32>, vector<2x16x32xf32>, vector<2x16x32xf32> -> vector<2x16x160xf32>
    %35 = vector.shape_cast %34 : vector<2x16x160xf32> to vector<32x160xf32>
    %cst_13 = arith.constant dense<0.000000e+00> : vector<32x32xf32>
    %36 = tpu.matmul %35, %3, %cst_13 {dimension_numbers = #tpu.dot_dimension_numbers<[1], [0], [0], [1], [0, 0, 1, 1], [], []>} : vector<32x160xf32>, vector<160x32xf32>, vector<32x32xf32> -> vector<32x32xf32>
    %37 = vector.broadcast %4 : vector<1x32xf32> to vector<32x32xf32>
    %38 = arith.addf %36, %37 : vector<32x32xf32>
    %39 = vector.shape_cast %38 : vector<32x32xf32> to vector<2x16x32xf32>
    %cst_14 = arith.constant 0.000000e+00 : f32
    %40 = vector.broadcast %cst_14 : f32 to vector<2x16x32xf32>
    %41 = arith.maximumf %39, %40 : vector<2x16x32xf32>
    %42 = arith.addf %41, %11 : vector<2x16x32xf32>
    %cst_15 = arith.constant 0.000000e+00 : f32
    %43 = vector.broadcast %cst_15 : f32 to vector<2x16x32xf32>
    %44 = arith.maximumf %42, %43 : vector<2x16x32xf32>
    %c216 = arith.constant 216 : index
    %c0_16 = arith.constant 0 : index
    %45 = vector.load %arg2[%c216, %c0_16] : memref<1744x128xf32, #tpu.memory_space<vmem>>, vector<160x32xf32>
    %c376 = arith.constant 376 : index
    %c0_17 = arith.constant 0 : index
    %46 = vector.load %arg2[%c376, %c0_17] : memref<1744x128xf32, #tpu.memory_space<vmem>>, vector<1x32xf32>
    %c384 = arith.constant 384 : index
    %c0_18 = arith.constant 0 : index
    %47 = vector.load %arg2[%c384, %c0_18] : memref<1744x128xf32, #tpu.memory_space<vmem>>, vector<160x32xf32>
    %c544 = arith.constant 544 : index
    %c0_19 = arith.constant 0 : index
    %48 = vector.load %arg2[%c544, %c0_19] : memref<1744x128xf32, #tpu.memory_space<vmem>>, vector<1x32xf32>
    %cst_20 = arith.constant 0.000000e+00 : f32
    %49 = vector.broadcast %cst_20 : f32 to vector<2x8x32xf32>
    %50 = tpu.concatenate %49, %44 in 1 : vector<2x8x32xf32>, vector<2x16x32xf32> -> vector<2x24x32xf32>
    %51 = vector.extract_strided_slice %50 {offsets = [0, 0, 0], sizes = [2, 16, 32], strides = [1, 1, 1]} : vector<2x24x32xf32> to vector<2x16x32xf32>
    %52 = vector.extract_strided_slice %50 {offsets = [0, 2, 0], sizes = [2, 16, 32], strides = [1, 1, 1]} : vector<2x24x32xf32> to vector<2x16x32xf32>
    %53 = vector.extract_strided_slice %50 {offsets = [0, 4, 0], sizes = [2, 16, 32], strides = [1, 1, 1]} : vector<2x24x32xf32> to vector<2x16x32xf32>
    %54 = vector.extract_strided_slice %50 {offsets = [0, 6, 0], sizes = [2, 16, 32], strides = [1, 1, 1]} : vector<2x24x32xf32> to vector<2x16x32xf32>
    %55 = vector.extract_strided_slice %50 {offsets = [0, 8, 0], sizes = [2, 16, 32], strides = [1, 1, 1]} : vector<2x24x32xf32> to vector<2x16x32xf32>
    %56 = tpu.concatenate %51, %52, %53, %54, %55 in 2 : vector<2x16x32xf32>, vector<2x16x32xf32>, vector<2x16x32xf32>, vector<2x16x32xf32>, vector<2x16x32xf32> -> vector<2x16x160xf32>
    %57 = vector.shape_cast %56 : vector<2x16x160xf32> to vector<32x160xf32>
    %cst_21 = arith.constant dense<0.000000e+00> : vector<32x32xf32>
    %58 = tpu.matmul %57, %45, %cst_21 {dimension_numbers = #tpu.dot_dimension_numbers<[1], [0], [0], [1], [0, 0, 1, 1], [], []>} : vector<32x160xf32>, vector<160x32xf32>, vector<32x32xf32> -> vector<32x32xf32>
    %59 = vector.broadcast %46 : vector<1x32xf32> to vector<32x32xf32>
    %60 = arith.addf %58, %59 : vector<32x32xf32>
    %61 = vector.shape_cast %60 : vector<32x32xf32> to vector<2x16x32xf32>
    %cst_22 = arith.constant 0.000000e+00 : f32
    %62 = vector.broadcast %cst_22 : f32 to vector<2x16x32xf32>
    %63 = arith.maximumf %61, %62 : vector<2x16x32xf32>
    %cst_23 = arith.constant 0.000000e+00 : f32
    %64 = vector.broadcast %cst_23 : f32 to vector<2x8x32xf32>
    %65 = tpu.concatenate %64, %63 in 1 : vector<2x8x32xf32>, vector<2x16x32xf32> -> vector<2x24x32xf32>
    %66 = vector.extract_strided_slice %65 {offsets = [0, 0, 0], sizes = [2, 16, 32], strides = [1, 1, 1]} : vector<2x24x32xf32> to vector<2x16x32xf32>
    %67 = vector.extract_strided_slice %65 {offsets = [0, 2, 0], sizes = [2, 16, 32], strides = [1, 1, 1]} : vector<2x24x32xf32> to vector<2x16x32xf32>
    %68 = vector.extract_strided_slice %65 {offsets = [0, 4, 0], sizes = [2, 16, 32], strides = [1, 1, 1]} : vector<2x24x32xf32> to vector<2x16x32xf32>
    %69 = vector.extract_strided_slice %65 {offsets = [0, 6, 0], sizes = [2, 16, 32], strides = [1, 1, 1]} : vector<2x24x32xf32> to vector<2x16x32xf32>
    %70 = vector.extract_strided_slice %65 {offsets = [0, 8, 0], sizes = [2, 16, 32], strides = [1, 1, 1]} : vector<2x24x32xf32> to vector<2x16x32xf32>
    %71 = tpu.concatenate %66, %67, %68, %69, %70 in 2 : vector<2x16x32xf32>, vector<2x16x32xf32>, vector<2x16x32xf32>, vector<2x16x32xf32>, vector<2x16x32xf32> -> vector<2x16x160xf32>
    %72 = vector.shape_cast %71 : vector<2x16x160xf32> to vector<32x160xf32>
    %cst_24 = arith.constant dense<0.000000e+00> : vector<32x32xf32>
    %73 = tpu.matmul %72, %47, %cst_24 {dimension_numbers = #tpu.dot_dimension_numbers<[1], [0], [0], [1], [0, 0, 1, 1], [], []>} : vector<32x160xf32>, vector<160x32xf32>, vector<32x32xf32> -> vector<32x32xf32>
    %74 = vector.broadcast %48 : vector<1x32xf32> to vector<32x32xf32>
    %75 = arith.addf %73, %74 : vector<32x32xf32>
    %76 = vector.shape_cast %75 : vector<32x32xf32> to vector<2x16x32xf32>
    %cst_25 = arith.constant 0.000000e+00 : f32
    %77 = vector.broadcast %cst_25 : f32 to vector<2x16x32xf32>
    %78 = arith.maximumf %76, %77 : vector<2x16x32xf32>
    %79 = arith.addf %78, %44 : vector<2x16x32xf32>
    %cst_26 = arith.constant 0.000000e+00 : f32
    %80 = vector.broadcast %cst_26 : f32 to vector<2x16x32xf32>
    %81 = arith.maximumf %79, %80 : vector<2x16x32xf32>
    %c552 = arith.constant 552 : index
    %c0_27 = arith.constant 0 : index
    %82 = vector.load %arg2[%c552, %c0_27] : memref<1744x128xf32, #tpu.memory_space<vmem>>, vector<128x32xf32>
    %c680 = arith.constant 680 : index
    %c0_28 = arith.constant 0 : index
    %83 = vector.load %arg2[%c680, %c0_28] : memref<1744x128xf32, #tpu.memory_space<vmem>>, vector<1x32xf32>
    %c688 = arith.constant 688 : index
    %c0_29 = arith.constant 0 : index
    %84 = vector.load %arg2[%c688, %c0_29] : memref<1744x128xf32, #tpu.memory_space<vmem>>, vector<128x32xf32>
    %c816 = arith.constant 816 : index
    %c0_30 = arith.constant 0 : index
    %85 = vector.load %arg2[%c816, %c0_30] : memref<1744x128xf32, #tpu.memory_space<vmem>>, vector<1x32xf32>
    %cst_31 = arith.constant 0.000000e+00 : f32
    %86 = vector.broadcast %cst_31 : f32 to vector<2x12x32xf32>
    %87 = tpu.concatenate %86, %81 in 1 : vector<2x12x32xf32>, vector<2x16x32xf32> -> vector<2x28x32xf32>
    %88 = vector.extract_strided_slice %87 {offsets = [0, 0, 0], sizes = [2, 16, 32], strides = [1, 1, 1]} : vector<2x28x32xf32> to vector<2x16x32xf32>
    %89 = vector.extract_strided_slice %87 {offsets = [0, 4, 0], sizes = [2, 16, 32], strides = [1, 1, 1]} : vector<2x28x32xf32> to vector<2x16x32xf32>
    %90 = vector.extract_strided_slice %87 {offsets = [0, 8, 0], sizes = [2, 16, 32], strides = [1, 1, 1]} : vector<2x28x32xf32> to vector<2x16x32xf32>
    %91 = vector.extract_strided_slice %87 {offsets = [0, 12, 0], sizes = [2, 16, 32], strides = [1, 1, 1]} : vector<2x28x32xf32> to vector<2x16x32xf32>
    %92 = tpu.concatenate %88, %89, %90, %91 in 2 : vector<2x16x32xf32>, vector<2x16x32xf32>, vector<2x16x32xf32>, vector<2x16x32xf32> -> vector<2x16x128xf32>
    %93 = vector.shape_cast %92 : vector<2x16x128xf32> to vector<32x128xf32>
    %cst_32 = arith.constant dense<0.000000e+00> : vector<32x32xf32>
    %94 = tpu.matmul %93, %82, %cst_32 {dimension_numbers = #tpu.dot_dimension_numbers<[1], [0], [0], [1], [0, 0, 1, 1], [], []>} : vector<32x128xf32>, vector<128x32xf32>, vector<32x32xf32> -> vector<32x32xf32>
    %95 = vector.broadcast %83 : vector<1x32xf32> to vector<32x32xf32>
    %96 = arith.addf %94, %95 : vector<32x32xf32>
    %97 = vector.shape_cast %96 : vector<32x32xf32> to vector<2x16x32xf32>
    %cst_33 = arith.constant 0.000000e+00 : f32
    %98 = vector.broadcast %cst_33 : f32 to vector<2x16x32xf32>
    %99 = arith.maximumf %97, %98 : vector<2x16x32xf32>
    %cst_34 = arith.constant 0.000000e+00 : f32
    %100 = vector.broadcast %cst_34 : f32 to vector<2x12x32xf32>
    %101 = tpu.concatenate %100, %99 in 1 : vector<2x12x32xf32>, vector<2x16x32xf32> -> vector<2x28x32xf32>
    %102 = vector.extract_strided_slice %101 {offsets = [0, 0, 0], sizes = [2, 16, 32], strides = [1, 1, 1]} : vector<2x28x32xf32> to vector<2x16x32xf32>
    %103 = vector.extract_strided_slice %101 {offsets = [0, 4, 0], sizes = [2, 16, 32], strides = [1, 1, 1]} : vector<2x28x32xf32> to vector<2x16x32xf32>
    %104 = vector.extract_strided_slice %101 {offsets = [0, 8, 0], sizes = [2, 16, 32], strides = [1, 1, 1]} : vector<2x28x32xf32> to vector<2x16x32xf32>
    %105 = vector.extract_strided_slice %101 {offsets = [0, 12, 0], sizes = [2, 16, 32], strides = [1, 1, 1]} : vector<2x28x32xf32> to vector<2x16x32xf32>
    %106 = tpu.concatenate %102, %103, %104, %105 in 2 : vector<2x16x32xf32>, vector<2x16x32xf32>, vector<2x16x32xf32>, vector<2x16x32xf32> -> vector<2x16x128xf32>
    %107 = vector.shape_cast %106 : vector<2x16x128xf32> to vector<32x128xf32>
    %cst_35 = arith.constant dense<0.000000e+00> : vector<32x32xf32>
    %108 = tpu.matmul %107, %84, %cst_35 {dimension_numbers = #tpu.dot_dimension_numbers<[1], [0], [0], [1], [0, 0, 1, 1], [], []>} : vector<32x128xf32>, vector<128x32xf32>, vector<32x32xf32> -> vector<32x32xf32>
    %109 = vector.broadcast %85 : vector<1x32xf32> to vector<32x32xf32>
    %110 = arith.addf %108, %109 : vector<32x32xf32>
    %111 = vector.shape_cast %110 : vector<32x32xf32> to vector<2x16x32xf32>
    %cst_36 = arith.constant 0.000000e+00 : f32
    %112 = vector.broadcast %cst_36 : f32 to vector<2x16x32xf32>
    %113 = arith.maximumf %111, %112 : vector<2x16x32xf32>
    %114 = arith.addf %113, %81 : vector<2x16x32xf32>
    %cst_37 = arith.constant 0.000000e+00 : f32
    %115 = vector.broadcast %cst_37 : f32 to vector<2x16x32xf32>
    %116 = arith.maximumf %114, %115 : vector<2x16x32xf32>
    %c824 = arith.constant 824 : index
    %c0_38 = arith.constant 0 : index
    %117 = vector.load %arg2[%c824, %c0_38] : memref<1744x128xf32, #tpu.memory_space<vmem>>, vector<32x8xf32>
    %c856 = arith.constant 856 : index
    %c0_39 = arith.constant 0 : index
    %118 = vector.load %arg2[%c856, %c0_39] : memref<1744x128xf32, #tpu.memory_space<vmem>>, vector<1x8xf32>
    %119 = vector.shape_cast %116 : vector<2x16x32xf32> to vector<32x32xf32>
    %cst_40 = arith.constant dense<0.000000e+00> : vector<32x8xf32>
    %120 = tpu.matmul %119, %117, %cst_40 {dimension_numbers = #tpu.dot_dimension_numbers<[1], [0], [0], [1], [0, 0, 1, 1], [], []>} : vector<32x32xf32>, vector<32x8xf32>, vector<32x8xf32> -> vector<32x8xf32>
    %121 = vector.broadcast %118 : vector<1x8xf32> to vector<32x8xf32>
    %122 = arith.addf %120, %121 : vector<32x8xf32>
    %123 = vector.shape_cast %122 : vector<32x8xf32> to vector<2x16x8xf32>
    %c864 = arith.constant 864 : index
    %c0_41 = arith.constant 0 : index
    %124 = vector.load %arg2[%c864, %c0_41] : memref<1744x128xf32, #tpu.memory_space<vmem>>, vector<40x32xf32>
    %c904 = arith.constant 904 : index
    %c0_42 = arith.constant 0 : index
    %125 = vector.load %arg2[%c904, %c0_42] : memref<1744x128xf32, #tpu.memory_space<vmem>>, vector<1x32xf32>
    %c912 = arith.constant 912 : index
    %c0_43 = arith.constant 0 : index
    %126 = vector.load %arg2[%c912, %c0_43] : memref<1744x128xf32, #tpu.memory_space<vmem>>, vector<160x32xf32>
    %c1072 = arith.constant 1072 : index
    %c0_44 = arith.constant 0 : index
    %127 = vector.load %arg2[%c1072, %c0_44] : memref<1744x128xf32, #tpu.memory_space<vmem>>, vector<1x32xf32>
    %c1080 = arith.constant 1080 : index
    %c0_45 = arith.constant 0 : index
    %128 = vector.load %arg2[%c1080, %c0_45] : memref<1744x128xf32, #tpu.memory_space<vmem>>, vector<8x32xf32>
    %c1088 = arith.constant 1088 : index
    %c0_46 = arith.constant 0 : index
    %129 = vector.load %arg2[%c1088, %c0_46] : memref<1744x128xf32, #tpu.memory_space<vmem>>, vector<1x32xf32>
    %130 = vector.shape_cast %123 : vector<2x16x8xf32> to vector<32x8xf32>
    %cst_47 = arith.constant dense<0.000000e+00> : vector<32x32xf32>
    %131 = tpu.matmul %130, %128, %cst_47 {dimension_numbers = #tpu.dot_dimension_numbers<[1], [0], [0], [1], [0, 0, 1, 1], [], []>} : vector<32x8xf32>, vector<8x32xf32>, vector<32x32xf32> -> vector<32x32xf32>
    %132 = vector.broadcast %129 : vector<1x32xf32> to vector<32x32xf32>
    %133 = arith.addf %131, %132 : vector<32x32xf32>
    %134 = vector.shape_cast %133 : vector<32x32xf32> to vector<2x16x32xf32>
    %cst_48 = arith.constant 0.000000e+00 : f32
    %135 = vector.broadcast %cst_48 : f32 to vector<2x4x8xf32>
    %136 = tpu.concatenate %135, %123 in 1 : vector<2x4x8xf32>, vector<2x16x8xf32> -> vector<2x20x8xf32>
    %137 = vector.extract_strided_slice %136 {offsets = [0, 0, 0], sizes = [2, 16, 8], strides = [1, 1, 1]} : vector<2x20x8xf32> to vector<2x16x8xf32>
    %138 = vector.extract_strided_slice %136 {offsets = [0, 1, 0], sizes = [2, 16, 8], strides = [1, 1, 1]} : vector<2x20x8xf32> to vector<2x16x8xf32>
    %139 = vector.extract_strided_slice %136 {offsets = [0, 2, 0], sizes = [2, 16, 8], strides = [1, 1, 1]} : vector<2x20x8xf32> to vector<2x16x8xf32>
    %140 = vector.extract_strided_slice %136 {offsets = [0, 3, 0], sizes = [2, 16, 8], strides = [1, 1, 1]} : vector<2x20x8xf32> to vector<2x16x8xf32>
    %141 = vector.extract_strided_slice %136 {offsets = [0, 4, 0], sizes = [2, 16, 8], strides = [1, 1, 1]} : vector<2x20x8xf32> to vector<2x16x8xf32>
    %142 = tpu.concatenate %137, %138, %139, %140, %141 in 2 : vector<2x16x8xf32>, vector<2x16x8xf32>, vector<2x16x8xf32>, vector<2x16x8xf32>, vector<2x16x8xf32> -> vector<2x16x40xf32>
    %143 = vector.shape_cast %142 : vector<2x16x40xf32> to vector<32x40xf32>
    %cst_49 = arith.constant dense<0.000000e+00> : vector<32x32xf32>
    %144 = tpu.matmul %143, %124, %cst_49 {dimension_numbers = #tpu.dot_dimension_numbers<[1], [0], [0], [1], [0, 0, 1, 1], [], []>} : vector<32x40xf32>, vector<40x32xf32>, vector<32x32xf32> -> vector<32x32xf32>
    %145 = vector.broadcast %125 : vector<1x32xf32> to vector<32x32xf32>
    %146 = arith.addf %144, %145 : vector<32x32xf32>
    %147 = vector.shape_cast %146 : vector<32x32xf32> to vector<2x16x32xf32>
    %cst_50 = arith.constant 0.000000e+00 : f32
    %148 = vector.broadcast %cst_50 : f32 to vector<2x16x32xf32>
    %149 = arith.maximumf %147, %148 : vector<2x16x32xf32>
    %cst_51 = arith.constant 0.000000e+00 : f32
    %150 = vector.broadcast %cst_51 : f32 to vector<2x4x32xf32>
    %151 = tpu.concatenate %150, %149 in 1 : vector<2x4x32xf32>, vector<2x16x32xf32> -> vector<2x20x32xf32>
    %152 = vector.extract_strided_slice %151 {offsets = [0, 0, 0], sizes = [2, 16, 32], strides = [1, 1, 1]} : vector<2x20x32xf32> to vector<2x16x32xf32>
    %153 = vector.extract_strided_slice %151 {offsets = [0, 1, 0], sizes = [2, 16, 32], strides = [1, 1, 1]} : vector<2x20x32xf32> to vector<2x16x32xf32>
    %154 = vector.extract_strided_slice %151 {offsets = [0, 2, 0], sizes = [2, 16, 32], strides = [1, 1, 1]} : vector<2x20x32xf32> to vector<2x16x32xf32>
    %155 = vector.extract_strided_slice %151 {offsets = [0, 3, 0], sizes = [2, 16, 32], strides = [1, 1, 1]} : vector<2x20x32xf32> to vector<2x16x32xf32>
    %156 = vector.extract_strided_slice %151 {offsets = [0, 4, 0], sizes = [2, 16, 32], strides = [1, 1, 1]} : vector<2x20x32xf32> to vector<2x16x32xf32>
    %157 = tpu.concatenate %152, %153, %154, %155, %156 in 2 : vector<2x16x32xf32>, vector<2x16x32xf32>, vector<2x16x32xf32>, vector<2x16x32xf32>, vector<2x16x32xf32> -> vector<2x16x160xf32>
    %158 = vector.shape_cast %157 : vector<2x16x160xf32> to vector<32x160xf32>
    %cst_52 = arith.constant dense<0.000000e+00> : vector<32x32xf32>
    %159 = tpu.matmul %158, %126, %cst_52 {dimension_numbers = #tpu.dot_dimension_numbers<[1], [0], [0], [1], [0, 0, 1, 1], [], []>} : vector<32x160xf32>, vector<160x32xf32>, vector<32x32xf32> -> vector<32x32xf32>
    %160 = vector.broadcast %127 : vector<1x32xf32> to vector<32x32xf32>
    %161 = arith.addf %159, %160 : vector<32x32xf32>
    %162 = vector.shape_cast %161 : vector<32x32xf32> to vector<2x16x32xf32>
    %cst_53 = arith.constant 0.000000e+00 : f32
    %163 = vector.broadcast %cst_53 : f32 to vector<2x16x32xf32>
    %164 = arith.maximumf %162, %163 : vector<2x16x32xf32>
    %165 = arith.addf %164, %134 : vector<2x16x32xf32>
    %cst_54 = arith.constant 0.000000e+00 : f32
    %166 = vector.broadcast %cst_54 : f32 to vector<2x16x32xf32>
    %167 = arith.maximumf %165, %166 : vector<2x16x32xf32>
    %c1096 = arith.constant 1096 : index
    %c0_55 = arith.constant 0 : index
    %168 = vector.load %arg2[%c1096, %c0_55] : memref<1744x128xf32, #tpu.memory_space<vmem>>, vector<160x32xf32>
    %c1256 = arith.constant 1256 : index
    %c0_56 = arith.constant 0 : index
    %169 = vector.load %arg2[%c1256, %c0_56] : memref<1744x128xf32, #tpu.memory_space<vmem>>, vector<1x32xf32>
    %c1264 = arith.constant 1264 : index
    %c0_57 = arith.constant 0 : index
    %170 = vector.load %arg2[%c1264, %c0_57] : memref<1744x128xf32, #tpu.memory_space<vmem>>, vector<160x32xf32>
    %c1424 = arith.constant 1424 : index
    %c0_58 = arith.constant 0 : index
    %171 = vector.load %arg2[%c1424, %c0_58] : memref<1744x128xf32, #tpu.memory_space<vmem>>, vector<1x32xf32>
    %cst_59 = arith.constant 0.000000e+00 : f32
    %172 = vector.broadcast %cst_59 : f32 to vector<2x8x32xf32>
    %173 = tpu.concatenate %172, %167 in 1 : vector<2x8x32xf32>, vector<2x16x32xf32> -> vector<2x24x32xf32>
    %174 = vector.extract_strided_slice %173 {offsets = [0, 0, 0], sizes = [2, 16, 32], strides = [1, 1, 1]} : vector<2x24x32xf32> to vector<2x16x32xf32>
    %175 = vector.extract_strided_slice %173 {offsets = [0, 2, 0], sizes = [2, 16, 32], strides = [1, 1, 1]} : vector<2x24x32xf32> to vector<2x16x32xf32>
    %176 = vector.extract_strided_slice %173 {offsets = [0, 4, 0], sizes = [2, 16, 32], strides = [1, 1, 1]} : vector<2x24x32xf32> to vector<2x16x32xf32>
    %177 = vector.extract_strided_slice %173 {offsets = [0, 6, 0], sizes = [2, 16, 32], strides = [1, 1, 1]} : vector<2x24x32xf32> to vector<2x16x32xf32>
    %178 = vector.extract_strided_slice %173 {offsets = [0, 8, 0], sizes = [2, 16, 32], strides = [1, 1, 1]} : vector<2x24x32xf32> to vector<2x16x32xf32>
    %179 = tpu.concatenate %174, %175, %176, %177, %178 in 2 : vector<2x16x32xf32>, vector<2x16x32xf32>, vector<2x16x32xf32>, vector<2x16x32xf32>, vector<2x16x32xf32> -> vector<2x16x160xf32>
    %180 = vector.shape_cast %179 : vector<2x16x160xf32> to vector<32x160xf32>
    %cst_60 = arith.constant dense<0.000000e+00> : vector<32x32xf32>
    %181 = tpu.matmul %180, %168, %cst_60 {dimension_numbers = #tpu.dot_dimension_numbers<[1], [0], [0], [1], [0, 0, 1, 1], [], []>} : vector<32x160xf32>, vector<160x32xf32>, vector<32x32xf32> -> vector<32x32xf32>
    %182 = vector.broadcast %169 : vector<1x32xf32> to vector<32x32xf32>
    %183 = arith.addf %181, %182 : vector<32x32xf32>
    %184 = vector.shape_cast %183 : vector<32x32xf32> to vector<2x16x32xf32>
    %cst_61 = arith.constant 0.000000e+00 : f32
    %185 = vector.broadcast %cst_61 : f32 to vector<2x16x32xf32>
    %186 = arith.maximumf %184, %185 : vector<2x16x32xf32>
    %cst_62 = arith.constant 0.000000e+00 : f32
    %187 = vector.broadcast %cst_62 : f32 to vector<2x8x32xf32>
    %188 = tpu.concatenate %187, %186 in 1 : vector<2x8x32xf32>, vector<2x16x32xf32> -> vector<2x24x32xf32>
    %189 = vector.extract_strided_slice %188 {offsets = [0, 0, 0], sizes = [2, 16, 32], strides = [1, 1, 1]} : vector<2x24x32xf32> to vector<2x16x32xf32>
    %190 = vector.extract_strided_slice %188 {offsets = [0, 2, 0], sizes = [2, 16, 32], strides = [1, 1, 1]} : vector<2x24x32xf32> to vector<2x16x32xf32>
    %191 = vector.extract_strided_slice %188 {offsets = [0, 4, 0], sizes = [2, 16, 32], strides = [1, 1, 1]} : vector<2x24x32xf32> to vector<2x16x32xf32>
    %192 = vector.extract_strided_slice %188 {offsets = [0, 6, 0], sizes = [2, 16, 32], strides = [1, 1, 1]} : vector<2x24x32xf32> to vector<2x16x32xf32>
    %193 = vector.extract_strided_slice %188 {offsets = [0, 8, 0], sizes = [2, 16, 32], strides = [1, 1, 1]} : vector<2x24x32xf32> to vector<2x16x32xf32>
    %194 = tpu.concatenate %189, %190, %191, %192, %193 in 2 : vector<2x16x32xf32>, vector<2x16x32xf32>, vector<2x16x32xf32>, vector<2x16x32xf32>, vector<2x16x32xf32> -> vector<2x16x160xf32>
    %195 = vector.shape_cast %194 : vector<2x16x160xf32> to vector<32x160xf32>
    %cst_63 = arith.constant dense<0.000000e+00> : vector<32x32xf32>
    %196 = tpu.matmul %195, %170, %cst_63 {dimension_numbers = #tpu.dot_dimension_numbers<[1], [0], [0], [1], [0, 0, 1, 1], [], []>} : vector<32x160xf32>, vector<160x32xf32>, vector<32x32xf32> -> vector<32x32xf32>
    %197 = vector.broadcast %171 : vector<1x32xf32> to vector<32x32xf32>
    %198 = arith.addf %196, %197 : vector<32x32xf32>
    %199 = vector.shape_cast %198 : vector<32x32xf32> to vector<2x16x32xf32>
    %cst_64 = arith.constant 0.000000e+00 : f32
    %200 = vector.broadcast %cst_64 : f32 to vector<2x16x32xf32>
    %201 = arith.maximumf %199, %200 : vector<2x16x32xf32>
    %202 = arith.addf %201, %167 : vector<2x16x32xf32>
    %cst_65 = arith.constant 0.000000e+00 : f32
    %203 = vector.broadcast %cst_65 : f32 to vector<2x16x32xf32>
    %204 = arith.maximumf %202, %203 : vector<2x16x32xf32>
    %c1432 = arith.constant 1432 : index
    %c0_66 = arith.constant 0 : index
    %205 = vector.load %arg2[%c1432, %c0_66] : memref<1744x128xf32, #tpu.memory_space<vmem>>, vector<128x32xf32>
    %c1560 = arith.constant 1560 : index
    %c0_67 = arith.constant 0 : index
    %206 = vector.load %arg2[%c1560, %c0_67] : memref<1744x128xf32, #tpu.memory_space<vmem>>, vector<1x32xf32>
    %c1568 = arith.constant 1568 : index
    %c0_68 = arith.constant 0 : index
    %207 = vector.load %arg2[%c1568, %c0_68] : memref<1744x128xf32, #tpu.memory_space<vmem>>, vector<128x32xf32>
    %c1696 = arith.constant 1696 : index
    %c0_69 = arith.constant 0 : index
    %208 = vector.load %arg2[%c1696, %c0_69] : memref<1744x128xf32, #tpu.memory_space<vmem>>, vector<1x32xf32>
    %cst_70 = arith.constant 0.000000e+00 : f32
    %209 = vector.broadcast %cst_70 : f32 to vector<2x12x32xf32>
    %210 = tpu.concatenate %209, %204 in 1 : vector<2x12x32xf32>, vector<2x16x32xf32> -> vector<2x28x32xf32>
    %211 = vector.extract_strided_slice %210 {offsets = [0, 0, 0], sizes = [2, 16, 32], strides = [1, 1, 1]} : vector<2x28x32xf32> to vector<2x16x32xf32>
    %212 = vector.extract_strided_slice %210 {offsets = [0, 4, 0], sizes = [2, 16, 32], strides = [1, 1, 1]} : vector<2x28x32xf32> to vector<2x16x32xf32>
    %213 = vector.extract_strided_slice %210 {offsets = [0, 8, 0], sizes = [2, 16, 32], strides = [1, 1, 1]} : vector<2x28x32xf32> to vector<2x16x32xf32>
    %214 = vector.extract_strided_slice %210 {offsets = [0, 12, 0], sizes = [2, 16, 32], strides = [1, 1, 1]} : vector<2x28x32xf32> to vector<2x16x32xf32>
    %215 = tpu.concatenate %211, %212, %213, %214 in 2 : vector<2x16x32xf32>, vector<2x16x32xf32>, vector<2x16x32xf32>, vector<2x16x32xf32> -> vector<2x16x128xf32>
    %216 = vector.shape_cast %215 : vector<2x16x128xf32> to vector<32x128xf32>
    %cst_71 = arith.constant dense<0.000000e+00> : vector<32x32xf32>
    %217 = tpu.matmul %216, %205, %cst_71 {dimension_numbers = #tpu.dot_dimension_numbers<[1], [0], [0], [1], [0, 0, 1, 1], [], []>} : vector<32x128xf32>, vector<128x32xf32>, vector<32x32xf32> -> vector<32x32xf32>
    %218 = vector.broadcast %206 : vector<1x32xf32> to vector<32x32xf32>
    %219 = arith.addf %217, %218 : vector<32x32xf32>
    %220 = vector.shape_cast %219 : vector<32x32xf32> to vector<2x16x32xf32>
    %cst_72 = arith.constant 0.000000e+00 : f32
    %221 = vector.broadcast %cst_72 : f32 to vector<2x16x32xf32>
    %222 = arith.maximumf %220, %221 : vector<2x16x32xf32>
    %cst_73 = arith.constant 0.000000e+00 : f32
    %223 = vector.broadcast %cst_73 : f32 to vector<2x12x32xf32>
    %224 = tpu.concatenate %223, %222 in 1 : vector<2x12x32xf32>, vector<2x16x32xf32> -> vector<2x28x32xf32>
    %225 = vector.extract_strided_slice %224 {offsets = [0, 0, 0], sizes = [2, 16, 32], strides = [1, 1, 1]} : vector<2x28x32xf32> to vector<2x16x32xf32>
    %226 = vector.extract_strided_slice %224 {offsets = [0, 4, 0], sizes = [2, 16, 32], strides = [1, 1, 1]} : vector<2x28x32xf32> to vector<2x16x32xf32>
    %227 = vector.extract_strided_slice %224 {offsets = [0, 8, 0], sizes = [2, 16, 32], strides = [1, 1, 1]} : vector<2x28x32xf32> to vector<2x16x32xf32>
    %228 = vector.extract_strided_slice %224 {offsets = [0, 12, 0], sizes = [2, 16, 32], strides = [1, 1, 1]} : vector<2x28x32xf32> to vector<2x16x32xf32>
    %229 = tpu.concatenate %225, %226, %227, %228 in 2 : vector<2x16x32xf32>, vector<2x16x32xf32>, vector<2x16x32xf32>, vector<2x16x32xf32> -> vector<2x16x128xf32>
    %230 = vector.shape_cast %229 : vector<2x16x128xf32> to vector<32x128xf32>
    %cst_74 = arith.constant dense<0.000000e+00> : vector<32x32xf32>
    %231 = tpu.matmul %230, %207, %cst_74 {dimension_numbers = #tpu.dot_dimension_numbers<[1], [0], [0], [1], [0, 0, 1, 1], [], []>} : vector<32x128xf32>, vector<128x32xf32>, vector<32x32xf32> -> vector<32x32xf32>
    %232 = vector.broadcast %208 : vector<1x32xf32> to vector<32x32xf32>
    %233 = arith.addf %231, %232 : vector<32x32xf32>
    %234 = vector.shape_cast %233 : vector<32x32xf32> to vector<2x16x32xf32>
    %cst_75 = arith.constant 0.000000e+00 : f32
    %235 = vector.broadcast %cst_75 : f32 to vector<2x16x32xf32>
    %236 = arith.maximumf %234, %235 : vector<2x16x32xf32>
    %237 = arith.addf %236, %204 : vector<2x16x32xf32>
    %cst_76 = arith.constant 0.000000e+00 : f32
    %238 = vector.broadcast %cst_76 : f32 to vector<2x16x32xf32>
    %239 = arith.maximumf %237, %238 : vector<2x16x32xf32>
    %c1704 = arith.constant 1704 : index
    %c0_77 = arith.constant 0 : index
    %240 = vector.load %arg2[%c1704, %c0_77] : memref<1744x128xf32, #tpu.memory_space<vmem>>, vector<32x4xf32>
    %c1736 = arith.constant 1736 : index
    %c0_78 = arith.constant 0 : index
    %241 = vector.load %arg2[%c1736, %c0_78] : memref<1744x128xf32, #tpu.memory_space<vmem>>, vector<1x4xf32>
    %242 = vector.shape_cast %239 : vector<2x16x32xf32> to vector<32x32xf32>
    %cst_79 = arith.constant dense<0.000000e+00> : vector<32x4xf32>
    %243 = tpu.matmul %242, %240, %cst_79 {dimension_numbers = #tpu.dot_dimension_numbers<[1], [0], [0], [1], [0, 0, 1, 1], [], []>} : vector<32x32xf32>, vector<32x4xf32>, vector<32x4xf32> -> vector<32x4xf32>
    %244 = vector.broadcast %241 : vector<1x4xf32> to vector<32x4xf32>
    %245 = arith.addf %243, %244 : vector<32x4xf32>
    %246 = vector.shape_cast %245 : vector<32x4xf32> to vector<2x16x4xf32>
    %c0_80 = arith.constant 0 : index
    %c0_81 = arith.constant 0 : index
    %c0_82 = arith.constant 0 : index
    %247 = vector.load %arg3[%c0_80, %c0_81, %c0_82] : memref<2x16x4xf32, #tpu.memory_space<vmem>>, vector<2x16x4xf32>
    tpu.vector_store %arg3[%c0_80, %c0_81, %c0_82], %246 {strides = array<i32>} : memref<2x16x4xf32, #tpu.memory_space<vmem>>, vector<2x16x4xf32>,
    %248 = arith.subf %246, %0 : vector<2x16x4xf32>
    %249 = vector.shape_cast %248 : vector<2x16x4xf32> to vector<32x4xf32>
    %250 = arith.mulf %249, %249 : vector<32x4xf32>
    %251 = vector.shape_cast %250 : vector<32x4xf32> to vector<1x32x4xf32>
    %cst_83 = arith.constant dense<0.000000e+00> : vector<1xf32>
    %252 = vector.multi_reduction <add>, %251, %cst_83 [1, 2] : vector<1x32x4xf32> to vector<1xf32>
    %253 = vector.shape_cast %252 : vector<1xf32> to vector<1x1x1xf32>
    %254 = vector.extract %253[0, 0, 0] : f32 from vector<1x1x1xf32>
    %255 = vector.broadcast %254 : f32 to vector<1x1x1xf32>
    %c0_84 = arith.constant 0 : index
    %c0_85 = arith.constant 0 : index
    %c0_86 = arith.constant 0 : index
    %256 = vector.load %arg4[%c0_84, %c0_85, %c0_86] : memref<1x1x1xf32, #tpu.memory_space<vmem>>, vector<1x1x1xf32>
    tpu.vector_store %arg4[%c0_84, %c0_85, %c0_86], %255 {strides = array<i32>} : memref<1x1x1xf32, #tpu.memory_space<vmem>>, vector<1x1x1xf32>,
    return
  }
  func.func @transform_0(%arg0: i32) -> (i32, i32, i32) {
    %c0_i32 = arith.constant 0 : i32
    %c0_i32_0 = arith.constant 0 : i32
    %c0_i32_1 = arith.constant 0 : i32
    return %arg0, %c0_i32, %c0_i32_0 : i32, i32, i32
  }
  func.func @transform_1(%arg0: i32) -> (i32, i32) {
    %c0_i32 = arith.constant 0 : i32
    %c0_i32_0 = arith.constant 0 : i32
    %c0_i32_1 = arith.constant 0 : i32
    return %c0_i32, %c0_i32_0 : i32, i32
  }
  func.func @transform_2(%arg0: i32) -> (i32, i32, i32) {
    %c0_i32 = arith.constant 0 : i32
    %c0_i32_0 = arith.constant 0 : i32
    %c0_i32_1 = arith.constant 0 : i32
    return %arg0, %c0_i32, %c0_i32_0 : i32, i32, i32
  }
  func.func @transform_3(%arg0: i32) -> (i32, i32, i32) {
    %c0_i32 = arith.constant 0 : i32
    %c0_i32_0 = arith.constant 0 : i32
    %c0_i32_1 = arith.constant 0 : i32
    return %arg0, %c0_i32, %c0_i32_0 : i32, i32, i32
  }
}

</mosaic_0001>

<bundles_post_ra>
// kernel: tcn_ae_forward.1
= control target key start
LH: loop header
LB: loop body
LE: loop exit
PB: predicated region body
PF: predicated region fallthrough
CT: control target
= control target key end

     0   :  { %s4280_s12 = smov 0   ;;  %s5820_s0 = inlined_call_operand.vmem [shape: f32[4,16,4], index: 0, kind: input, shape index: {}]   ;;  %s5821_s1 = inlined_call_operand.vmem [shape: f32[1744,128], index: 1, kind: input, shape index: {}]   ;;  %s5822_s2 = inlined_call_operand.vmem [shape: f32[4,16,4], index: 2, kind: output, shape index: {0}]   ;;  %s5823_s3 = inlined_call_operand.vmem [shape: f32[2,1,1], index: 3, kind: output, shape index: {1}]  }
   0x1 LB: > { %s4286_s13 = sadd.s32 4294967295, %s4248_s12   ;;  %p3249_p0 = scmp.ge.s32.totalorder %s4248_s12, 1  ;;  %s4248_s12 = sphi %s4280_s12, %s14_s12  }
   0x2   : > { %p142_p1 = scmp.lt.s32.totalorder %s4248_s12, 3 }
   0x4   : > { %p143_p2 = pnand %p3249_p0, %p142_p1 }
   0x5   : > { %s3250_s14 = sshll.u32 (!%p143_p2), %s4286_s13, 1  ;;  %v192_v0 = vld [vmem:[%s5821_s1] sm:$0xff] (!%p143_p2)  ;;  %v193_v1 = vld [vmem:[%s5821_s1 + $0x8] sm:$0xff] (!%p143_p2)  ;;  %vm236_vm0 = vcmask (!%p143_p2), 1043456   ;;  %vm223_vm1 = vcmask (!%p143_p2), 31744   ;;  %vm362_vm2 = vcmask (!%p143_p2), 1045504  }
   0x6   : > { %146 = sbr.rel (%p143_p2) target bundleno = 4882 (0x1312), region = 28  ;;  %p172_p3 = scmp.lt.s32.totalorder (!%p143_p2), %s3250_s14, 3  ;;  %v3672_v4 = vpack.c.bf16 (!%p143_p2), %v193_v1, %v192_v0  ;;  %vm339_vm3 = vcmask (!%p143_p2), 1046528   ;;  %v194_v15 = vld [vmem:[%s5821_s1 + $0x10] sm:$0xf] (!%p143_p2)  ;;  %vm385_vm4 = vcmask (!%p143_p2), 1044480  }
   0x7   : > { %s4250_s25 = smov (!%p143_p2), 8   ;;  %s4251_s26 = smov (!%p143_p2), 4   ;;  %vm434_vm5 = vcmask (!%p143_p2), 64512   ;;  %vm439_vm6 = vcmask (!%p143_p2), 97280   ;;  %vm444_vm7 = vcmask (!%p143_p2), 130048   ;;  %vm453_vm8 = vcmask (!%p143_p2), 162816  }
   0x8   : > { %3673 = vmatprep.subr.bf16.mxu1 (!%p143_p2), %v3672_v4  ;;  %s4252_s27 = smov (!%p143_p2), 12   ;;  %s4253_s28 = smov (!%p143_p2), 16   ;;  %vm652_vm9 = vcmask (!%p143_p2), 261120   ;;  %vm657_vm10 = vcmask (!%p143_p2), 523264   ;;  %vm662_vm11 = vcmask (!%p143_p2), 785408   ;;  %vm865_vm12 = vcmask (!%p143_p2), 1041408  }
   0x9   : > { %3675 = vmatpush3.bf16.msra.mxu1 (!%p143_p2), %v3672_v4  ;;  %s4255_s6 = smov (!%p143_p2), 64   ;;  %s4256_s7 = smov (!%p143_p2), 32   ;;  %vm1911_vm13 = vcmask (!%p143_p2), 195584   ;;  %vm1924_vm14 = vcmask (!%p143_p2), 326656   ;;  %vm3160_vm15 = vcmask (!%p143_p2), 0  }
   0xa   : > { %3460 = vmatprep.subr.msk.mxu1 (!%p143_p2), %vm236_vm0, %v194_v15  ;;  %s4257_s8 = smov (!%p143_p2), 96   ;;  %s4259_s22 = smov (!%p143_p2), 24  }
   0xb   : > { %p185_p4 = scmp.lt.s32.totalorder (!%p143_p2), %s4286_s13, 1 }
   0xd   : > { %s5825_s14 = smov (!%p172_p3, %s3250_s14), 3  ;;  %3461 = vmatpush3.msk.msra.mxu1 %vm236_vm0, %v194_v15  ;;  %s5827_s13 = smov (!%p185_p4, %s4286_s13), 1 }
   0xe   : > { %s3324_s15 = sshll.u32 %s5825_s14, 4 }
   0xf   : > { %s4299_s18 = scalar_lea.vmem %s5820_s0, %s3324_s15  ;;  %s183_s21 = scalar_lea.vmem %s5822_s2, %s3324_s15 }
  0x10   : > { %v188_v2 = vld [vmem:[%s4299_s18] sm:$0xff]  ;;  %v4309_v3 = vld [vmem:[%s4299_s18 + $0x8] sm:$0xff]  ;;  %v4327_v16 = vld [vmem:[%s4299_s18 + $0x18] sm:$0xff] }
  0x11   : > { %v325_v5 = vrot.slane %v188_v2, 4  ;;  %v326_v6 = vrot.slane %v4309_v3, 4  ;;  %3450 = vmatprep.mubr.msk.f32.mxu0 %vm223_vm1, %v188_v2  ;;  %v4332_v19 = vld [vmem:[%s4299_s18 + $0x10] sm:$0xff]  ;;  %v329_v26 = vrot.slane %v4327_v16, 4 }
  0x12   : > { %v328_v25 = vrot.slane %v4332_v19, 4 }
  0x13   : > { %v4314_v7 = vsel %vm236_vm0, %v325_v5, %v326_v6  ;;  %v4317_v8 = vsel %vm236_vm0, 0.0, %v325_v5  ;;  %v366_v9 = vrot.slane %v326_v6, 2  ;;  %v343_v10 = vrot.slane %v326_v6, 1 }
  0x14   : > { %v363_v11 = vrot.slane %v4317_v8, 2  ;;  %v364_v12 = vrot.slane %v4314_v7, 2  ;;  %v340_v13 = vrot.slane %v4317_v8, 1  ;;  %v341_v14 = vrot.slane %v4314_v7, 1 }
  0x15   : > { %v387_v20 = vrot.slane %v4314_v7, 3  ;;  %v389_v23 = vrot.slane %v326_v6, 3  ;;  %v386_v24 = vrot.slane %v4317_v8, 3  ;;  %v409_v27 = vrot.slane %v4314_v7, 4 }
  0x16   : > { %v365_v17 = vsel %vm362_vm2, %v363_v11, %v364_v12  ;;  %v342_v18 = vsel %vm339_vm3, %v340_v13, %v341_v14  ;;  %v367_v21 = vsel %vm362_vm2, %v364_v12, %v366_v9  ;;  %v344_v22 = vsel %vm339_vm3, %v341_v14, %v343_v10 }
  0x17   : > { %373 = vrot.lane.b32.xlu1 %v365_v17, %s4250_s25  ;;  %350 = vrot.lane.b32.xlu0 %v342_v18, %s4251_s26  ;;  %v390_v28 = vsel %vm385_vm4, %v387_v20, %v389_v23  ;;  %v388_v29 = vsel %vm385_vm4, %v386_v24, %v387_v20  ;;  %v411_v30 = vrot.slane %v326_v6, 4  ;;  %v408_v31 = vrot.slane %v4317_v8, 4 }
  0x18   : > { %v4351_v32 = vsel %vm236_vm0, %v328_v25, %v329_v26  ;;  %v336_v33 = vsel %vm236_vm0, 0.0, %v328_v25  ;;  %v348_v34 = vrot.slane %v329_v26, 1  ;;  %v371_v39 = vrot.slane %v329_v26, 2 }
  0x19   : > { %v412_v35 = vsel %vm236_vm0, %v409_v27, %v411_v30  ;;  %v410_v36 = vsel %vm236_vm0, %v408_v31, %v409_v27  ;;  %v345_v37 = vrot.slane %v336_v33, 1  ;;  %v346_v38 = vrot.slane %v4351_v32, 1  ;;  %v217_v27 = vld [vmem:[%s5821_s1 + $0xc8] sm:$0xf]  ;;  %v198_v30 = vld [vmem:[%s5821_s1 + $0x30] sm:$0xff] }
  0x1a   : > { %v368_v42 = vrot.slane %v336_v33, 2  ;;  %v369_v43 = vrot.slane %v4351_v32, 2  ;;  %v391_v44 = vrot.slane %v336_v33, 3  ;;  %v392_v47 = vrot.slane %v4351_v32, 3  ;;  %3448 = vmatprep.subr.msk.mxu0 %vm236_vm0, %v217_v27 }
  0x1b   : > { %375 = vrot.lane.b32.xlu1 %v367_v21, %s4250_s25  ;;  %352 = vrot.lane.b32.xlu0 %v344_v22, %s4251_s26  ;;  %v347_v40 = vsel %vm339_vm3, %v345_v37, %v346_v38  ;;  %v349_v41 = vsel %vm339_vm3, %v346_v38, %v348_v34  ;;  %v394_v48 = vrot.slane %v329_v26, 3  ;;  %v413_v49 = vrot.slane %v336_v33, 4  ;;  %v204_v38 = vld [vmem:[%s5821_s1 + $0x60] sm:$0xff] }
  0x1c   : > { %v370_v45 = vsel %vm362_vm2, %v368_v42, %v369_v43  ;;  %v372_v46 = vsel %vm362_vm2, %v369_v43, %v371_v39  ;;  %v393_v50 = vsel %vm385_vm4, %v391_v44, %v392_v47  ;;  %v414_v52 = vrot.slane %v4351_v32, 4  ;;  %3449 = vmatpush3.msk.msra.mxu0 %vm236_vm0, %v217_v27  ;;  %v205_v39 = vld [vmem:[%s5821_s1 + $0x68] sm:$0xff]  ;;  %v207_v42 = vld [vmem:[%s5821_s1 + $0x78] sm:$0xff]  ;;  %v208_v44 = vld [vmem:[%s5821_s1 + $0x80] sm:$0xff] }
  0x1d   : > { %v395_v51 = vsel %vm385_vm4, %v392_v47, %v394_v48  ;;  %v416_v53 = vrot.slane %v329_v26, 4  ;;  %3451 = vmatmul.mubr.msk.f32.vlgmr.msra.gmra.mrb[0].mxu0 %vm223_vm1, %v4309_v3  ;;  %v4254_v31 = vmov 0.0|0.0   ;;  %v210_v47 = vld [vmem:[%s5821_s1 + $0x90] sm:$0xff]  ;;  %v211_v48 = vld [vmem:[%s5821_s1 + $0x98] sm:$0xff] }
  0x1e   : > { %v415_v54 = vsel %vm236_vm0, %v413_v49, %v414_v52  ;;  %3453 = vmatprep.mubr.msk.f32.mxu0 %vm223_vm1, %v4332_v19  ;;  %3676 = vmatprep.subr.bf16.mxu0 %v4254_v31  ;;  %v3698_v49 = vpack.c.bf16 %v211_v48, %v210_v47 }
  0x1f   : > { %398 = vrot.lane.b32.xlu1 %v390_v28, %s4252_s27  ;;  %396 = vrot.lane.b32.xlu0 %v388_v29, %s4252_s27  ;;  %v417_v55 = vsel %vm236_vm0, %v414_v52, %v416_v53  ;;  %v196_v28 = vld [vmem:[%s5821_s1 + $0x20] sm:$0xff]  ;;  %v197_v29 = vld [vmem:[%s5821_s1 + $0x28] sm:$0xff] }
  0x20   : > { %v3677_v3 = vpack.c.bf16 %v197_v29, %v196_v28  ;;  %3706 = vmatprep.subr.bf16.mxu1 %v4254_v31  ;;  %v212_v52 = vld [vmem:[%s5821_s1 + $0xa0] sm:$0xff]  ;;  %v213_v53 = vld [vmem:[%s5821_s1 + $0xa8] sm:$0xff] }
  0x21   : > { %3454 = vmatmul.mubr.msk.f32.gmra.mrb[2].mxu0 %vm223_vm1, %v4327_v16  ;;  %v199_v16 = vld [vmem:[%s5821_s1 + $0x38] sm:$0xff] }
  0x22   : > { %3678 = vmatpush1.bf16.msra.mxu0 %v3677_v3  ;;  %v3680_v19 = vpack.c.bf16 %v199_v16, %v198_v30 }
  0x23   : > { %420 = vrot.lane.b32.xlu1 %v412_v35, %s4253_s28  ;;  %418 = vrot.lane.b32.xlu0 %v410_v36, %s4253_s28  ;;  %v202_v35 = vld [vmem:[%s5821_s1 + $0x50] sm:$0xff]  ;;  %v203_v36 = vld [vmem:[%s5821_s1 + $0x58] sm:$0xff] }
  0x24   : > { %3679 = vmatprep.subr.bf16.mxu0 %v4254_v31  ;;  %v3686_v37 = vpack.c.bf16 %v203_v36, %v202_v35 }
  0x26   : > { %3681 = vmatpush1.bf16.msra.mxu0 %v3680_v19 }
  0x27   : > { %354 = vrot.lane.b32.xlu0 %v347_v40, %s4251_s26  ;;  %356 = vrot.lane.b32.xlu1 %v349_v41, %s4251_s26  ;;  %v3689_v40 = vpack.c.bf16 %v205_v39, %v204_v38  ;;  %v206_v41 = vld [vmem:[%s5821_s1 + $0x70] sm:$0xff] }
  0x28   : > { %3682 = vmatprep.subr.bf16.mxu0 %v4254_v31  ;;  %v3692_v43 = vpack.c.bf16 %v207_v42, %v206_v41 }
  0x2b   : > { %377 = vrot.lane.b32.xlu0 %v370_v45, %s4250_s25  ;;  %379 = vrot.lane.b32.xlu1 %v372_v46, %s4250_s25  ;;  %v209_v45 = vld [vmem:[%s5821_s1 + $0x88] sm:$0xff] }
  0x2c   : > { %v3695_v46 = vpack.c.bf16 %v209_v45, %v208_v44 }
  0x2f   : > { %400 = vrot.lane.b32.xlu0 %v393_v50, %s4252_s27  ;;  %402 = vrot.lane.b32.xlu1 %v395_v51, %s4252_s27  ;;  %v3262_v50 = vld [vmem:[%s5821_s1 + $0x18] ss:$0 sm:$0xff] }
  0x33   : > { %422 = vrot.lane.b32.xlu0 %v415_v54, %s4253_s28  ;;  %424 = vrot.lane.b32.xlu1 %v417_v55, %s4253_s28 }
  0x89   : > { %v374_v56 = vpop.permute.xlu1 %373  ;;  %v351_v57 = vpop.permute.xlu0 %350 }
  0x8a   : > { %v430_v60 = vsel %vm223_vm1, %v4317_v8, %v351_v57 }
  0x8b   : > { %v435_v1 = vsel %vm434_vm5, %v430_v60, %v374_v56  ;;  %v3701_v56 = vpack.c.bf16 %v213_v53, %v212_v52  ;;  %v214_v60 = vld [vmem:[%s5821_s1 + $0xb0] sm:$0xff] }
  0x8d   : > { %v376_v58 = vpop.permute.xlu1 %375  ;;  %v353_v59 = vpop.permute.xlu0 %352 }
  0x8e   : > { %v431_v61 = vsel %vm223_vm1, %v4314_v7, %v353_v59 }
  0x8f   : > { %v436_v0 = vsel %vm434_vm5, %v431_v61, %v376_v58  ;;  %v215_v61 = vld [vmem:[%s5821_s1 + $0xb8] sm:$0xff] }
  0x91   : > { %v399_v62 = vpop.permute.xlu1 %398  ;;  %v397_v63 = vpop.permute.xlu0 %396 }
  0x92   : > { %v441_v2 = vsel %vm439_vm6, %v436_v0, %v399_v62  ;;  %v440_v4 = vsel %vm439_vm6, %v435_v1, %v397_v63  ;;  %v3704_v63 = vpack.c.bf16 %v215_v61, %v214_v60 }
  0x95   : > { %v421_v5 = vpop.permute.xlu1 %420  ;;  %v419_v6 = vpop.permute.xlu0 %418 }
  0x96   : > { %v446_v8 = vsel %vm444_vm7, %v441_v2, %v421_v5  ;;  %v445_v7 = vsel %vm444_vm7, %v440_v4, %v419_v6 }
  0x97   : > { %3462 = vmatprep.mubr.msk.f32.mxu1 %vm453_vm8, %v445_v7 }
  0x98   : > { %3463 = vmatmul.mubr.msk.f32.vlgmr.msra.gmra.mrb[0].mxu1 %vm453_vm8, %v446_v8 }
  0x99   : > { %v355_v9 = vpop.permute.xlu0 %354  ;;  %v357_v10 = vpop.permute.xlu1 %356 }
  0x9a   : > { %v432_v11 = vsel %vm223_vm1, %v336_v33, %v355_v9  ;;  %v433_v12 = vsel %vm223_vm1, %v4351_v32, %v357_v10  ;;  %v200_v32 = vld [vmem:[%s5821_s1 + $0x40] sm:$0xff]  ;;  %v201_v33 = vld [vmem:[%s5821_s1 + $0x48] sm:$0xff] }
  0x9b   : > { %v3683_v34 = vpack.c.bf16 %v201_v33, %v200_v32 }
  0x9d   : > { %v378_v13 = vpop.permute.xlu0 %377  ;;  %v380_v14 = vpop.permute.xlu1 %379  ;;  %3684 = vmatpush1.bf16.msra.mxu0 %v3683_v34 }
  0x9e   : > { %v437_v15 = vsel %vm434_vm5, %v432_v11, %v378_v13  ;;  %v438_v17 = vsel %vm434_vm5, %v433_v12, %v380_v14  ;;  %3685 = vmatprep.subr.bf16.mxu0 %v4254_v31 }
  0xa1   : > { %v401_v18 = vpop.permute.xlu0 %400  ;;  %v403_v20 = vpop.permute.xlu1 %402  ;;  %3687 = vmatpush1.bf16.msra.mxu0 %v3686_v37 }
  0xa2   : > { %v442_v21 = vsel %vm439_vm6, %v437_v15, %v401_v18  ;;  %v443_v22 = vsel %vm439_vm6, %v438_v17, %v403_v20  ;;  %3688 = vmatprep.subr.bf16.mxu0 %v4254_v31 }
  0xa5   : > { %v423_v23 = vpop.permute.xlu0 %422  ;;  %v425_v24 = vpop.permute.xlu1 %424  ;;  %3690 = vmatpush1.bf16.msra.mxu0 %v3689_v40 }
  0xa6   : > { %v447_v25 = vsel %vm444_vm7, %v442_v21, %v423_v23  ;;  %v448_v26 = vsel %vm444_vm7, %v443_v22, %v425_v24  ;;  %3691 = vmatprep.subr.bf16.mxu0 %v4254_v31 }
  0xa7   : > { %3465 = vmatprep.mubr.msk.f32.mxu1 %vm453_vm8, %v447_v25 }
  0xa8   : > { %3466 = vmatmul.mubr.msk.f32.gmra.mrb[2].mxu1 %vm453_vm8, %v448_v26 }
  0xa9   : > { %3693 = vmatpush1.bf16.msra.mxu0 %v3692_v43 }
  0xaa   : > { %3694 = vmatprep.subr.bf16.mxu0 %v4254_v31 }
  0xad   : > { %3696 = vmatpush1.bf16.msra.mxu0 %v3695_v46 }
  0xae   : > { %3697 = vmatprep.subr.bf16.mxu0 %v4254_v31 }
  0xb1   : > { %3699 = vmatpush1.bf16.msra.mxu0 %v3698_v49 }
  0xb2   : > { %3700 = vmatprep.subr.bf16.mxu0 %v4254_v31 }
  0xb5   : > { %3702 = vmatpush1.bf16.msra.mxu0 %v3701_v56 }
  0xb6   : > { %3703 = vmatprep.subr.bf16.mxu0 %v4254_v31 }
  0xb9   : > { %3705 = vmatpush1.bf16.msra.mxu0 %v3704_v63 }
  0xba   : > { %3736 = vmatprep.subr.bf16.mxu0 %v4254_v31 }
  0xf0   : > { %v4542_v52 = vpop.f32.mrb[0].mxu0 }
  0xf1   : > { %v4544_v53 = vpop.f32.mrb[1].mxu0 }
 0x16b   : > { %v3464_v51 = vpop.f32.mrb[0].mxu1 }
 0x16c   : > { %v541_v54 = vadd.f32 %v3464_v51, %v3262_v50  ;;  %v535_v55 = vpop.f32.mrb[1].mxu1 }
 0x16d   : > { %v536_v57 = vadd.f32 %v3262_v50, %v535_v55 }
 0x16e   : > { %v555_v58 = vmax.f32 %v541_v54, 0.0  ;;  %v4546_v54 = vpop.f32.mrb[2].mxu0 }
 0x16f   : > { %v554_v59 = vmax.f32 %v536_v57, 0.0  ;;  %v4548_v55 = vpop.f32.mrb[3].mxu0 }
 0x170   : > { %v563_v62 = vrot.slane %v555_v58, 4 }
 0x171   : > { %v562_v0 = vrot.slane %v554_v59, 4 }
 0x172   : > { %v601_v1 = vrot.slane %v563_v62, 2  ;;  %v579_v5 = vrot.slane %v563_v62, 1  ;;  %v645_v6 = vrot.slane %v563_v62, 4  ;;  %v623_v24 = vrot.slane %v563_v62, 3 }
 0x173   : > { %v4489_v2 = vsel %vm236_vm0, %v562_v0, %v563_v62  ;;  %v4492_v4 = vsel %vm236_vm0, 0.0, %v562_v0 }
 0x174   : > { %v642_v8 = vrot.slane %v4492_v4, 4  ;;  %v643_v7 = vrot.slane %v4489_v2, 4  ;;  %v598_v9 = vrot.slane %v4492_v4, 2  ;;  %v599_v10 = vrot.slane %v4489_v2, 2 }
 0x175   : > { %v576_v11 = vrot.slane %v4492_v4, 1  ;;  %v577_v12 = vrot.slane %v4489_v2, 1  ;;  %v620_v13 = vrot.slane %v4492_v4, 3  ;;  %v621_v14 = vrot.slane %v4489_v2, 3 }
 0x176   : > { %v644_v15 = vsel %vm236_vm0, %v642_v8, %v643_v7  ;;  %v600_v17 = vsel %vm362_vm2, %v598_v9, %v599_v10  ;;  %v602_v18 = vsel %vm362_vm2, %v599_v10, %v601_v1  ;;  %v4507_v20 = vsel %vm236_vm0, %v643_v7, %v645_v6 }
 0x177   : > { %3269 = vmatprep.mubr.msk.f32.mxu0 %vm652_vm9, %v644_v15  ;;  %v4033_v21 = vpack.i.bf16 %v602_v18, %v600_v17  ;;  %v578_v22 = vsel %vm339_vm3, %v576_v11, %v577_v12  ;;  %v580_v23 = vsel %vm339_vm3, %v577_v12, %v579_v5  ;;  %v622_v26 = vsel %vm385_vm4, %v620_v13, %v621_v14 }
 0x178   : > { %v4028_v25 = vpack.i.bf16 %v580_v23, %v578_v22  ;;  %v624_v27 = vsel %vm385_vm4, %v621_v14, %v623_v24 }
 0x179   : > { %4034 = vrot.lane.b32.xlu1 %v4033_v21, %s4255_s6  ;;  %v4038_v3 = vpack.i.bf16 %v624_v27, %v622_v26  ;;  %v776_v27 = vld [vmem:[%s5821_s1 + $0xd8] sm:$0xff] }
 0x17a   : > { %4029 = vrot.lane.b32.xlu0 %v4028_v25, %s4256_s7 }
 0x17b   : > { %v3467_v28 = vpop.f32.mrb[2].mxu1 }
 0x17c   : > { %v551_v29 = vadd.f32 %v3467_v28, %v3262_v50  ;;  %v545_v30 = vpop.f32.mrb[3].mxu1  ;;  %v777_v28 = vld [vmem:[%s5821_s1 + $0xe0] sm:$0xff] }
 0x17d   : > { %v546_v16 = vadd.f32 %v3262_v50, %v545_v30  ;;  %v3707_v30 = vpack.c.bf16 %v777_v28, %v776_v27 }
 0x17e   : > { %v557_v19 = vmax.f32 %v551_v29, 0.0  ;;  %4039 = vrot.lane.b32.xlu0 %v4038_v3, %s4257_s8  ;;  %v778_v29 = vld [vmem:[%s5821_s1 + $0xe8] sm:$0xff]  ;;  %v779_v3 = vld [vmem:[%s5821_s1 + $0xf0] sm:$0xff] }
 0x17f   : > { %v556_v32 = vmax.f32 %v546_v16, 0.0  ;;  %3708 = vmatpush1.bf16.msra.mxu1 %v3707_v30  ;;  %v3710_v16 = vpack.c.bf16 %v779_v3, %v778_v29 }
 0x180   : > { %v4517_v33 = vrot.slane %v557_v19, 4  ;;  %3709 = vmatprep.subr.bf16.mxu1 %v4254_v31  ;;  %v780_v19 = vld [vmem:[%s5821_s1 + $0xf8] sm:$0xff] }
 0x181   : > { %v565_v34 = vrot.slane %v556_v32, 4  ;;  %v781_v32 = vld [vmem:[%s5821_s1 + $0x100] sm:$0xff] }
 0x182   : > { %v584_v37 = vrot.slane %v4517_v33, 1  ;;  %v606_v48 = vrot.slane %v4517_v33, 2  ;;  %v628_v49 = vrot.slane %v4517_v33, 3  ;;  %v650_v14 = vrot.slane %v4517_v33, 4 }
 0x183   : > { %v4521_v35 = vsel %vm236_vm0, %v565_v34, %v4517_v33  ;;  %v573_v36 = vsel %vm236_vm0, 0.0, %v565_v34  ;;  %3711 = vmatpush1.bf16.msra.mxu1 %v3710_v16  ;;  %v3713_v33 = vpack.c.bf16 %v781_v32, %v780_v19  ;;  %v782_v34 = vld [vmem:[%s5821_s1 + $0x108] sm:$0xff] }
 0x184   : > { %v603_v38 = vrot.slane %v573_v36, 2  ;;  %v604_v39 = vrot.slane %v4521_v35, 2  ;;  %v581_v40 = vrot.slane %v573_v36, 1  ;;  %v582_v41 = vrot.slane %v4521_v35, 1  ;;  %3712 = vmatprep.subr.bf16.mxu1 %v4254_v31 }
 0x185   : > { %v625_v42 = vrot.slane %v573_v36, 3  ;;  %v626_v43 = vrot.slane %v4521_v35, 3  ;;  %v647_v7 = vrot.slane %v573_v36, 4  ;;  %v648_v9 = vrot.slane %v4521_v35, 4 }
 0x186   : > { %v605_v44 = vsel %vm362_vm2, %v603_v38, %v604_v39  ;;  %v583_v45 = vsel %vm339_vm3, %v581_v40, %v582_v41  ;;  %v585_v46 = vsel %vm339_vm3, %v582_v41, %v584_v37  ;;  %v607_v50 = vsel %vm362_vm2, %v604_v39, %v606_v48  ;;  %v784_v37 = vld [vmem:[%s5821_s1 + $0x118] sm:$0xff]  ;;  %v785_v38 = vld [vmem:[%s5821_s1 + $0x120] sm:$0xff]  ;;  %v786_v40 = vld [vmem:[%s5821_s1 + $0x128] sm:$0xff] }
 0x187   : > { %612 = vrot.lane.b32.xlu0 %v605_v44, %s4255_s6  ;;  %590 = vrot.lane.b32.xlu1 %v583_v45, %s4256_s7  ;;  %v627_v47 = vsel %vm385_vm4, %v625_v42, %v626_v43  ;;  %v629_v51 = vsel %vm385_vm4, %v626_v43, %v628_v49  ;;  %v649_v11 = vsel %vm236_vm0, %v647_v7, %v648_v9  ;;  %v787_v41 = vld [vmem:[%s5821_s1 + $0x130] sm:$0xff]  ;;  %v788_v43 = vld [vmem:[%s5821_s1 + $0x138] sm:$0xff] }
 0x188   : > { %v651_v21 = vsel %vm236_vm0, %v648_v9, %v650_v14  ;;  %3714 = vmatpush1.bf16.msra.mxu1 %v3713_v33  ;;  %v3719_v39 = vpack.c.bf16 %v785_v38, %v784_v37  ;;  %v3722_v42 = vpack.c.bf16 %v787_v41, %v786_v40  ;;  %v789_v44 = vld [vmem:[%s5821_s1 + $0x140] sm:$0xff]  ;;  %v794_v7 = vld [vmem:[%s5821_s1 + $0x168] sm:$0xff]  ;;  %v795_v9 = vld [vmem:[%s5821_s1 + $0x170] sm:$0xff] }
 0x189   : > { %3715 = vmatprep.subr.bf16.mxu1 %v4254_v31  ;;  %v3725_v45 = vpack.c.bf16 %v789_v44, %v788_v43  ;;  %v3268_v49 = vld [vmem:[%s5821_s1 + $0xc0] ss:$0 sm:$0xff] }
 0x18b   : > { %592 = vrot.lane.b32.xlu0 %v585_v46, %s4256_s7  ;;  %634 = vrot.lane.b32.xlu1 %v627_v47, %s4257_s8  ;;  %v790_v46 = vld [vmem:[%s5821_s1 + $0x148] sm:$0xff]  ;;  %v791_v47 = vld [vmem:[%s5821_s1 + $0x150] sm:$0xff] }
 0x18c   : > { %v3728_v48 = vpack.c.bf16 %v791_v47, %v790_v46 }
 0x18f   : > { %614 = vrot.lane.b32.xlu1 %v607_v50, %s4255_s6  ;;  %636 = vrot.lane.b32.xlu0 %v629_v51, %s4257_s8  ;;  %v3256_v50 = vld [vmem:[%s5821_s1 + $0xd0] ss:$0 sm:$0xff] }
 0x1eb   : > { %v4035_v56 = vpop.permute.xlu1 %4034 }
 0x1ec   : > { %v4030_v57 = vpop.permute.xlu0 %4029  ;;  %v4036_v59 = vunpack.i.l.bf16 %v4035_v56  ;;  %v4037_v0 = vunpack.i.h.bf16 %v4035_v56 }
 0x1ed   : > { %v4031_v58 = vunpack.i.l.bf16 %v4030_v57  ;;  %v4032_v60 = vunpack.i.h.bf16 %v4030_v57 }
 0x1ef   : > { %v653_v61 = vsel %vm652_vm9, %v4492_v4, %v4031_v58  ;;  %v654_v8 = vsel %vm652_vm9, %v4489_v2, %v4032_v60  ;;  %v307_v58 = vadd.f32 %v3256_v50, %v4544_v53  ;;  %v792_v60 = vld [vmem:[%s5821_s1 + $0x158] sm:$0xff] }
 0x1f0   : > { %v4040_v62 = vpop.permute.xlu0 %4039  ;;  %v658_v1 = vsel %vm657_vm10, %v653_v61, %v4036_v59  ;;  %v659_v4 = vsel %vm657_vm10, %v654_v8, %v4037_v0  ;;  %v793_v61 = vld [vmem:[%s5821_s1 + $0x160] sm:$0xff] }
 0x1f1   : > { %v4041_v63 = vunpack.i.l.bf16 %v4040_v62  ;;  %v4042_v5 = vunpack.i.h.bf16 %v4040_v62 }
 0x1f3   : > { %v663_v6 = vsel %vm662_vm11, %v658_v1, %v4041_v63  ;;  %v664_v10 = vsel %vm662_vm11, %v659_v4, %v4042_v5  ;;  %v3731_v63 = vpack.c.bf16 %v793_v61, %v792_v60  ;;  %v3734_v4 = vpack.c.bf16 %v795_v9, %v794_v7 }
 0x1f4   : > { %744 = vmatmul.mubr.f32.vlgmr.msra.gmra.mrb[4].mxu0 %v663_v6  ;;  %v312_v6 = vadd.f32 %v4542_v52, %v3256_v50 }
 0x1f5   : > { %3270 = vmatprep.mubr.msk.f32.mxu0 %vm652_vm9, %v4507_v20 }
 0x1f8   : > { %749 = vmatmul.mubr.f32.gmra.mrb[6].mxu0 %v664_v10 }
 0x1f9   : > { %3271 = vmatprep.mubr.msk.f32.mxu0 %vm652_vm9, %v649_v11  ;;  %v591_v12 = vpop.permute.xlu1 %590  ;;  %v613_v13 = vpop.permute.xlu0 %612  ;;  %v4258_v11 = vmov 0.0  }
 0x1fa   : > { %v655_v2 = vsel %vm652_vm9, %v573_v36, %v591_v12  ;;  %v4654_v52 = vrot.slane %v4258_v11, 4  ;;  %v4659_v14 = vrot.slane %v4258_v11, 2 }
 0x1fb   : > { %v660_v15 = vsel %vm657_vm10, %v655_v2, %v613_v13 }
 0x1fd   : > { %v635_v17 = vpop.permute.xlu1 %634  ;;  %v593_v18 = vpop.permute.xlu0 %592 }
 0x1fe   : > { %v665_v20 = vsel %vm662_vm11, %v660_v15, %v635_v17  ;;  %v656_v22 = vsel %vm652_vm9, %v4521_v35, %v593_v18  ;;  %v783_v35 = vld [vmem:[%s5821_s1 + $0x110] sm:$0xff] }
 0x1ff   : > { %754 = vmatmul.mubr.f32.gmra.mrb[8].mxu0 %v665_v20  ;;  %v3716_v36 = vpack.c.bf16 %v783_v35, %v782_v34 }
 0x200   : > { %3272 = vmatprep.mubr.msk.f32.mxu0 %vm652_vm9, %v651_v21 }
 0x201   : > { %v615_v23 = vpop.permute.xlu1 %614  ;;  %v637_v24 = vpop.permute.xlu0 %636  ;;  %3717 = vmatpush1.bf16.msra.mxu1 %v3716_v36  ;;  %v322_v36 = vadd.f32 %v4546_v54, %v3256_v50 }
 0x202   : > { %v661_v25 = vsel %vm657_vm10, %v656_v22, %v615_v23  ;;  %3718 = vmatprep.subr.bf16.mxu1 %v4254_v31  ;;  %v317_v23 = vadd.f32 %v3256_v50, %v4548_v55 }
 0x203   : > { %v666_v26 = vsel %vm662_vm11, %v661_v25, %v637_v24  ;;  %v4666_v25 = vrot.slane %v4258_v11, 6 }
 0x204   : > { %759 = vmatmul.mubr.f32.gmra.mrb[10].mxu0 %v666_v26 }
 0x205   : > { %3720 = vmatpush1.bf16.msra.mxu1 %v3719_v39 }
 0x206   : > { %3721 = vmatprep.subr.bf16.mxu1 %v4254_v31 }
 0x209   : > { %3723 = vmatpush1.bf16.msra.mxu1 %v3722_v42 }
 0x20a   : > { %3724 = vmatprep.subr.bf16.mxu1 %v4254_v31 }
 0x20d   : > { %3726 = vmatpush1.bf16.msra.mxu1 %v3725_v45 }
 0x20e   : > { %3727 = vmatprep.subr.bf16.mxu1 %v4254_v31 }
 0x211   : > { %3729 = vmatpush1.bf16.msra.mxu1 %v3728_v48 }
 0x212   : > { %3730 = vmatprep.subr.bf16.mxu1 %v4254_v31 }
 0x215   : > { %3732 = vmatpush1.bf16.msra.mxu1 %v3731_v63 }
 0x216   : > { %3733 = vmatprep.subr.bf16.mxu1 %v4254_v31 }
 0x219   : > { %3735 = vmatpush1.bf16.msra.mxu1 %v3734_v4 }
 0x2c7   : > { %v745_v51 = vpop.f32.mrb[4].mxu0 }
 0x2c8   : > { %v746_v56 = vadd.f32 %v3268_v49, %v745_v51  ;;  %v747_v57 = vpop.f32.mrb[5].mxu0 }
 0x2ca   : > { %v764_v59 = vmax.f32 %v746_v56, 0.0 }
 0x2cb   : > { %v750_v62 = vpop.f32.mrb[6].mxu0 }
 0x2cc   : > { %v768_v0 = vadd.f32 %v764_v59, %v307_v58  ;;  %v751_v1 = vadd.f32 %v3268_v49, %v750_v62  ;;  %v752_v5 = vpop.f32.mrb[7].mxu0 }
 0x2ce   : > { %v4643_v8 = vmax.f32 %v768_v0, 0.0  ;;  %v765_v53 = vmax.f32 %v751_v1, 0.0 }
 0x2d0   : > { %v769_v10 = vadd.f32 %v765_v53, %v312_v6  ;;  %3274 = vmatprep.mubr.msk.f32.mxu1 %vm652_vm9, %v4643_v8  ;;  %v845_v2 = vrot.slane %v4643_v8, 4  ;;  %v824_v15 = vrot.slane %v4643_v8, 2  ;;  %v867_v26 = vrot.slane %v4643_v8, 6 }
 0x2d2   : > { %v4656_v12 = vmax.f32 %v769_v10, 0.0  ;;  %v755_v13 = vpop.f32.mrb[8].mxu0  ;;  %v846_v27 = vsel %vm236_vm0, %v4654_v52, %v845_v2  ;;  %v825_v29 = vsel %vm362_vm2, %v4659_v14, %v824_v15  ;;  %v868_v38 = vsel %vm865_vm12, %v4666_v25, %v867_v26 }
 0x2d3   : > { %v756_v17 = vadd.f32 %v3268_v49, %v755_v13  ;;  %v757_v18 = vpop.f32.mrb[9].mxu0 }
 0x2d4   : > { %v847_v20 = vrot.slane %v4656_v12, 4  ;;  %v826_v21 = vrot.slane %v4656_v12, 2  ;;  %v869_v22 = vrot.slane %v4656_v12, 6 }
 0x2d5   : > { %v766_v24 = vmax.f32 %v756_v17, 0.0 }
 0x2d6   : > { %v848_v28 = vsel %vm236_vm0, %v845_v2, %v847_v20  ;;  %v827_v30 = vsel %vm362_vm2, %v824_v15, %v826_v21  ;;  %v870_v34 = vsel %vm865_vm12, %v867_v26, %v869_v22  ;;  %v797_v26 = vld [vmem:[%s5821_s1 + $0x180] sm:$0xff] }
 0x2d7   : > { %v770_v3 = vadd.f32 %v766_v24, %v317_v23  ;;  %v760_v16 = vpop.f32.mrb[10].mxu0  ;;  %v4048_v19 = vpack.i.bf16 %v848_v28, %v846_v27  ;;  %v4043_v32 = vpack.i.bf16 %v827_v30, %v825_v29  ;;  %v4053_v39 = vpack.i.bf16 %v870_v34, %v868_v38  ;;  %v798_v27 = vld [vmem:[%s5821_s1 + $0x188] sm:$0xff]  ;;  %v799_v28 = vld [vmem:[%s5821_s1 + $0x190] sm:$0xff]  ;;  %v800_v30 = vld [vmem:[%s5821_s1 + $0x198] sm:$0xff] }
 0x2d8   : > { %v761_v55 = vadd.f32 %v3268_v49, %v760_v16  ;;  %v762_v33 = vpop.f32.mrb[11].mxu0  ;;  %v3737_v29 = vpack.c.bf16 %v798_v27, %v797_v26  ;;  %v801_v16 = vld [vmem:[%s5821_s1 + $0x1a0] sm:$0xff] }
 0x2d9   : > { %v4676_v35 = vmax.f32 %v770_v3, 0.0  ;;  %4049 = vrot.lane.b32.xlu0 %v4048_v19, %s4255_s6  ;;  %4044 = vrot.lane.b32.xlu1 %v4043_v32, %s4256_s7  ;;  %v3740_v3 = vpack.c.bf16 %v800_v30, %v799_v28  ;;  %v802_v19 = vld [vmem:[%s5821_s1 + $0x1a8] sm:$0xff]  ;;  %v804_v33 = vld [vmem:[%s5821_s1 + $0x1b8] sm:$0xff] }
 0x2da   : > { %v767_v37 = vmax.f32 %v761_v55, 0.0  ;;  %3738 = vmatpush1.bf16.msra.mxu0 %v3737_v29  ;;  %v3743_v32 = vpack.c.bf16 %v802_v19, %v801_v16  ;;  %v803_v55 = vld [vmem:[%s5821_s1 + $0x1b0] sm:$0xff] }
 0x2db   : > { %v828_v40 = vrot.slane %v4676_v35, 2  ;;  %v849_v42 = vrot.slane %v4676_v35, 4  ;;  %v871_v44 = vrot.slane %v4676_v35, 6  ;;  %3739 = vmatprep.subr.bf16.mxu0 %v4254_v31  ;;  %v3746_v34 = vpack.c.bf16 %v804_v33, %v803_v55 }
 0x2dc   : > { %v771_v41 = vadd.f32 %v767_v37, %v322_v36  ;;  %v805_v36 = vld [vmem:[%s5821_s1 + $0x1c0] sm:$0xff]  ;;  %v806_v37 = vld [vmem:[%s5821_s1 + $0x1c8] sm:$0xff] }
 0x2dd   : > { %4054 = vrot.lane.b32.xlu1 %v4053_v39, %s4257_s8  ;;  %v829_v43 = vsel %vm362_vm2, %v4659_v14, %v828_v40  ;;  %v850_v54 = vsel %vm236_vm0, %v4654_v52, %v849_v42  ;;  %v872_v47 = vsel %vm865_vm12, %v4666_v25, %v871_v44  ;;  %v3749_v38 = vpack.c.bf16 %v806_v37, %v805_v36  ;;  %v807_v39 = vld [vmem:[%s5821_s1 + $0x1d0] sm:$0xff] }
 0x2de   : > { %v4689_v45 = vmax.f32 %v771_v41, 0.0  ;;  %836 = vrot.lane.b32.xlu0 %v829_v43, %s4256_s7  ;;  %3741 = vmatpush1.bf16.msra.mxu0 %v3740_v3  ;;  %v810_v43 = vld [vmem:[%s5821_s1 + $0x1e8] sm:$0xff] }
 0x2df   : > { %3742 = vmatprep.subr.bf16.mxu0 %v4254_v31 }
 0x2e0   : > { %v830_v46 = vrot.slane %v4689_v45, 2  ;;  %v851_v48 = vrot.slane %v4689_v45, 4  ;;  %v873_v50 = vrot.slane %v4689_v45, 6 }
 0x2e1   : > { %857 = vrot.lane.b32.xlu1 %v850_v54, %s4255_s6  ;;  %v811_v54 = vld [vmem:[%s5821_s1 + $0x1f0] sm:$0xff] }
 0x2e2   : > { %879 = vrot.lane.b32.xlu0 %v872_v47, %s4257_s8  ;;  %v831_v49 = vsel %vm362_vm2, %v828_v40, %v830_v46  ;;  %v852_v51 = vsel %vm236_vm0, %v849_v42, %v851_v48  ;;  %v874_v56 = vsel %vm865_vm12, %v871_v44, %v873_v50  ;;  %3744 = vmatpush1.bf16.msra.mxu0 %v3743_v32  ;;  %v808_v40 = vld [vmem:[%s5821_s1 + $0x1d8] sm:$0xff]  ;;  %v809_v42 = vld [vmem:[%s5821_s1 + $0x1e0] sm:$0xff]  ;;  %v814_v50 = vld [vmem:[%s5821_s1 + $0x208] sm:$0xff] }
 0x2e3   : > { %3745 = vmatprep.subr.bf16.mxu0 %v4254_v31  ;;  %v3752_v41 = vpack.c.bf16 %v808_v40, %v807_v39  ;;  %v3755_v44 = vpack.c.bf16 %v810_v43, %v809_v42  ;;  %v812_v46 = vld [vmem:[%s5821_s1 + $0x1f8] sm:$0xff] }
 0x2e4   : > { %v3758_v47 = vpack.c.bf16 %v812_v46, %v811_v54  ;;  %v3273_v48 = vld [vmem:[%s5821_s1 + $0x178] ss:$0 sm:$0xff] }
 0x2e5   : > { %838 = vrot.lane.b32.xlu1 %v831_v49, %s4256_s7  ;;  %v813_v49 = vld [vmem:[%s5821_s1 + $0x200] sm:$0xff] }
 0x2e6   : > { %859 = vrot.lane.b32.xlu0 %v852_v51, %s4255_s6  ;;  %3747 = vmatpush1.bf16.msra.mxu0 %v3746_v34 }
 0x2e7   : > { %3748 = vmatprep.subr.bf16.mxu0 %v4254_v31 }
 0x2e9   : > { %881 = vrot.lane.b32.xlu1 %v874_v56, %s4257_s8  ;;  %v3761_v56 = vpack.c.bf16 %v814_v50, %v813_v49 }
 0x2ea   : > { %3750 = vmatpush1.bf16.msra.mxu0 %v3749_v38 }
 0x2eb   : > { %3751 = vmatprep.subr.bf16.mxu0 %v4254_v31 }
 0x2ee   : > { %3753 = vmatpush1.bf16.msra.mxu0 %v3752_v41 }
 0x2ef   : > { %3754 = vmatprep.subr.bf16.mxu0 %v4254_v31 }
 0x2f2   : > { %3756 = vmatpush1.bf16.msra.mxu0 %v3755_v44 }
 0x2f3   : > { %3757 = vmatprep.subr.bf16.mxu0 %v4254_v31 }
 0x2f6   : > { %3759 = vmatpush1.bf16.msra.mxu0 %v3758_v47 }
 0x2f7   : > { %3760 = vmatprep.subr.bf16.mxu0 %v4254_v31 }
 0x2fa   : > { %3762 = vmatpush1.bf16.msra.mxu0 %v3761_v56 }
 0x2fb   : > { %3763 = vmatprep.subr.bf16.mxu0 %v4254_v31 }
 0x34b   : > { %v4050_v57 = vpop.permute.xlu0 %4049  ;;  %v4045_v58 = vpop.permute.xlu1 %4044 }
 0x34c   : > { %v4046_v59 = vunpack.i.l.bf16 %v4045_v58  ;;  %v4051_v60 = vunpack.i.l.bf16 %v4050_v57  ;;  %v4047_v61 = vunpack.i.h.bf16 %v4045_v58  ;;  %v4052_v5 = vunpack.i.h.bf16 %v4050_v57 }
 0x34e   : > { %v887_v62 = vsel %vm652_vm9, 0.0, %v4046_v59  ;;  %v888_v9 = vsel %vm652_vm9, %v4643_v8, %v4047_v61  ;;  %v816_v61 = vld [vmem:[%s5821_s1 + $0x218] sm:$0xff] }
 0x34f   : > { %v4055_v63 = vpop.permute.xlu1 %4054  ;;  %v891_v6 = vsel %vm657_vm10, %v887_v62, %v4051_v60  ;;  %v892_v13 = vsel %vm657_vm10, %v888_v9, %v4052_v5  ;;  %v815_v60 = vld [vmem:[%s5821_s1 + $0x210] sm:$0xff] }
 0x350   : > { %v4056_v0 = vunpack.i.l.bf16 %v4055_v63  ;;  %v837_v1 = vpop.permute.xlu0 %836  ;;  %v4057_v53 = vunpack.i.h.bf16 %v4055_v63  ;;  %v3764_v63 = vpack.c.bf16 %v816_v61, %v815_v60 }
 0x351   : > { %v889_v10 = vsel %vm652_vm9, 0.0, %v837_v1 }
 0x352   : > { %v895_v7 = vsel %vm662_vm11, %v891_v6, %v4056_v0  ;;  %v896_v2 = vsel %vm662_vm11, %v892_v13, %v4057_v53  ;;  %3765 = vmatpush1.bf16.msra.mxu0 %v3764_v63 }
 0x353   : > { %v858_v4 = vpop.permute.xlu1 %857  ;;  %976 = vmatmul.mubr.f32.vlgmr.msra.gmra.mrb[4].mxu1 %v895_v7 }
 0x354   : > { %3275 = vmatprep.mubr.msk.f32.mxu1 %vm652_vm9, %v4656_v12  ;;  %v880_v11 = vpop.permute.xlu0 %879  ;;  %v893_v15 = vsel %vm657_vm10, %v889_v10, %v858_v4 }
 0x355   : > { %v897_v21 = vsel %vm662_vm11, %v893_v15, %v880_v11 }
 0x357   : > { %v839_v17 = vpop.permute.xlu1 %838  ;;  %981 = vmatmul.mubr.f32.gmra.mrb[6].mxu1 %v896_v2 }
 0x358   : > { %v890_v18 = vsel %vm652_vm9, %v4676_v35, %v839_v17  ;;  %3276 = vmatprep.mubr.msk.f32.mxu1 %vm652_vm9, %v4676_v35  ;;  %v860_v20 = vpop.permute.xlu0 %859 }
 0x359   : > { %v894_v22 = vsel %vm657_vm10, %v890_v18, %v860_v20 }
 0x35b   : > { %v882_v23 = vpop.permute.xlu1 %881  ;;  %986 = vmatmul.mubr.f32.gmra.mrb[8].mxu1 %v897_v21 }
 0x35c   : > { %3277 = vmatprep.mubr.msk.f32.mxu1 %vm652_vm9, %v4689_v45  ;;  %v898_v24 = vsel %vm662_vm11, %v894_v22, %v882_v23 }
 0x35f   : > { %991 = vmatmul.mubr.f32.gmra.mrb[10].mxu1 %v898_v24 }
 0x426   : > { %v977_v51 = vpop.f32.mrb[4].mxu1 }
 0x427   : > { %v978_v57 = vadd.f32 %v3273_v48, %v977_v51  ;;  %v979_v58 = vpop.f32.mrb[5].mxu1 }
 0x429   : > { %v4792_v59 = vmax.f32 %v978_v57, 0.0 }
 0x42a   : > { %v982_v62 = vpop.f32.mrb[6].mxu1 }
 0x42b   : > { %v983_v0 = vadd.f32 %v3273_v48, %v982_v62  ;;  %v984_v1 = vpop.f32.mrb[7].mxu1  ;;  %3279 = vmatprep.mubr.msk.f32.mxu0 %vm652_vm9, %v4792_v59  ;;  %v1024_v5 = vrot.slane %v4792_v59, 4  ;;  %v1004_v53 = vrot.slane %v4792_v59, 2  ;;  %v1044_v15 = vrot.slane %v4792_v59, 6 }
 0x42d   : > { %v997_v6 = vmax.f32 %v983_v0, 0.0  ;;  %v1025_v2 = vsel %vm236_vm0, %v4654_v52, %v1024_v5  ;;  %v1005_v20 = vsel %vm362_vm2, %v4659_v14, %v1004_v53  ;;  %v1045_v30 = vsel %vm865_vm12, %v4666_v25, %v1044_v15 }
 0x42e   : > { %v987_v7 = vpop.f32.mrb[8].mxu1 }
 0x42f   : > { %v1006_v9 = vrot.slane %v997_v6, 2  ;;  %v1026_v4 = vrot.slane %v997_v6, 4  ;;  %v1046_v10 = vrot.slane %v997_v6, 6  ;;  %v988_v11 = vadd.f32 %v3273_v48, %v987_v7  ;;  %v989_v13 = vpop.f32.mrb[9].mxu1 }
 0x430   : > { %v1186_v13 = vld [vmem:[%s5821_s1 + $0x230] sm:$0xff] }
 0x431   : > { %v998_v17 = vmax.f32 %v988_v11, 0.0  ;;  %v1027_v18 = vsel %vm236_vm0, %v1024_v5, %v1026_v4  ;;  %v1007_v21 = vsel %vm362_vm2, %v1004_v53, %v1006_v9  ;;  %v1047_v29 = vsel %vm865_vm12, %v1044_v15, %v1046_v10  ;;  %v1185_v11 = vld [vmem:[%s5821_s1 + $0x228] sm:$0xff] }
 0x432   : > { %v992_v22 = vpop.f32.mrb[10].mxu1  ;;  %v4063_v23 = vpack.i.bf16 %v1027_v18, %v1025_v2  ;;  %v4058_v24 = vpack.i.bf16 %v1007_v21, %v1005_v20  ;;  %v4068_v3 = vpack.i.bf16 %v1047_v29, %v1045_v30  ;;  %v1187_v2 = vld [vmem:[%s5821_s1 + $0x238] sm:$0xff]  ;;  %v3766_v15 = vpack.c.bf16 %v1186_v13, %v1185_v11  ;;  %v1189_v20 = vld [vmem:[%s5821_s1 + $0x248] sm:$0xff]  ;;  %v1190_v21 = vld [vmem:[%s5821_s1 + $0x250] sm:$0xff] }
 0x433   : > { %v993_v26 = vadd.f32 %v3273_v48, %v992_v22  ;;  %v994_v27 = vpop.f32.mrb[11].mxu1  ;;  %v1008_v28 = vrot.slane %v998_v17, 2  ;;  %v1048_v32 = vrot.slane %v998_v17, 6  ;;  %v1028_v55 = vrot.slane %v998_v17, 4  ;;  %v1195_v30 = vld [vmem:[%s5821_s1 + $0x278] sm:$0xff] }
 0x434   : > { %4064 = vrot.lane.b32.xlu1 %v4063_v23, %s4255_s6  ;;  %4059 = vrot.lane.b32.xlu0 %v4058_v24, %s4256_s7  ;;  %v3774_v22 = vpack.c.bf16 %v1190_v21, %v1189_v20  ;;  %v1191_v23 = vld [vmem:[%s5821_s1 + $0x258] sm:$0xff]  ;;  %v1192_v24 = vld [vmem:[%s5821_s1 + $0x260] sm:$0xff] }
 0x435   : > { %v999_v16 = vmax.f32 %v993_v26, 0.0  ;;  %v1009_v19 = vsel %vm362_vm2, %v4659_v14, %v1008_v28  ;;  %v1049_v33 = vsel %vm865_vm12, %v4666_v25, %v1048_v32  ;;  %v1029_v34 = vsel %vm236_vm0, %v4654_v52, %v1028_v55  ;;  %3767 = vmatprep.subr.bf16.mxu1 %v3766_v15  ;;  %v1193_v27 = vld [vmem:[%s5821_s1 + $0x268] sm:$0xff] }
 0x436   : > { %3769 = vmatpush3.bf16.msra.mxu1 %v3766_v15  ;;  %v3778_v26 = vpack.c.bf16 %v1192_v24, %v1191_v23 }
 0x437   : > { %v1030_v36 = vrot.slane %v999_v16, 4  ;;  %v1010_v37 = vrot.slane %v999_v16, 2  ;;  %v1050_v40 = vrot.slane %v999_v16, 6 }
 0x438   : > { %1016 = vrot.lane.b32.xlu1 %v1009_v19, %s4256_s7  ;;  %4069 = vrot.lane.b32.xlu0 %v4068_v3, %s4257_s8  ;;  %v1196_v3 = vld [vmem:[%s5821_s1 + $0x280] sm:$0xff] }
 0x439   : > { %v1031_v38 = vsel %vm236_vm0, %v1028_v55, %v1030_v36  ;;  %v1011_v39 = vsel %vm362_vm2, %v1008_v28, %v1010_v37  ;;  %v1051_v41 = vsel %vm865_vm12, %v1048_v32, %v1050_v40  ;;  %v1194_v28 = vld [vmem:[%s5821_s1 + $0x270] sm:$0xff]  ;;  %v3278_v19 = vld [vmem:[%s5821_s1 + $0x220] ss:$0 sm:$0xff]  ;;  %v1197_v40 = vld [vmem:[%s5821_s1 + $0x288] sm:$0xff] }
 0x43a   : > { %v3782_v29 = vpack.c.bf16 %v1194_v28, %v1193_v27 }
 0x43c   : > { %1056 = vrot.lane.b32.xlu1 %v1049_v33, %s4257_s8  ;;  %1036 = vrot.lane.b32.xlu0 %v1029_v34, %s4255_s6 }
 0x440   : > { %1038 = vrot.lane.b32.xlu1 %v1031_v38, %s4255_s6  ;;  %1018 = vrot.lane.b32.xlu0 %v1011_v39, %s4256_s7 }
 0x444   : > { %1058 = vrot.lane.b32.xlu0 %v1051_v41, %s4257_s8  ;;  %v1198_v41 = vld [vmem:[%s5821_s1 + $0x290] sm:$0xff] }
 0x4a6   : > { %v4065_v42 = vpop.permute.xlu1 %4064  ;;  %v4060_v43 = vpop.permute.xlu0 %4059 }
 0x4a7   : > { %v4061_v44 = vunpack.i.l.bf16 %v4060_v43  ;;  %v4066_v54 = vunpack.i.l.bf16 %v4065_v42  ;;  %v4062_v46 = vunpack.i.h.bf16 %v4060_v43  ;;  %v4067_v51 = vunpack.i.h.bf16 %v4065_v42 }
 0x4a9   : > { %v1064_v47 = vsel %vm652_vm9, 0.0, %v4061_v44  ;;  %v1065_v60 = vsel %vm652_vm9, %v4792_v59, %v4062_v46  ;;  %v3790_v44 = vpack.c.bf16 %v1198_v41, %v1197_v40 }
 0x4aa   : > { %v1017_v48 = vpop.permute.xlu1 %1016  ;;  %v4070_v49 = vpop.permute.xlu0 %4069  ;;  %v1068_v56 = vsel %vm657_vm10, %v1064_v47, %v4066_v54  ;;  %v1069_v63 = vsel %vm657_vm10, %v1065_v60, %v4067_v51 }
 0x4ab   : > { %v4071_v50 = vunpack.i.l.bf16 %v4070_v49  ;;  %v4072_v57 = vunpack.i.h.bf16 %v4070_v49  ;;  %v1066_v0 = vsel %vm652_vm9, 0.0, %v1017_v48  ;;  %v1199_v49 = vld [vmem:[%s5821_s1 + $0x298] sm:$0xff] }
 0x4ad   : > { %v1072_v58 = vsel %vm662_vm11, %v1068_v56, %v4071_v50  ;;  %v1073_v1 = vsel %vm662_vm11, %v1069_v63, %v4072_v57  ;;  %v1200_v50 = vld [vmem:[%s5821_s1 + $0x2a0] sm:$0xff] }
 0x4ae   : > { %v1037_v61 = vpop.permute.xlu0 %1036  ;;  %1153 = vmatmul.mubr.f32.vlgmr.msra.gmra.mrb[12].mxu0 %v1072_v58  ;;  %v1057_v62 = vpop.permute.xlu1 %1056  ;;  %v3794_v58 = vpack.c.bf16 %v1200_v50, %v1199_v49 }
 0x4af   : > { %3280 = vmatprep.mubr.msk.f32.mxu0 %vm652_vm9, %v997_v6  ;;  %v1070_v5 = vsel %vm657_vm10, %v1066_v0, %v1037_v61 }
 0x4b0   : > { %v1074_v9 = vsel %vm662_vm11, %v1070_v5, %v1057_v62 }
 0x4b2   : > { %v1019_v53 = vpop.permute.xlu0 %1018  ;;  %1158 = vmatmul.mubr.f32.gmra.mrb[14].mxu0 %v1073_v1  ;;  %v1039_v7 = vpop.permute.xlu1 %1038 }
 0x4b3   : > { %3281 = vmatprep.mubr.msk.f32.mxu0 %vm652_vm9, %v998_v17  ;;  %v1067_v59 = vsel %vm652_vm9, %v998_v17, %v1019_v53  ;;  %v1188_v17 = vld [vmem:[%s5821_s1 + $0x240] sm:$0xff] }
 0x4b4   : > { %v1071_v6 = vsel %vm657_vm10, %v1067_v59, %v1039_v7  ;;  %v3770_v18 = vpack.c.bf16 %v1188_v17, %v1187_v2 }
 0x4b6   : > { %v1059_v4 = vpop.permute.xlu0 %1058  ;;  %1163 = vmatmul.mubr.f32.gmra.mrb[16].mxu0 %v1074_v9  ;;  %3771 = vmatprep.subr.bf16.mxu1 %v3770_v18 }
 0x4b7   : > { %3282 = vmatprep.mubr.msk.f32.mxu0 %vm652_vm9, %v999_v16  ;;  %v1075_v10 = vsel %vm662_vm11, %v1071_v6, %v1059_v4  ;;  %3773 = vmatpush3.bf16.msra.mxu1 %v3770_v18  ;;  %v3786_v16 = vpack.c.bf16 %v1196_v3, %v1195_v30 }
 0x4b8   : > { %3775 = vmatprep.subr.bf16.mxu1 %v3774_v22 }
 0x4ba   : > { %1168 = vmatmul.mubr.f32.gmra.mrb[18].mxu0 %v1075_v10 }
 0x4bb   : > { %3777 = vmatpush3.bf16.msra.mxu1 %v3774_v22 }
 0x4bc   : > { %3779 = vmatprep.subr.bf16.mxu1 %v3778_v26 }
 0x4bf   : > { %3781 = vmatpush3.bf16.msra.mxu1 %v3778_v26 }
 0x4c0   : > { %3783 = vmatprep.subr.bf16.mxu1 %v3782_v29 }
 0x4c3   : > { %3785 = vmatpush3.bf16.msra.mxu1 %v3782_v29 }
 0x4c4   : > { %3787 = vmatprep.subr.bf16.mxu1 %v3786_v16 }
 0x4c7   : > { %3789 = vmatpush3.bf16.msra.mxu1 %v3786_v16 }
 0x4c8   : > { %3791 = vmatprep.subr.bf16.mxu1 %v3790_v44 }
 0x4cb   : > { %3793 = vmatpush3.bf16.msra.mxu1 %v3790_v44 }
 0x4cc   : > { %3795 = vmatprep.subr.bf16.mxu1 %v3794_v58 }
 0x4cf   : > { %3797 = vmatpush3.bf16.msra.mxu1 %v3794_v58 }
 0x581   : > { %v1154_v32 = vpop.f32.mrb[12].mxu0 }
 0x582   : > { %v1155_v55 = vadd.f32 %v3278_v19, %v1154_v32  ;;  %v1156_v33 = vpop.f32.mrb[13].mxu0 }
 0x584   : > { %v1173_v34 = vmax.f32 %v1155_v55, 0.0 }
 0x585   : > { %v1159_v36 = vpop.f32.mrb[14].mxu0 }
 0x586   : > { %v4889_v37 = vadd.f32 %v1173_v34, %v4643_v8  ;;  %v1160_v38 = vadd.f32 %v3278_v19, %v1159_v36  ;;  %v1161_v39 = vpop.f32.mrb[15].mxu0 }
 0x588   : > { %v1181_v42 = vmax.f32 %v4889_v37, 0.0  ;;  %v1174_v43 = vmax.f32 %v1160_v38, 0.0 }
 0x589   : > { %v1164_v54 = vpop.f32.mrb[16].mxu0 }
 0x58a   : > { %v1223_v46 = vrot.slane %v1181_v42, 4  ;;  %v4901_v8 = vadd.f32 %v1174_v43, %v4656_v12  ;;  %v1165_v47 = vadd.f32 %v3278_v19, %v1164_v54  ;;  %v1166_v48 = vpop.f32.mrb[17].mxu0 }
 0x58c   : > { %v1182_v51 = vmax.f32 %v4901_v8, 0.0  ;;  %v1175_v56 = vmax.f32 %v1165_v47, 0.0  ;;  %v1231_v57 = vsel %vm236_vm0, 0.0, %v1223_v46 }
 0x58d   : > { %v1169_v12 = vpop.f32.mrb[18].mxu0  ;;  %v1235_v0 = vrot.slane %v1231_v57, 4 }
 0x58e   : > { %v1224_v60 = vrot.slane %v1182_v51, 4  ;;  %v4914_v61 = vadd.f32 %v1175_v56, %v4676_v35  ;;  %v1170_v62 = vadd.f32 %v3278_v19, %v1169_v12  ;;  %v1171_v63 = vpop.f32.mrb[19].mxu0 }
 0x58f   : > { %v1236_v35 = vsel %vm236_vm0, %v4654_v52, %v1235_v0 }
 0x590   : > { %v1183_v1 = vmax.f32 %v4914_v61, 0.0  ;;  %v1176_v5 = vmax.f32 %v1170_v62, 0.0  ;;  %v1225_v53 = vsel %vm236_vm0, %v1223_v46, %v1224_v60  ;;  %v1267_v7 = vrot.slane %v1224_v60, 4  ;;  %v1672_v61 = vld [vmem:[%s5821_s1 + $0x368] sm:$0xff] }
 0x591   : > { %v4073_v59 = vpack.i.bf16 %v1225_v53, %v1231_v57  ;;  %v1237_v9 = vrot.slane %v1225_v53, 4  ;;  %v1202_v53 = vld [vmem:[%s5821_s1 + $0x2b0] sm:$0xff] }
 0x592   : > { %v1226_v4 = vrot.slane %v1183_v1, 4  ;;  %v4921_v6 = vadd.f32 %v1176_v5, %v4689_v45 }
 0x593   : > { %4074 = vrot.lane.b32.xlu0 %v4073_v59, %s4255_s6  ;;  %v1238_v10 = vsel %vm236_vm0, %v1235_v0, %v1237_v9  ;;  %v1268_v15 = vsel %vm236_vm0, %v1237_v9, %v1267_v7  ;;  %v1203_v7 = vld [vmem:[%s5821_s1 + $0x2b8] sm:$0xff]  ;;  %v1204_v59 = vld [vmem:[%s5821_s1 + $0x2c0] sm:$0xff] }
 0x594   : > { %v1232_v11 = vsel %vm236_vm0, 0.0, %v1226_v4  ;;  %v1184_v13 = vmax.f32 %v4921_v6, 0.0  ;;  %v4078_v2 = vpack.i.bf16 %v1238_v10, %v1236_v35  ;;  %v4083_v20 = vpack.i.bf16 %v1268_v15, %v1238_v10  ;;  %v1206_v10 = vld [vmem:[%s5821_s1 + $0x2d0] sm:$0xff]  ;;  %v1208_v15 = vld [vmem:[%s5821_s1 + $0x2e0] sm:$0xff] }
 0x595   : > { %v1239_v45 = vrot.slane %v1232_v11, 4  ;;  %v3798_v9 = vpack.c.bf16 %v1203_v7, %v1202_v53  ;;  %v1671_v6 = vld [vmem:[%s5821_s1 + $0x360] sm:$0xff] }
 0x596   : > { %v1227_v17 = vrot.slane %v1184_v13, 4  ;;  %4079 = vrot.lane.b32.xlu1 %v4078_v2, %s4256_s7 }
 0x597   : > { %v1240_v23 = vsel %vm236_vm0, %v4654_v52, %v1239_v45  ;;  %3799 = vmatprep.subr.bf16.mxu1 %v3798_v9 }
 0x598   : > { %v1228_v18 = vsel %vm236_vm0, %v1226_v4, %v1227_v17  ;;  %v1269_v21 = vrot.slane %v1227_v17, 4  ;;  %v1205_v4 = vld [vmem:[%s5821_s1 + $0x2c8] sm:$0xff] }
 0x599   : > { %v1241_v22 = vrot.slane %v1228_v18, 4  ;;  %v4088_v27 = vpack.i.bf16 %v1228_v18, %v1232_v11  ;;  %v3802_v35 = vpack.c.bf16 %v1205_v4, %v1204_v59  ;;  %v1209_v17 = vld [vmem:[%s5821_s1 + $0x2e8] sm:$0xff]  ;;  %v1210_v18 = vld [vmem:[%s5821_s1 + $0x2f0] sm:$0xff] }
 0x59a   : > { %4084 = vrot.lane.b32.xlu1 %v4083_v20, %s4257_s8  ;;  %v1211_v20 = vld [vmem:[%s5821_s1 + $0x2f8] sm:$0xff] }
 0x59b   : > { %v1242_v24 = vsel %vm236_vm0, %v1239_v45, %v1241_v22  ;;  %v1270_v28 = vsel %vm236_vm0, %v1241_v22, %v1269_v21  ;;  %v3810_v45 = vpack.c.bf16 %v1209_v17, %v1208_v15  ;;  %v3814_v21 = vpack.c.bf16 %v1211_v20, %v1210_v18  ;;  %v1212_v22 = vld [vmem:[%s5821_s1 + $0x300] sm:$0xff] }
 0x59c   : > { %v4093_v26 = vpack.i.bf16 %v1242_v24, %v1240_v23  ;;  %v4098_v29 = vpack.i.bf16 %v1270_v28, %v1242_v24  ;;  %v1213_v23 = vld [vmem:[%s5821_s1 + $0x308] sm:$0xff]  ;;  %v1215_v28 = vld [vmem:[%s5821_s1 + $0x318] sm:$0xff] }
 0x59d   : > { %v3818_v24 = vpack.c.bf16 %v1213_v23, %v1212_v22 }
 0x59e   : > { %4094 = vrot.lane.b32.xlu0 %v4093_v26, %s4256_s7  ;;  %4089 = vrot.lane.b32.xlu1 %v4088_v27, %s4255_s6  ;;  %v3283_v26 = vld [vmem:[%s5821_s1 + $0x2a8] ss:$0 sm:$0xff]  ;;  %v1214_v27 = vld [vmem:[%s5821_s1 + $0x310] sm:$0xff] }
 0x5a2   : > { %4099 = vrot.lane.b32.xlu0 %v4098_v29, %s4257_s8 }
 0x605   : > { %v4075_v3 = vpop.permute.xlu0 %4074 }
 0x606   : > { %v4077_v33 = vunpack.i.h.bf16 %v4075_v3  ;;  %v4076_v34 = vunpack.i.l.bf16 %v4075_v3 }
 0x608   : > { %v4080_v30 = vpop.permute.xlu1 %4079 }
 0x609   : > { %v4082_v16 = vunpack.i.h.bf16 %v4080_v30  ;;  %v4081_v19 = vunpack.i.l.bf16 %v4080_v30  ;;  %v3822_v30 = vpack.c.bf16 %v1215_v28, %v1214_v27 }
 0x60b   : > { %v1284_v32 = vsel %vm652_vm9, %v1231_v57, %v4082_v16  ;;  %v1283_v55 = vsel %vm652_vm9, 0.0, %v4081_v19 }
 0x60c   : > { %v4085_v36 = vpop.permute.xlu1 %4084  ;;  %v1287_v40 = vsel %vm657_vm10, %v1283_v55, %v4076_v34  ;;  %v1288_v41 = vsel %vm657_vm10, %v1284_v32, %v4077_v33  ;;  %v1216_v55 = vld [vmem:[%s5821_s1 + $0x320] sm:$0xff]  ;;  %v1217_v33 = vld [vmem:[%s5821_s1 + $0x328] sm:$0xff] }
 0x60d   : > { %v4087_v38 = vunpack.i.h.bf16 %v4085_v36  ;;  %v4086_v39 = vunpack.i.l.bf16 %v4085_v36  ;;  %v3826_v36 = vpack.c.bf16 %v1217_v33, %v1216_v55 }
 0x60f   : > { %v1291_v43 = vsel %vm662_vm11, %v1287_v40, %v4086_v39  ;;  %v1292_v44 = vsel %vm662_vm11, %v1288_v41, %v4087_v38 }
 0x610   : > { %v4095_v54 = vpop.permute.xlu0 %4094  ;;  %v4090_v46 = vpop.permute.xlu1 %4089  ;;  %3500 = vmatprep.mubr.f32.mxu1 %v1291_v43 }
 0x611   : > { %v4097_v47 = vunpack.i.h.bf16 %v4095_v54  ;;  %v4096_v48 = vunpack.i.l.bf16 %v4095_v54  ;;  %3501 = vmatmul.mubr.f32.vlgmr.msra.gmra.mrb[12].mxu1 %v1292_v44  ;;  %v4092_v49 = vunpack.i.h.bf16 %v4090_v46  ;;  %v4091_v50 = vunpack.i.l.bf16 %v4090_v46 }
 0x612   : > { %3801 = vmatpush3.bf16.msra.mxu1 %v3798_v9 }
 0x613   : > { %v1285_v56 = vsel %vm652_vm9, 0.0, %v4096_v48  ;;  %v1286_v57 = vsel %vm652_vm9, %v1232_v11, %v4097_v47  ;;  %v1207_v11 = vld [vmem:[%s5821_s1 + $0x2d8] sm:$0xff]  ;;  %3803 = vmatprep.subr.bf16.mxu1 %v3802_v35 }
 0x614   : > { %v4100_v58 = vpop.permute.xlu0 %4099  ;;  %v1289_v62 = vsel %vm657_vm10, %v1285_v56, %v4091_v50  ;;  %v1290_v63 = vsel %vm657_vm10, %v1286_v57, %v4092_v49  ;;  %v3806_v2 = vpack.c.bf16 %v1207_v11, %v1206_v10 }
 0x615   : > { %v4102_v12 = vunpack.i.h.bf16 %v4100_v58  ;;  %v4101_v60 = vunpack.i.l.bf16 %v4100_v58 }
 0x616   : > { %3805 = vmatpush3.bf16.msra.mxu1 %v3802_v35 }
 0x617   : > { %v1293_v0 = vsel %vm662_vm11, %v1289_v62, %v4101_v60  ;;  %v1294_v5 = vsel %vm662_vm11, %v1290_v63, %v4102_v12  ;;  %3807 = vmatprep.subr.bf16.mxu1 %v3806_v2 }
 0x618   : > { %3503 = vmatprep.mubr.f32.mxu1 %v1293_v0 }
 0x619   : > { %3504 = vmatmul.mubr.f32.gmra.mrb[14].mxu1 %v1294_v5 }
 0x61a   : > { %3809 = vmatpush3.bf16.msra.mxu1 %v3806_v2 }
 0x61b   : > { %3811 = vmatprep.subr.bf16.mxu1 %v3810_v45 }
 0x61e   : > { %3813 = vmatpush3.bf16.msra.mxu1 %v3810_v45 }
 0x61f   : > { %3815 = vmatprep.subr.bf16.mxu1 %v3814_v21 }
 0x622   : > { %3817 = vmatpush3.bf16.msra.mxu1 %v3814_v21 }
 0x623   : > { %3819 = vmatprep.subr.bf16.mxu1 %v3818_v24 }
 0x626   : > { %3821 = vmatpush3.bf16.msra.mxu1 %v3818_v24 }
 0x627   : > { %3823 = vmatprep.subr.bf16.mxu1 %v3822_v30 }
 0x62a   : > { %3825 = vmatpush3.bf16.msra.mxu1 %v3822_v30 }
 0x62b   : > { %3827 = vmatprep.subr.bf16.mxu1 %v3826_v36 }
 0x62e   : > { %3829 = vmatpush3.bf16.msra.mxu1 %v3826_v36 }
 0x6e4   : > { %v3502_v29 = vpop.f32.mrb[12].mxu1 }
 0x6e5   : > { %v1371_v3 = vadd.f32 %v3502_v29, %v3283_v26  ;;  %v1365_v16 = vpop.f32.mrb[13].mxu1 }
 0x6e6   : > { %v1366_v19 = vadd.f32 %v3283_v26, %v1365_v16 }
 0x6e7   : > { %v1385_v32 = vmax.f32 %v1371_v3, 0.0 }
 0x6e8   : > { %v1384_v34 = vmax.f32 %v1366_v19, 0.0 }
 0x6e9   : > { %v1393_v38 = vrot.slane %v1385_v32, 4 }
 0x6ea   : > { %v1392_v39 = vrot.slane %v1384_v34, 4 }
 0x6eb   : > { %v1436_v40 = vrot.slane %v1393_v38, 4 }
 0x6ec   : > { %v1400_v41 = vsel %vm236_vm0, 0.0, %v1392_v39  ;;  %v3505_v43 = vpop.f32.mrb[14].mxu1  ;;  %v1394_v44 = vsel %vm236_vm0, %v1392_v39, %v1393_v38 }
 0x6ed   : > { %v1404_v54 = vrot.slane %v1400_v41, 4  ;;  %v1381_v46 = vadd.f32 %v3505_v43, %v3283_v26  ;;  %v1375_v47 = vpop.f32.mrb[15].mxu1  ;;  %v4103_v48 = vpack.i.bf16 %v1394_v44, %v1400_v41  ;;  %v1406_v49 = vrot.slane %v1394_v44, 4 }
 0x6ee   : > { %v1376_v50 = vadd.f32 %v3283_v26, %v1375_v47 }
 0x6ef   : > { %v1387_v56 = vmax.f32 %v1381_v46, 0.0  ;;  %4104 = vrot.lane.b32.xlu0 %v4103_v48, %s4255_s6  ;;  %v1405_v57 = vsel %vm236_vm0, %v4654_v52, %v1404_v54  ;;  %v1407_v58 = vsel %vm236_vm0, %v1404_v54, %v1406_v49  ;;  %v1437_v12 = vsel %vm236_vm0, %v1406_v49, %v1436_v40  ;;  %v1565_v49 = vld [vmem:[%s5821_s1 + $0x338] sm:$0xff] }
 0x6f0   : > { %v1386_v60 = vmax.f32 %v1376_v50, 0.0  ;;  %v4108_v62 = vpack.i.bf16 %v1407_v58, %v1405_v57  ;;  %v4113_v63 = vpack.i.bf16 %v1437_v12, %v1407_v58  ;;  %v1566_v50 = vld [vmem:[%s5821_s1 + $0x340] sm:$0xff]  ;;  %v1567_v57 = vld [vmem:[%s5821_s1 + $0x348] sm:$0xff]  ;;  %v1568_v58 = vld [vmem:[%s5821_s1 + $0x350] sm:$0xff] }
 0x6f1   : > { %v1396_v0 = vrot.slane %v1387_v56, 4  ;;  %v3830_v56 = vpack.c.bf16 %v1566_v50, %v1565_v49  ;;  %v3834_v12 = vpack.c.bf16 %v1568_v58, %v1567_v57 }
 0x6f2   : > { %v1395_v5 = vrot.slane %v1386_v60, 4  ;;  %4109 = vrot.lane.b32.xlu1 %v4108_v62, %s4256_s7  ;;  %v3284_v60 = vld [vmem:[%s5821_s1 + $0x330] ss:$0 sm:$0xff] }
 0x6f3   : > { %v1438_v59 = vrot.slane %v1396_v0, 4  ;;  %3831 = vmatprep.subr.bf16.mxu1 %v3830_v56 }
 0x6f4   : > { %v1397_v53 = vsel %vm236_vm0, %v1395_v5, %v1396_v0  ;;  %v1401_v7 = vsel %vm236_vm0, 0.0, %v1395_v5 }
 0x6f5   : > { %v1408_v9 = vrot.slane %v1401_v7, 4  ;;  %v1410_v4 = vrot.slane %v1397_v53, 4  ;;  %v4118_v15 = vpack.i.bf16 %v1397_v53, %v1401_v7 }
 0x6f6   : > { %4114 = vrot.lane.b32.xlu1 %v4113_v63, %s4257_s8 }
 0x6f7   : > { %v1409_v35 = vsel %vm236_vm0, %v4654_v52, %v1408_v9  ;;  %v1411_v10 = vsel %vm236_vm0, %v1408_v9, %v1410_v4  ;;  %v1439_v11 = vsel %vm236_vm0, %v1410_v4, %v1438_v59 }
 0x6f8   : > { %v4123_v2 = vpack.i.bf16 %v1411_v10, %v1409_v35  ;;  %v4128_v17 = vpack.i.bf16 %v1439_v11, %v1411_v10 }
 0x6fa   : > { %4124 = vrot.lane.b32.xlu0 %v4123_v2, %s4256_s7  ;;  %4119 = vrot.lane.b32.xlu1 %v4118_v15, %s4255_s6 }
 0x6fe   : > { %4129 = vrot.lane.b32.xlu0 %v4128_v17, %s4257_s8 }
 0x761   : > { %v4105_v18 = vpop.permute.xlu0 %4104 }
 0x762   : > { %v4107_v24 = vunpack.i.h.bf16 %v4105_v18  ;;  %v4106_v26 = vunpack.i.l.bf16 %v4105_v18 }
 0x764   : > { %v4110_v45 = vpop.permute.xlu1 %4109 }
 0x765   : > { %v4112_v20 = vunpack.i.h.bf16 %v4110_v45  ;;  %v4111_v21 = vunpack.i.l.bf16 %v4110_v45 }
 0x767   : > { %v1453_v22 = vsel %vm652_vm9, %v1400_v41, %v4112_v20  ;;  %v1452_v23 = vsel %vm652_vm9, 0.0, %v4111_v21 }
 0x768   : > { %v4115_v27 = vpop.permute.xlu1 %4114  ;;  %v1456_v30 = vsel %vm657_vm10, %v1452_v23, %v4106_v26  ;;  %v1457_v3 = vsel %vm657_vm10, %v1453_v22, %v4107_v24 }
 0x769   : > { %v4117_v28 = vunpack.i.h.bf16 %v4115_v27  ;;  %v4116_v29 = vunpack.i.l.bf16 %v4115_v27  ;;  %v1673_v27 = vld [vmem:[%s5821_s1 + $0x370] sm:$0xff] }
 0x76b   : > { %v1460_v16 = vsel %vm662_vm11, %v1456_v30, %v4116_v29  ;;  %v1461_v19 = vsel %vm662_vm11, %v1457_v3, %v4117_v28  ;;  %v1674_v28 = vld [vmem:[%s5821_s1 + $0x378] sm:$0xff] }
 0x76c   : > { %v4125_v32 = vpop.permute.xlu0 %4124  ;;  %v4120_v55 = vpop.permute.xlu1 %4119  ;;  %3538 = vmatprep.mubr.f32.mxu1 %v1460_v16  ;;  %v3842_v3 = vpack.c.bf16 %v1674_v28, %v1673_v27 }
 0x76d   : > { %v4127_v33 = vunpack.i.h.bf16 %v4125_v32  ;;  %v4126_v34 = vunpack.i.l.bf16 %v4125_v32  ;;  %3539 = vmatmul.mubr.f32.vlgmr.msra.gmra.mrb[16].mxu1 %v1461_v19  ;;  %v4122_v36 = vunpack.i.h.bf16 %v4120_v55  ;;  %v4121_v38 = vunpack.i.l.bf16 %v4120_v55 }
 0x76e   : > { %3833 = vmatpush3.bf16.msra.mxu1 %v3830_v56 }
 0x76f   : > { %v1454_v39 = vsel %vm652_vm9, 0.0, %v4126_v34  ;;  %v1455_v40 = vsel %vm652_vm9, %v1401_v7, %v4127_v33  ;;  %3835 = vmatprep.subr.bf16.mxu1 %v3834_v12 }
 0x770   : > { %v4130_v41 = vpop.permute.xlu0 %4129  ;;  %v1458_v54 = vsel %vm657_vm10, %v1454_v39, %v4121_v38  ;;  %v1459_v46 = vsel %vm657_vm10, %v1455_v40, %v4122_v36 }
 0x771   : > { %v4132_v43 = vunpack.i.h.bf16 %v4130_v41  ;;  %v4131_v44 = vunpack.i.l.bf16 %v4130_v41  ;;  %v1675_v41 = vld [vmem:[%s5821_s1 + $0x380] sm:$0xff] }
 0x772   : > { %3837 = vmatpush3.bf16.msra.mxu1 %v3834_v12 }
 0x773   : > { %v1462_v47 = vsel %vm662_vm11, %v1458_v54, %v4131_v44  ;;  %v1463_v48 = vsel %vm662_vm11, %v1459_v46, %v4132_v43  ;;  %3846 = vmatprep.subr.bf16.mxu1 %v4254_v31 }
 0x774   : > { %3541 = vmatprep.mubr.f32.mxu1 %v1462_v47 }
 0x775   : > { %3542 = vmatmul.mubr.f32.gmra.mrb[18].mxu1 %v1463_v48 }
 0x840   : > { %v3540_v62 = vpop.f32.mrb[16].mxu1 }
 0x841   : > { %v1540_v63 = vadd.f32 %v3540_v62, %v3284_v60  ;;  %v1534_v0 = vpop.f32.mrb[17].mxu1 }
 0x842   : > { %v1535_v5 = vadd.f32 %v3284_v60, %v1534_v0 }
 0x843   : > { %v1554_v53 = vmax.f32 %v1540_v63, 0.0 }
 0x844   : > { %v1553_v7 = vmax.f32 %v1535_v5, 0.0 }
 0x845   : > { %v1558_v59 = vadd.f32 %v1554_v53, %v1182_v51  ;;  %v1698_v51 = vld [vmem:[%s5821_s1 + $0x438] sm:$0xff] }
 0x846   : > { %v1557_v9 = vadd.f32 %v1553_v7, %v1181_v42  ;;  %3558 = vmatprep.subr.mxu0 %v1698_v51 }
 0x847   : > { %v1562_v10 = vmax.f32 %v1558_v59, 0.0  ;;  %3559 = vmatpush3.msra.mxu0 %v1698_v51 }
 0x848   : > { %v1561_v4 = vmax.f32 %v1557_v9, 0.0  ;;  %v3543_v35 = vpop.f32.mrb[18].mxu1 }
 0x849   : > { %v1550_v11 = vadd.f32 %v3543_v35, %v3284_v60  ;;  %v1544_v2 = vpop.f32.mrb[19].mxu1 }
 0x84a   : > { %v1545_v15 = vadd.f32 %v3284_v60, %v1544_v2  ;;  %3552 = vmatprep.mubr.msk.f32.mxu1 %vm652_vm9, %v1561_v4 }
 0x84b   : > { %v1556_v17 = vmax.f32 %v1550_v11, 0.0  ;;  %3553 = vmatmul.mubr.msk.f32.vlgmr.msra.gmra.mrb[20].mxu1 %vm652_vm9, %v1562_v10 }
 0x84c   : > { %v1555_v45 = vmax.f32 %v1545_v15, 0.0 }
 0x84d   : > { %v1560_v18 = vadd.f32 %v1556_v17, %v1184_v13  ;;  %v3838_v13 = vpack.c.bf16 %v1672_v61, %v1671_v6 }
 0x84e   : > { %v1559_v8 = vadd.f32 %v1555_v45, %v1183_v1  ;;  %v3285_v1 = vld [vmem:[%s5821_s1 + $0x358] ss:$0 sm:$0xff] }
 0x84f   : > { %v1564_v42 = vmax.f32 %v1560_v18, 0.0  ;;  %3839 = vmatprep.subr.bf16.mxu0 %v3838_v13 }
 0x850   : > { %v1563_v37 = vmax.f32 %v1559_v8, 0.0 }
 0x852   : > { %3555 = vmatprep.mubr.msk.f32.mxu1 %vm652_vm9, %v1563_v37 }
 0x853   : > { %3556 = vmatmul.mubr.msk.f32.gmra.mrb[22].mxu1 %vm652_vm9, %v1564_v42 }
 0x91e   : > { %v3554_v20 = vpop.f32.mrb[20].mxu1 }
 0x91f   : > { %v1658_v21 = vadd.f32 %v3554_v20, %v3285_v1  ;;  %v1652_v22 = vpop.f32.mrb[21].mxu1 }
 0x920   : > { %v1653_v23 = vadd.f32 %v3285_v1, %v1652_v22 }
 0x921   : > { %v1802_v24 = vrot.slane %v1658_v21, 4 }
 0x922   : > { %v1801_v26 = vrot.slane %v1653_v23, 4  ;;  %3560 = vmatprep.mubr.msk.f32.mxu0 %vm434_vm5, %v1653_v23 }
 0x923   : > { %3561 = vmatmul.mubr.msk.f32.vlgmr.msra.gmra.mrb[20].mxu0 %vm434_vm5, %v1658_v21  ;;  %v1818_v19 = vrot.slane %v1802_v24, 1  ;;  %v1840_v54 = vrot.slane %v1802_v24, 2  ;;  %v1862_v57 = vrot.slane %v1802_v24, 3  ;;  %v1884_v0 = vrot.slane %v1802_v24, 4 }
 0x924   : > { %v5084_v29 = vsel %vm236_vm0, %v1801_v26, %v1802_v24  ;;  %v5087_v30 = vsel %vm236_vm0, 0.0, %v1801_v26  ;;  %3841 = vmatpush3.bf16.msra.mxu0 %v3838_v13 }
 0x925   : > { %v1816_v16 = vrot.slane %v5084_v29, 1  ;;  %v1815_v32 = vrot.slane %v5087_v30, 1  ;;  %v1838_v33 = vrot.slane %v5084_v29, 2  ;;  %3843 = vmatprep.subr.bf16.mxu0 %v3842_v3  ;;  %v1837_v40 = vrot.slane %v5087_v30, 2 }
 0x926   : > { %v3557_v55 = vpop.f32.mrb[22].mxu1  ;;  %v1860_v49 = vrot.slane %v5084_v29, 3  ;;  %v1859_v50 = vrot.slane %v5087_v30, 3  ;;  %v1882_v60 = vrot.slane %v5084_v29, 4  ;;  %v1881_v62 = vrot.slane %v5087_v30, 4 }
 0x927   : > { %v1668_v34 = vadd.f32 %v3557_v55, %v3285_v1  ;;  %v1662_v36 = vpop.f32.mrb[23].mxu1  ;;  %v1819_v38 = vsel %vm339_vm3, %v1816_v16, %v1818_v19  ;;  %v1817_v39 = vsel %vm339_vm3, %v1815_v32, %v1816_v16  ;;  %v1841_v47 = vsel %vm362_vm2, %v1838_v33, %v1840_v54 }
 0x928   : > { %v1663_v43 = vadd.f32 %v3285_v1, %v1662_v36  ;;  %1827 = vrot.lane.b32.xlu0 %v1819_v38, %s4250_s25  ;;  %1825 = vrot.lane.b32.xlu1 %v1817_v39, %s4250_s25  ;;  %v1839_v48 = vsel %vm362_vm2, %v1837_v40, %v1838_v33  ;;  %v1863_v58 = vsel %vm385_vm4, %v1860_v49, %v1862_v57 }
 0x929   : > { %v1805_v44 = vrot.slane %v1668_v34, 4  ;;  %3845 = vmatpush3.bf16.msra.mxu0 %v3842_v3  ;;  %v1861_v12 = vsel %vm385_vm4, %v1859_v50, %v1860_v49  ;;  %v1885_v5 = vsel %vm236_vm0, %v1882_v60, %v1884_v0  ;;  %v1883_v53 = vsel %vm236_vm0, %v1881_v62, %v1882_v60  ;;  %v1678_v0 = vld [vmem:[%s5821_s1 + $0x398] sm:$0xff] }
 0x92a   : > { %v1804_v46 = vrot.slane %v1663_v43, 4  ;;  %3563 = vmatprep.mubr.msk.f32.mxu0 %vm434_vm5, %v1663_v43  ;;  %3574 = vmatprep.subr.mxu0 %v1675_v41 }
 0x92b   : > { %3564 = vmatmul.mubr.msk.f32.gmra.mrb[22].mxu0 %vm434_vm5, %v1668_v34  ;;  %v1823_v9 = vrot.slane %v1805_v44, 1  ;;  %v1845_v2 = vrot.slane %v1805_v44, 2  ;;  %v1867_v8 = vrot.slane %v1805_v44, 3  ;;  %v1889_v61 = vrot.slane %v1805_v44, 4 }
 0x92c   : > { %v5107_v56 = vsel %vm236_vm0, %v1804_v46, %v1805_v44  ;;  %1849 = vrot.lane.b32.xlu0 %v1841_v47, %s4253_s28  ;;  %1847 = vrot.lane.b32.xlu1 %v1839_v48, %s4253_s28  ;;  %v5117_v63 = vsel %vm236_vm0, 0.0, %v1804_v46 }
 0x92d   : > { %3575 = vmatpush3.msra.mxu0 %v1675_v41  ;;  %v1821_v7 = vrot.slane %v5107_v56, 1  ;;  %v1820_v59 = vrot.slane %v5117_v63, 1  ;;  %v1843_v10 = vrot.slane %v5107_v56, 2  ;;  %v1842_v11 = vrot.slane %v5117_v63, 2 }
 0x92e   : > { %3876 = vmatprep.subr.bf16.mxu0 %v4254_v31  ;;  %v1865_v45 = vrot.slane %v5107_v56, 3  ;;  %v1864_v18 = vrot.slane %v5117_v63, 3  ;;  %v1887_v51 = vrot.slane %v5107_v56, 4  ;;  %v1886_v6 = vrot.slane %v5117_v63, 4 }
 0x92f   : > { %v1824_v4 = vsel %vm339_vm3, %v1821_v7, %v1823_v9  ;;  %v1822_v35 = vsel %vm339_vm3, %v1820_v59, %v1821_v7  ;;  %v1846_v15 = vsel %vm362_vm2, %v1843_v10, %v1845_v2  ;;  %v1844_v17 = vsel %vm362_vm2, %v1842_v11, %v1843_v10  ;;  %v1680_v7 = vld [vmem:[%s5821_s1 + $0x3a8] sm:$0xff]  ;;  %v1681_v9 = vld [vmem:[%s5821_s1 + $0x3b0] sm:$0xff]  ;;  %v1683_v10 = vld [vmem:[%s5821_s1 + $0x3c0] sm:$0xff] }
 0x930   : > { %1871 = vrot.lane.b32.xlu0 %v1863_v58, %s4259_s22  ;;  %1869 = vrot.lane.b32.xlu1 %v1861_v12, %s4259_s22  ;;  %v1868_v37 = vsel %vm385_vm4, %v1865_v45, %v1867_v8  ;;  %v1866_v42 = vsel %vm385_vm4, %v1864_v18, %v1865_v45  ;;  %v1890_v1 = vsel %vm236_vm0, %v1887_v51, %v1889_v61  ;;  %v1684_v11 = vld [vmem:[%s5821_s1 + $0x3c8] sm:$0xff]  ;;  %v1687_v18 = vld [vmem:[%s5821_s1 + $0x3e0] sm:$0xff] }
 0x931   : > { %v1888_v13 = vsel %vm236_vm0, %v1886_v6, %v1887_v51  ;;  %v3856_v2 = vpack.c.bf16 %v1684_v11, %v1683_v10  ;;  %v1688_v8 = vld [vmem:[%s5821_s1 + $0x3e8] sm:$0xff]  ;;  %v1690_v51 = vld [vmem:[%s5821_s1 + $0x3f8] sm:$0xff]  ;;  %v1691_v61 = vld [vmem:[%s5821_s1 + $0x400] sm:$0xff] }
 0x934   : > { %1893 = vrot.lane.b32.xlu0 %v1885_v5, %s4256_s7  ;;  %1891 = vrot.lane.b32.xlu1 %v1883_v53, %s4256_s7  ;;  %v1679_v5 = vld [vmem:[%s5821_s1 + $0x3a0] sm:$0xff] }
 0x935   : > { %v3850_v59 = vpack.c.bf16 %v1680_v7, %v1679_v5 }
 0x938   : > { %1831 = vrot.lane.b32.xlu0 %v1824_v4, %s4250_s25  ;;  %1829 = vrot.lane.b32.xlu1 %v1822_v35, %s4250_s25  ;;  %v1682_v4 = vld [vmem:[%s5821_s1 + $0x3b8] sm:$0xff] }
 0x939   : > { %v3853_v35 = vpack.c.bf16 %v1682_v4, %v1681_v9 }
 0x93c   : > { %1853 = vrot.lane.b32.xlu0 %v1846_v15, %s4253_s28  ;;  %1851 = vrot.lane.b32.xlu1 %v1844_v17, %s4253_s28  ;;  %v1685_v15 = vld [vmem:[%s5821_s1 + $0x3d0] sm:$0xff]  ;;  %v1686_v17 = vld [vmem:[%s5821_s1 + $0x3d8] sm:$0xff] }
 0x93d   : > { %v3859_v45 = vpack.c.bf16 %v1686_v17, %v1685_v15 }
 0x940   : > { %1875 = vrot.lane.b32.xlu0 %v1868_v37, %s4259_s22  ;;  %1873 = vrot.lane.b32.xlu1 %v1866_v42, %s4259_s22  ;;  %v3862_v37 = vpack.c.bf16 %v1688_v8, %v1687_v18  ;;  %v1689_v42 = vld [vmem:[%s5821_s1 + $0x3f0] sm:$0xff] }
 0x941   : > { %v3865_v6 = vpack.c.bf16 %v1690_v51, %v1689_v42 }
 0x944   : > { %1897 = vrot.lane.b32.xlu0 %v1890_v1, %s4256_s7  ;;  %1895 = vrot.lane.b32.xlu1 %v1888_v13, %s4256_s7  ;;  %v1692_v1 = vld [vmem:[%s5821_s1 + $0x408] sm:$0xff] }
 0x945   : > { %v3868_v13 = vpack.c.bf16 %v1692_v1, %v1691_v61 }
 0x99a   : > { %v1828_v20 = vpop.permute.xlu0 %1827  ;;  %v1826_v21 = vpop.permute.xlu1 %1825 }
 0x99b   : > { %v1904_v27 = vsel %vm434_vm5, %v5084_v29, %v1828_v20  ;;  %v1903_v28 = vsel %vm434_vm5, %v5087_v30, %v1826_v21  ;;  %v3295_v20 = vld [vmem:[%s5821_s1 + $0x388] ss:$0 sm:$0xff] }
 0x99e   : > { %v1850_v22 = vpop.permute.xlu0 %1849  ;;  %v1848_v23 = vpop.permute.xlu1 %1847 }
 0x99f   : > { %v1908_v3 = vsel %vm444_vm7, %v1904_v27, %v1850_v22  ;;  %v1907_v16 = vsel %vm444_vm7, %v1903_v28, %v1848_v23  ;;  %v1693_v22 = vld [vmem:[%s5821_s1 + $0x410] sm:$0xff]  ;;  %v1694_v23 = vld [vmem:[%s5821_s1 + $0x418] sm:$0xff] }
 0x9a0   : > { %v3871_v27 = vpack.c.bf16 %v1694_v23, %v1693_v22 }
 0x9a2   : > { %v1872_v24 = vpop.permute.xlu0 %1871  ;;  %v1870_v26 = vpop.permute.xlu1 %1869 }
 0x9a3   : > { %v1913_v19 = vsel %vm1911_vm13, %v1908_v3, %v1872_v24  ;;  %v1912_v32 = vsel %vm1911_vm13, %v1907_v16, %v1870_v26 }
 0x9a6   : > { %v1894_v55 = vpop.permute.xlu0 %1893  ;;  %v1892_v33 = vpop.permute.xlu1 %1891 }
 0x9a7   : > { %v1917_v34 = vsel %vm652_vm9, %v1913_v19, %v1894_v55  ;;  %v1916_v36 = vsel %vm652_vm9, %v1912_v32, %v1892_v33  ;;  %v1695_v19 = vld [vmem:[%s5821_s1 + $0x420] sm:$0xff]  ;;  %v1696_v32 = vld [vmem:[%s5821_s1 + $0x428] sm:$0xff] }
 0x9a8   : > { %3576 = vmatprep.mubr.msk.f32.mxu0 %vm1924_vm14, %v1916_v36  ;;  %v3874_v33 = vpack.c.bf16 %v1696_v32, %v1695_v19 }
 0x9a9   : > { %3577 = vmatmul.mubr.msk.f32.vlgmr.msra.gmra.mrb[24].mxu0 %vm1924_vm14, %v1917_v34 }
 0x9aa   : > { %v1832_v29 = vpop.permute.xlu0 %1831  ;;  %v1830_v30 = vpop.permute.xlu1 %1829 }
 0x9ab   : > { %v1906_v43 = vsel %vm434_vm5, %v5107_v56, %v1832_v29  ;;  %v1905_v44 = vsel %vm434_vm5, %v5117_v63, %v1830_v30  ;;  %v1677_v63 = vld [vmem:[%s5821_s1 + $0x390] sm:$0xff] }
 0x9ac   : > { %v3847_v53 = vpack.c.bf16 %v1678_v0, %v1677_v63 }
 0x9ae   : > { %v1854_v38 = vpop.permute.xlu0 %1853  ;;  %v1852_v39 = vpop.permute.xlu1 %1851  ;;  %3848 = vmatpush1.bf16.msra.mxu1 %v3847_v53 }
 0x9af   : > { %v1910_v54 = vsel %vm444_vm7, %v1906_v43, %v1854_v38  ;;  %v1909_v46 = vsel %vm444_vm7, %v1905_v44, %v1852_v39  ;;  %3849 = vmatprep.subr.bf16.mxu1 %v4254_v31 }
 0x9b2   : > { %v1876_v40 = vpop.permute.xlu0 %1875  ;;  %v1874_v41 = vpop.permute.xlu1 %1873  ;;  %3851 = vmatpush1.bf16.msra.mxu1 %v3850_v59 }
 0x9b3   : > { %v1915_v47 = vsel %vm1911_vm13, %v1910_v54, %v1876_v40  ;;  %v1914_v48 = vsel %vm1911_vm13, %v1909_v46, %v1874_v41  ;;  %3852 = vmatprep.subr.bf16.mxu1 %v4254_v31 }
 0x9b6   : > { %v1898_v49 = vpop.permute.xlu0 %1897  ;;  %v1896_v50 = vpop.permute.xlu1 %1895  ;;  %3854 = vmatpush1.bf16.msra.mxu1 %v3853_v35 }
 0x9b7   : > { %v1919_v57 = vsel %vm652_vm9, %v1915_v47, %v1898_v49  ;;  %v1918_v58 = vsel %vm652_vm9, %v1914_v48, %v1896_v50  ;;  %3855 = vmatprep.subr.bf16.mxu1 %v4254_v31 }
 0x9b8   : > { %3579 = vmatprep.mubr.msk.f32.mxu0 %vm1924_vm14, %v1918_v58 }
 0x9b9   : > { %3580 = vmatmul.mubr.msk.f32.gmra.mrb[26].mxu0 %vm1924_vm14, %v1919_v57 }
 0x9ba   : > { %3857 = vmatpush1.bf16.msra.mxu1 %v3856_v2 }
 0x9bb   : > { %3858 = vmatprep.subr.bf16.mxu1 %v4254_v31 }
 0x9be   : > { %3860 = vmatpush1.bf16.msra.mxu1 %v3859_v45 }
 0x9bf   : > { %3861 = vmatprep.subr.bf16.mxu1 %v4254_v31 }
 0x9c2   : > { %3863 = vmatpush1.bf16.msra.mxu1 %v3862_v37 }
 0x9c3   : > { %3864 = vmatprep.subr.bf16.mxu1 %v4254_v31 }
 0x9c6   : > { %3866 = vmatpush1.bf16.msra.mxu1 %v3865_v6 }
 0x9c7   : > { %3867 = vmatprep.subr.bf16.mxu1 %v4254_v31 }
 0x9ca   : > { %3869 = vmatpush1.bf16.msra.mxu1 %v3868_v13 }
 0x9cb   : > { %3870 = vmatprep.subr.bf16.mxu1 %v4254_v31 }
 0x9ce   : > { %3872 = vmatpush1.bf16.msra.mxu1 %v3871_v27 }
 0x9cf   : > { %3873 = vmatprep.subr.bf16.mxu1 %v4254_v31 }
 0x9d2   : > { %3875 = vmatpush1.bf16.msra.mxu1 %v3874_v33 }
 0x9d3   : > { %3906 = vmatprep.subr.bf16.mxu1 %v4254_v31 }
 0x9f6   : > { %v5169_v56 = vpop.f32.mrb[20].mxu0 }
 0x9f7   : > { %v5171_v12 = vpop.f32.mrb[21].mxu0 }
 0x9fe   : > { %v5173_v60 = vpop.f32.mrb[22].mxu0 }
 0x9ff   : > { %v5175_v62 = vpop.f32.mrb[23].mxu0 }
 0xa7c   : > { %v3578_v21 = vpop.f32.mrb[24].mxu0 }
 0xa7d   : > { %v2009_v24 = vadd.f32 %v3578_v21, %v3295_v20  ;;  %v2003_v26 = vpop.f32.mrb[25].mxu0 }
 0xa7e   : > { %v2004_v28 = vadd.f32 %v3295_v20, %v2003_v26 }
 0xa7f   : > { %v2023_v3 = vmax.f32 %v2009_v24, 0.0 }
 0xa80   : > { %v2022_v16 = vmax.f32 %v2004_v28, 0.0 }
 0xa81   : > { %v2031_v55 = vrot.slane %v2023_v3, 4 }
 0xa82   : > { %v2030_v34 = vrot.slane %v2022_v16, 4 }
 0xa83   : > { %v2069_v36 = vrot.slane %v2031_v55, 2  ;;  %v2047_v38 = vrot.slane %v2031_v55, 1  ;;  %v2113_v39 = vrot.slane %v2031_v55, 4  ;;  %v2091_v53 = vrot.slane %v2031_v55, 3 }
 0xa84   : > { %v5250_v29 = vsel %vm236_vm0, %v2030_v34, %v2031_v55  ;;  %v5253_v30 = vsel %vm236_vm0, 0.0, %v2030_v34 }
 0xa85   : > { %v2110_v40 = vrot.slane %v5253_v30, 4  ;;  %v2111_v41 = vrot.slane %v5250_v29, 4  ;;  %v2066_v43 = vrot.slane %v5253_v30, 2  ;;  %v2067_v44 = vrot.slane %v5250_v29, 2 }
 0xa86   : > { %v2044_v54 = vrot.slane %v5253_v30, 1  ;;  %v2045_v46 = vrot.slane %v5250_v29, 1  ;;  %v2088_v47 = vrot.slane %v5253_v30, 3  ;;  %v2089_v48 = vrot.slane %v5250_v29, 3 }
 0xa87   : > { %v2112_v49 = vsel %vm236_vm0, %v2110_v40, %v2111_v41  ;;  %v2068_v50 = vsel %vm362_vm2, %v2066_v43, %v2067_v44  ;;  %v2070_v57 = vsel %vm362_vm2, %v2067_v44, %v2069_v36  ;;  %v2114_v58 = vsel %vm236_vm0, %v2111_v41, %v2113_v39 }
 0xa88   : > { %3301 = vmatprep.mubr.msk.f32.mxu1 %vm652_vm9, %v2112_v49  ;;  %v4138_v63 = vpack.i.bf16 %v2070_v57, %v2068_v50  ;;  %v2046_v0 = vsel %vm339_vm3, %v2044_v54, %v2045_v46  ;;  %v2048_v5 = vsel %vm339_vm3, %v2045_v46, %v2047_v38  ;;  %v2090_v59 = vsel %vm385_vm4, %v2088_v47, %v2089_v48 }
 0xa89   : > { %v4133_v7 = vpack.i.bf16 %v2048_v5, %v2046_v0  ;;  %v2092_v9 = vsel %vm385_vm4, %v2089_v48, %v2091_v53 }
 0xa8a   : > { %4139 = vrot.lane.b32.xlu0 %v4138_v63, %s4255_s6  ;;  %v4143_v11 = vpack.i.bf16 %v2092_v9, %v2090_v59 }
 0xa8b   : > { %4134 = vrot.lane.b32.xlu1 %v4133_v7, %s4256_s7 }
 0xa8c   : > { %v3581_v4 = vpop.f32.mrb[26].mxu0 }
 0xa8d   : > { %v2019_v35 = vadd.f32 %v3581_v4, %v3295_v20  ;;  %v2013_v10 = vpop.f32.mrb[27].mxu0 }
 0xa8e   : > { %v2014_v2 = vadd.f32 %v3295_v20, %v2013_v10  ;;  %v2241_v10 = vld [vmem:[%s5821_s1 + $0x448] sm:$0xff] }
 0xa8f   : > { %v2025_v15 = vmax.f32 %v2019_v35, 0.0  ;;  %4144 = vrot.lane.b32.xlu1 %v4143_v11, %s4257_s8  ;;  %v2242_v11 = vld [vmem:[%s5821_s1 + $0x450] sm:$0xff] }
 0xa90   : > { %v2024_v17 = vmax.f32 %v2014_v2, 0.0  ;;  %v2243_v2 = vld [vmem:[%s5821_s1 + $0x458] sm:$0xff] }
 0xa91   : > { %v2034_v45 = vrot.slane %v2025_v15, 4  ;;  %v3877_v15 = vpack.c.bf16 %v2242_v11, %v2241_v10 }
 0xa92   : > { %v2033_v18 = vrot.slane %v2024_v17, 4  ;;  %v2244_v17 = vld [vmem:[%s5821_s1 + $0x460] sm:$0xff] }
 0xa93   : > { %v2052_v22 = vrot.slane %v2034_v45, 1  ;;  %v2074_v26 = vrot.slane %v2034_v45, 2  ;;  %v2096_v27 = vrot.slane %v2034_v45, 3  ;;  %v2118_v5 = vrot.slane %v2034_v45, 4  ;;  %3878 = vmatpush1.bf16.msra.mxu0 %v3877_v15 }
 0xa94   : > { %v2035_v8 = vsel %vm236_vm0, %v2033_v18, %v2034_v45  ;;  %v2041_v37 = vsel %vm236_vm0, 0.0, %v2033_v18  ;;  %v3880_v45 = vpack.c.bf16 %v2244_v17, %v2243_v2  ;;  %3879 = vmatprep.subr.bf16.mxu0 %v4254_v31  ;;  %v2245_v18 = vld [vmem:[%s5821_s1 + $0x468] sm:$0xff] }
 0xa95   : > { %v2049_v42 = vrot.slane %v2041_v37, 1  ;;  %v2050_v51 = vrot.slane %v2035_v8, 1  ;;  %v2071_v6 = vrot.slane %v2041_v37, 2  ;;  %v2072_v61 = vrot.slane %v2035_v8, 2 }
 0xa96   : > { %v2093_v21 = vrot.slane %v2041_v37, 3  ;;  %v2094_v20 = vrot.slane %v2035_v8, 3  ;;  %v2115_v54 = vrot.slane %v2041_v37, 4  ;;  %v2116_v46 = vrot.slane %v2035_v8, 4 }
 0xa97   : > { %v2051_v1 = vsel %vm339_vm3, %v2049_v42, %v2050_v51  ;;  %v2073_v13 = vsel %vm362_vm2, %v2071_v6, %v2072_v61  ;;  %v2053_v24 = vsel %vm339_vm3, %v2050_v51, %v2052_v22  ;;  %v2075_v28 = vsel %vm362_vm2, %v2072_v61, %v2074_v26  ;;  %3881 = vmatpush1.bf16.msra.mxu0 %v3880_v45  ;;  %v2247_v42 = vld [vmem:[%s5821_s1 + $0x478] sm:$0xff]  ;;  %v2248_v51 = vld [vmem:[%s5821_s1 + $0x480] sm:$0xff]  ;;  %v2249_v61 = vld [vmem:[%s5821_s1 + $0x488] sm:$0xff] }
 0xa98   : > { %2058 = vrot.lane.b32.xlu0 %v2051_v1, %s4256_s7  ;;  %2080 = vrot.lane.b32.xlu1 %v2073_v13, %s4255_s6  ;;  %v2095_v23 = vsel %vm385_vm4, %v2093_v21, %v2094_v20  ;;  %v2097_v3 = vsel %vm385_vm4, %v2094_v20, %v2096_v27  ;;  %v2117_v48 = vsel %vm236_vm0, %v2115_v54, %v2116_v46  ;;  %v2250_v1 = vld [vmem:[%s5821_s1 + $0x490] sm:$0xff]  ;;  %v2251_v21 = vld [vmem:[%s5821_s1 + $0x498] sm:$0xff] }
 0xa99   : > { %v2119_v53 = vsel %vm236_vm0, %v2116_v46, %v2118_v5  ;;  %3882 = vmatprep.subr.bf16.mxu0 %v4254_v31  ;;  %v3886_v6 = vpack.c.bf16 %v2248_v51, %v2247_v42  ;;  %v3889_v13 = vpack.c.bf16 %v2250_v1, %v2249_v61  ;;  %v2252_v20 = vld [vmem:[%s5821_s1 + $0x4a0] sm:$0xff]  ;;  %v2255_v27 = vld [vmem:[%s5821_s1 + $0x4b8] sm:$0xff] }
 0xa9a   : > { %v3892_v22 = vpack.c.bf16 %v2252_v20, %v2251_v21 }
 0xa9c   : > { %2102 = vrot.lane.b32.xlu0 %v2095_v23, %s4257_s8  ;;  %2060 = vrot.lane.b32.xlu1 %v2053_v24, %s4256_s7  ;;  %v2253_v23 = vld [vmem:[%s5821_s1 + $0x4a8] sm:$0xff]  ;;  %v2254_v24 = vld [vmem:[%s5821_s1 + $0x4b0] sm:$0xff] }
 0xa9d   : > { %v3895_v26 = vpack.c.bf16 %v2254_v24, %v2253_v23 }
 0xaa0   : > { %2082 = vrot.lane.b32.xlu0 %v2075_v28, %s4255_s6  ;;  %2104 = vrot.lane.b32.xlu1 %v2097_v3, %s4257_s8  ;;  %v2256_v28 = vld [vmem:[%s5821_s1 + $0x4c0] sm:$0xff] }
 0xaa1   : > { %v3898_v3 = vpack.c.bf16 %v2256_v28, %v2255_v27 }
 0xafc   : > { %v4140_v16 = vpop.permute.xlu0 %4139 }
 0xafd   : > { %v4135_v19 = vpop.permute.xlu1 %4134  ;;  %v4141_v55 = vunpack.i.l.bf16 %v4140_v16  ;;  %v4142_v39 = vunpack.i.h.bf16 %v4140_v16  ;;  %v3300_v16 = vld [vmem:[%s5821_s1 + $0x430] ss:$0 sm:$0xff] }
 0xafe   : > { %v4136_v32 = vunpack.i.l.bf16 %v4135_v19  ;;  %v4137_v33 = vunpack.i.h.bf16 %v4135_v19  ;;  %v3290_v19 = vld [vmem:[%s5821_s1 + $0x440] ss:$0 sm:$0xff] }
 0xaff   : > { %v1788_v46 = vadd.f32 %v5169_v56, %v3290_v19  ;;  %v1798_v51 = vadd.f32 %v5173_v60, %v3290_v19 }
 0xb00   : > { %v2120_v34 = vsel %vm652_vm9, %v5253_v30, %v4136_v32  ;;  %v2121_v44 = vsel %vm652_vm9, %v5250_v29, %v4137_v33 }
 0xb01   : > { %v4145_v36 = vpop.permute.xlu1 %4144  ;;  %v2124_v40 = vsel %vm657_vm10, %v2120_v34, %v4141_v55  ;;  %v2125_v47 = vsel %vm657_vm10, %v2121_v44, %v4142_v39  ;;  %v1783_v34 = vadd.f32 %v3290_v19, %v5171_v12  ;;  %v2258_v39 = vld [vmem:[%s5821_s1 + $0x4d0] sm:$0xff] }
 0xb02   : > { %v4146_v38 = vunpack.i.l.bf16 %v4145_v36  ;;  %v4147_v41 = vunpack.i.h.bf16 %v4145_v36 }
 0xb04   : > { %v2128_v43 = vsel %vm662_vm11, %v2124_v40, %v4146_v38  ;;  %v2129_v30 = vsel %vm662_vm11, %v2125_v47, %v4147_v41  ;;  %v2257_v38 = vld [vmem:[%s5821_s1 + $0x4c8] sm:$0xff] }
 0xb05   : > { %2209 = vmatmul.mubr.f32.vlgmr.msra.gmra.mrb[24].mxu1 %v2128_v43  ;;  %v3901_v41 = vpack.c.bf16 %v2258_v39, %v2257_v38 }
 0xb06   : > { %3302 = vmatprep.mubr.msk.f32.mxu1 %vm652_vm9, %v2114_v58 }
 0xb09   : > { %2214 = vmatmul.mubr.f32.gmra.mrb[26].mxu1 %v2129_v30  ;;  %v2259_v30 = vld [vmem:[%s5821_s1 + $0x4d8] sm:$0xff] }
 0xb0a   : > { %3303 = vmatprep.mubr.msk.f32.mxu1 %vm652_vm9, %v2117_v48  ;;  %v2059_v49 = vpop.permute.xlu0 %2058  ;;  %v2081_v50 = vpop.permute.xlu1 %2080  ;;  %v2260_v48 = vld [vmem:[%s5821_s1 + $0x4e0] sm:$0xff] }
 0xb0b   : > { %v2122_v57 = vsel %vm652_vm9, %v2041_v37, %v2059_v49  ;;  %v3904_v49 = vpack.c.bf16 %v2260_v48, %v2259_v30 }
 0xb0c   : > { %v2126_v29 = vsel %vm657_vm10, %v2122_v57, %v2081_v50 }
 0xb0e   : > { %v2103_v63 = vpop.permute.xlu0 %2102  ;;  %v2061_v0 = vpop.permute.xlu1 %2060 }
 0xb0f   : > { %v2130_v58 = vsel %vm662_vm11, %v2126_v29, %v2103_v63  ;;  %v2123_v7 = vsel %vm652_vm9, %v2035_v8, %v2061_v0  ;;  %v2246_v8 = vld [vmem:[%s5821_s1 + $0x470] sm:$0xff] }
 0xb10   : > { %2219 = vmatmul.mubr.f32.gmra.mrb[28].mxu1 %v2130_v58  ;;  %v3883_v37 = vpack.c.bf16 %v2246_v8, %v2245_v18 }
 0xb11   : > { %3304 = vmatprep.mubr.msk.f32.mxu1 %vm652_vm9, %v2119_v53 }
 0xb12   : > { %v2083_v59 = vpop.permute.xlu0 %2082  ;;  %v2105_v9 = vpop.permute.xlu1 %2104  ;;  %3884 = vmatpush1.bf16.msra.mxu0 %v3883_v37 }
 0xb13   : > { %v2127_v4 = vsel %vm657_vm10, %v2123_v7, %v2083_v59  ;;  %3885 = vmatprep.subr.bf16.mxu0 %v4254_v31  ;;  %v1793_v59 = vadd.f32 %v3290_v19, %v5175_v62 }
 0xb14   : > { %v2131_v35 = vsel %vm662_vm11, %v2127_v4, %v2105_v9 }
 0xb15   : > { %2224 = vmatmul.mubr.f32.gmra.mrb[30].mxu1 %v2131_v35 }
 0xb16   : > { %3887 = vmatpush1.bf16.msra.mxu0 %v3886_v6 }
 0xb17   : > { %3888 = vmatprep.subr.bf16.mxu0 %v4254_v31 }
 0xb1a   : > { %3890 = vmatpush1.bf16.msra.mxu0 %v3889_v13 }
 0xb1b   : > { %3891 = vmatprep.subr.bf16.mxu0 %v4254_v31 }
 0xb1e   : > { %3893 = vmatpush1.bf16.msra.mxu0 %v3892_v22 }
 0xb1f   : > { %3894 = vmatprep.subr.bf16.mxu0 %v4254_v31 }
 0xb22   : > { %3896 = vmatpush1.bf16.msra.mxu0 %v3895_v26 }
 0xb23   : > { %3897 = vmatprep.subr.bf16.mxu0 %v4254_v31 }
 0xb26   : > { %3899 = vmatpush1.bf16.msra.mxu0 %v3898_v3 }
 0xb27   : > { %3900 = vmatprep.subr.bf16.mxu0 %v4254_v31 }
 0xb2a   : > { %3902 = vmatpush1.bf16.msra.mxu0 %v3901_v41 }
 0xb2b   : > { %3903 = vmatprep.subr.bf16.mxu0 %v4254_v31 }
 0xb2e   : > { %3905 = vmatpush1.bf16.msra.mxu0 %v3904_v49 }
 0xbd8   : > { %v2210_v32 = vpop.f32.mrb[24].mxu1 }
 0xbd9   : > { %v2211_v55 = vadd.f32 %v3300_v16, %v2210_v32  ;;  %v2212_v33 = vpop.f32.mrb[25].mxu1 }
 0xbdb   : > { %v2229_v36 = vmax.f32 %v2211_v55, 0.0 }
 0xbdc   : > { %v2215_v40 = vpop.f32.mrb[26].mxu1 }
 0xbdd   : > { %v2233_v43 = vadd.f32 %v2229_v36, %v1783_v34  ;;  %v2216_v44 = vadd.f32 %v3300_v16, %v2215_v40  ;;  %v2217_v54 = vpop.f32.mrb[27].mxu1 }
 0xbdf   : > { %v5379_v47 = vmax.f32 %v2233_v43, 0.0  ;;  %v2230_v12 = vmax.f32 %v2216_v44, 0.0 }
 0xbe1   : > { %v2234_v50 = vadd.f32 %v2230_v12, %v1788_v46  ;;  %3306 = vmatprep.mubr.msk.f32.mxu0 %vm652_vm9, %v5379_v47  ;;  %v2307_v29 = vrot.slane %v5379_v47, 4  ;;  %v2287_v63 = vrot.slane %v5379_v47, 2  ;;  %v2327_v4 = vrot.slane %v5379_v47, 6 }
 0xbe3   : > { %v5390_v56 = vmax.f32 %v2234_v50, 0.0  ;;  %v2220_v57 = vpop.f32.mrb[28].mxu1  ;;  %v2308_v35 = vsel %vm236_vm0, %v4654_v52, %v2307_v29  ;;  %v2288_v11 = vsel %vm362_vm2, %v4659_v14, %v2287_v63  ;;  %v2328_v61 = vsel %vm865_vm12, %v4666_v25, %v2327_v4 }
 0xbe4   : > { %v2221_v0 = vadd.f32 %v3300_v16, %v2220_v57  ;;  %v2222_v5 = vpop.f32.mrb[29].mxu1 }
 0xbe5   : > { %v2309_v58 = vrot.slane %v5390_v56, 4  ;;  %v2289_v53 = vrot.slane %v5390_v56, 2  ;;  %v2329_v7 = vrot.slane %v5390_v56, 6 }
 0xbe6   : > { %v2231_v9 = vmax.f32 %v2221_v0, 0.0 }
 0xbe7   : > { %v2310_v10 = vsel %vm236_vm0, %v2307_v29, %v2309_v58  ;;  %v2290_v2 = vsel %vm362_vm2, %v2287_v63, %v2289_v53  ;;  %v2330_v62 = vsel %vm865_vm12, %v2327_v4, %v2329_v7  ;;  %v2262_v4 = vld [vmem:[%s5821_s1 + $0x4f0] sm:$0xff] }
 0xbe8   : > { %v2235_v15 = vadd.f32 %v2231_v9, %v1793_v59  ;;  %v2225_v17 = vpop.f32.mrb[30].mxu1  ;;  %v4153_v45 = vpack.i.bf16 %v2310_v10, %v2308_v35  ;;  %v4148_v18 = vpack.i.bf16 %v2290_v2, %v2288_v11  ;;  %v4158_v1 = vpack.i.bf16 %v2330_v62, %v2328_v61  ;;  %v2263_v35 = vld [vmem:[%s5821_s1 + $0x4f8] sm:$0xff]  ;;  %v2264_v10 = vld [vmem:[%s5821_s1 + $0x500] sm:$0xff]  ;;  %v2265_v2 = vld [vmem:[%s5821_s1 + $0x508] sm:$0xff] }
 0xbe9   : > { %v2226_v8 = vadd.f32 %v3300_v16, %v2225_v17  ;;  %v2227_v37 = vpop.f32.mrb[31].mxu1  ;;  %v3907_v11 = vpack.c.bf16 %v2263_v35, %v2262_v4  ;;  %v2266_v17 = vld [vmem:[%s5821_s1 + $0x510] sm:$0xff] }
 0xbea   : > { %v5406_v42 = vmax.f32 %v2235_v15, 0.0  ;;  %4154 = vrot.lane.b32.xlu1 %v4153_v45, %s4255_s6  ;;  %4149 = vrot.lane.b32.xlu0 %v4148_v18, %s4256_s7  ;;  %v3910_v15 = vpack.c.bf16 %v2265_v2, %v2264_v10  ;;  %v2267_v45 = vld [vmem:[%s5821_s1 + $0x518] sm:$0xff]  ;;  %v2269_v37 = vld [vmem:[%s5821_s1 + $0x528] sm:$0xff] }
 0xbeb   : > { %v2232_v6 = vmax.f32 %v2226_v8, 0.0  ;;  %3908 = vmatpush1.bf16.msra.mxu1 %v3907_v11  ;;  %v3913_v18 = vpack.c.bf16 %v2267_v45, %v2266_v17  ;;  %v2268_v8 = vld [vmem:[%s5821_s1 + $0x520] sm:$0xff] }
 0xbec   : > { %v2291_v13 = vrot.slane %v5406_v42, 2  ;;  %v2311_v20 = vrot.slane %v5406_v42, 4  ;;  %v2331_v23 = vrot.slane %v5406_v42, 6  ;;  %3909 = vmatprep.subr.bf16.mxu1 %v4254_v31  ;;  %v3916_v62 = vpack.c.bf16 %v2269_v37, %v2268_v8 }
 0xbed   : > { %v2236_v21 = vadd.f32 %v2232_v6, %v1798_v51  ;;  %v2270_v51 = vld [vmem:[%s5821_s1 + $0x530] sm:$0xff]  ;;  %v2271_v6 = vld [vmem:[%s5821_s1 + $0x538] sm:$0xff] }
 0xbee   : > { %4159 = vrot.lane.b32.xlu0 %v4158_v1, %s4257_s8  ;;  %v2292_v22 = vsel %vm362_vm2, %v4659_v14, %v2291_v13  ;;  %v2312_v60 = vsel %vm236_vm0, %v4654_v52, %v2311_v20  ;;  %v2332_v27 = vsel %vm865_vm12, %v4666_v25, %v2331_v23  ;;  %v3919_v61 = vpack.c.bf16 %v2271_v6, %v2270_v51  ;;  %v2272_v1 = vld [vmem:[%s5821_s1 + $0x540] sm:$0xff] }
 0xbef   : > { %v5419_v24 = vmax.f32 %v2236_v21, 0.0  ;;  %2299 = vrot.lane.b32.xlu1 %v2292_v22, %s4256_s7  ;;  %3911 = vmatpush1.bf16.msra.mxu1 %v3910_v15  ;;  %v2275_v22 = vld [vmem:[%s5821_s1 + $0x558] sm:$0xff] }
 0xbf0   : > { %3912 = vmatprep.subr.bf16.mxu1 %v4254_v31 }
 0xbf1   : > { %v2293_v26 = vrot.slane %v5419_v24, 2  ;;  %v2313_v28 = vrot.slane %v5419_v24, 4  ;;  %v2333_v16 = vrot.slane %v5419_v24, 6 }
 0xbf2   : > { %2319 = vrot.lane.b32.xlu0 %v2312_v60, %s4255_s6  ;;  %v2276_v60 = vld [vmem:[%s5821_s1 + $0x560] sm:$0xff] }
 0xbf3   : > { %2339 = vrot.lane.b32.xlu1 %v2332_v27, %s4257_s8  ;;  %v2294_v3 = vsel %vm362_vm2, %v2291_v13, %v2293_v26  ;;  %v2314_v19 = vsel %vm236_vm0, %v2311_v20, %v2313_v28  ;;  %v2334_v32 = vsel %vm865_vm12, %v2331_v23, %v2333_v16  ;;  %3914 = vmatpush1.bf16.msra.mxu1 %v3913_v18  ;;  %v2273_v13 = vld [vmem:[%s5821_s1 + $0x548] sm:$0xff]  ;;  %v2274_v20 = vld [vmem:[%s5821_s1 + $0x550] sm:$0xff]  ;;  %v2279_v16 = vld [vmem:[%s5821_s1 + $0x578] sm:$0xff] }
 0xbf4   : > { %3915 = vmatprep.subr.bf16.mxu1 %v4254_v31  ;;  %v3922_v21 = vpack.c.bf16 %v2273_v13, %v2272_v1  ;;  %v3925_v23 = vpack.c.bf16 %v2275_v22, %v2274_v20  ;;  %v2277_v26 = vld [vmem:[%s5821_s1 + $0x568] sm:$0xff] }
 0xbf5   : > { %v3928_v27 = vpack.c.bf16 %v2277_v26, %v2276_v60  ;;  %v3305_v28 = vld [vmem:[%s5821_s1 + $0x4e8] ss:$0 sm:$0xff] }
 0xbf6   : > { %2301 = vrot.lane.b32.xlu0 %v2294_v3, %s4256_s7  ;;  %v2278_v3 = vld [vmem:[%s5821_s1 + $0x570] sm:$0xff] }
 0xbf7   : > { %2321 = vrot.lane.b32.xlu1 %v2314_v19, %s4255_s6  ;;  %3917 = vmatpush1.bf16.msra.mxu1 %v3916_v62 }
 0xbf8   : > { %3918 = vmatprep.subr.bf16.mxu1 %v4254_v31 }
 0xbfa   : > { %2341 = vrot.lane.b32.xlu0 %v2334_v32, %s4257_s8  ;;  %v3931_v32 = vpack.c.bf16 %v2279_v16, %v2278_v3 }
 0xbfb   : > { %3920 = vmatpush1.bf16.msra.mxu1 %v3919_v61 }
 0xbfc   : > { %3921 = vmatprep.subr.bf16.mxu1 %v4254_v31 }
 0xbff   : > { %3923 = vmatpush1.bf16.msra.mxu1 %v3922_v21 }
 0xc00   : > { %3924 = vmatprep.subr.bf16.mxu1 %v4254_v31 }
 0xc03   : > { %3926 = vmatpush1.bf16.msra.mxu1 %v3925_v23 }
 0xc04   : > { %3927 = vmatprep.subr.bf16.mxu1 %v4254_v31 }
 0xc07   : > { %3929 = vmatpush1.bf16.msra.mxu1 %v3928_v27 }
 0xc08   : > { %3930 = vmatprep.subr.bf16.mxu1 %v4254_v31 }
 0xc0b   : > { %3932 = vmatpush1.bf16.msra.mxu1 %v3931_v32 }
 0xc0c   : > { %3933 = vmatprep.subr.bf16.mxu1 %v4254_v31 }
 0xc5c   : > { %v4155_v55 = vpop.permute.xlu1 %4154  ;;  %v4150_v33 = vpop.permute.xlu0 %4149 }
 0xc5d   : > { %v4151_v34 = vunpack.i.l.bf16 %v4150_v33  ;;  %v4156_v36 = vunpack.i.l.bf16 %v4155_v55  ;;  %v4152_v38 = vunpack.i.h.bf16 %v4150_v33  ;;  %v4157_v44 = vunpack.i.h.bf16 %v4155_v55 }
 0xc5f   : > { %v2347_v39 = vsel %vm652_vm9, 0.0, %v4151_v34  ;;  %v2348_v30 = vsel %vm652_vm9, %v5379_v47, %v4152_v38  ;;  %v2281_v38 = vld [vmem:[%s5821_s1 + $0x588] sm:$0xff] }
 0xc60   : > { %v4160_v40 = vpop.permute.xlu0 %4159  ;;  %v2351_v54 = vsel %vm657_vm10, %v2347_v39, %v4156_v36  ;;  %v2352_v57 = vsel %vm657_vm10, %v2348_v30, %v4157_v44  ;;  %v2280_v36 = vld [vmem:[%s5821_s1 + $0x580] sm:$0xff] }
 0xc61   : > { %v4161_v41 = vunpack.i.l.bf16 %v4160_v40  ;;  %v2300_v43 = vpop.permute.xlu1 %2299  ;;  %v4162_v46 = vunpack.i.h.bf16 %v4160_v40  ;;  %v3934_v40 = vpack.c.bf16 %v2281_v38, %v2280_v36 }
 0xc62   : > { %v2349_v49 = vsel %vm652_vm9, 0.0, %v2300_v43 }
 0xc63   : > { %v2355_v12 = vsel %vm662_vm11, %v2351_v54, %v4161_v41  ;;  %v2356_v29 = vsel %vm662_vm11, %v2352_v57, %v4162_v46  ;;  %3935 = vmatpush1.bf16.msra.mxu1 %v3934_v40 }
 0xc64   : > { %v2320_v48 = vpop.permute.xlu0 %2319  ;;  %2436 = vmatmul.mubr.f32.vlgmr.msra.gmra.mrb[28].mxu0 %v2355_v12 }
 0xc65   : > { %3307 = vmatprep.mubr.msk.f32.mxu0 %vm652_vm9, %v5390_v56  ;;  %v2340_v50 = vpop.permute.xlu1 %2339  ;;  %v2353_v63 = vsel %vm657_vm10, %v2349_v49, %v2320_v48 }
 0xc66   : > { %v2357_v53 = vsel %vm662_vm11, %v2353_v63, %v2340_v50 }
 0xc68   : > { %v2302_v0 = vpop.permute.xlu0 %2301  ;;  %2441 = vmatmul.mubr.f32.gmra.mrb[30].mxu0 %v2356_v29 }
 0xc69   : > { %v2350_v5 = vsel %vm652_vm9, %v5406_v42, %v2302_v0  ;;  %3308 = vmatprep.mubr.msk.f32.mxu0 %vm652_vm9, %v5406_v42  ;;  %v2322_v58 = vpop.permute.xlu1 %2321 }
 0xc6a   : > { %v2354_v7 = vsel %vm657_vm10, %v2350_v5, %v2322_v58 }
 0xc6c   : > { %v2342_v59 = vpop.permute.xlu0 %2341  ;;  %2446 = vmatmul.mubr.f32.gmra.mrb[32].mxu0 %v2357_v53 }
 0xc6d   : > { %3309 = vmatprep.mubr.msk.f32.mxu0 %vm652_vm9, %v5419_v24  ;;  %v2358_v9 = vsel %vm662_vm11, %v2354_v7, %v2342_v59 }
 0xc70   : > { %2451 = vmatmul.mubr.f32.gmra.mrb[34].mxu0 %v2358_v9 }
 0xd37   : > { %v2437_v19 = vpop.f32.mrb[28].mxu0 }
 0xd38   : > { %v2438_v55 = vadd.f32 %v3305_v28, %v2437_v19  ;;  %v2439_v33 = vpop.f32.mrb[29].mxu0 }
 0xd3a   : > { %v5522_v34 = vmax.f32 %v2438_v55, 0.0 }
 0xd3b   : > { %v2442_v39 = vpop.f32.mrb[30].mxu0 }
 0xd3c   : > { %v2443_v41 = vadd.f32 %v3305_v28, %v2442_v39  ;;  %v2444_v43 = vpop.f32.mrb[31].mxu0  ;;  %3311 = vmatprep.mubr.msk.f32.mxu1 %vm652_vm9, %v5522_v34  ;;  %v2484_v44 = vrot.slane %v5522_v34, 4  ;;  %v2464_v31 = vrot.slane %v5522_v34, 2  ;;  %v2504_v29 = vrot.slane %v5522_v34, 6 }
 0xd3e   : > { %v2457_v54 = vmax.f32 %v2443_v41, 0.0  ;;  %v2485_v57 = vsel %vm236_vm0, %v4654_v52, %v2484_v44  ;;  %v2465_v5 = vsel %vm362_vm2, %v4659_v14, %v2464_v31  ;;  %v2505_v11 = vsel %vm865_vm12, %v4666_v25, %v2504_v29 }
 0xd3f   : > { %v2447_v46 = vpop.f32.mrb[32].mxu0 }
 0xd40   : > { %v2466_v12 = vrot.slane %v2457_v54, 2  ;;  %v2486_v30 = vrot.slane %v2457_v54, 4  ;;  %v2506_v48 = vrot.slane %v2457_v54, 6  ;;  %v2448_v49 = vadd.f32 %v3305_v28, %v2447_v46  ;;  %v2449_v50 = vpop.f32.mrb[33].mxu0 }
 0xd41   : > { %v2648_v50 = vld [vmem:[%s5821_s1 + $0x5b0] sm:$0xff] }
 0xd42   : > { %v2458_v63 = vmax.f32 %v2448_v49, 0.0  ;;  %v2487_v0 = vsel %vm236_vm0, %v2484_v44, %v2486_v30  ;;  %v2467_v58 = vsel %vm362_vm2, %v2464_v31, %v2466_v12  ;;  %v2507_v10 = vsel %vm865_vm12, %v2504_v29, %v2506_v48  ;;  %v2645_v12 = vld [vmem:[%s5821_s1 + $0x598] sm:$0xff]  ;;  %v2646_v30 = vld [vmem:[%s5821_s1 + $0x5a0] sm:$0xff]  ;;  %v2647_v48 = vld [vmem:[%s5821_s1 + $0x5a8] sm:$0xff] }
 0xd43   : > { %v2452_v53 = vpop.f32.mrb[34].mxu0  ;;  %v4168_v7 = vpack.i.bf16 %v2487_v0, %v2485_v57  ;;  %v4163_v59 = vpack.i.bf16 %v2467_v58, %v2465_v5  ;;  %v4173_v2 = vpack.i.bf16 %v2507_v10, %v2505_v11  ;;  %v3936_v49 = vpack.c.bf16 %v2646_v30, %v2645_v12  ;;  %v2649_v29 = vld [vmem:[%s5821_s1 + $0x5b8] sm:$0xff]  ;;  %v2651_v5 = vld [vmem:[%s5821_s1 + $0x5c8] sm:$0xff]  ;;  %v2652_v58 = vld [vmem:[%s5821_s1 + $0x5d0] sm:$0xff] }
 0xd44   : > { %v2453_v9 = vadd.f32 %v3305_v28, %v2452_v53  ;;  %v2454_v4 = vpop.f32.mrb[35].mxu0  ;;  %v2468_v35 = vrot.slane %v2458_v63, 2  ;;  %v2508_v45 = vrot.slane %v2458_v63, 6  ;;  %v2488_v18 = vrot.slane %v2458_v63, 4  ;;  %v3310_v11 = vld [vmem:[%s5821_s1 + $0x590] ss:$0 sm:$0xff] }
 0xd45   : > { %4169 = vrot.lane.b32.xlu0 %v4168_v7, %s4255_s6  ;;  %4164 = vrot.lane.b32.xlu1 %v4163_v59, %s4256_s7  ;;  %v3940_v57 = vpack.c.bf16 %v2648_v50, %v2647_v48  ;;  %v3948_v53 = vpack.c.bf16 %v2652_v58, %v2651_v5  ;;  %v2653_v7 = vld [vmem:[%s5821_s1 + $0x5d8] sm:$0xff]  ;;  %v2654_v59 = vld [vmem:[%s5821_s1 + $0x5e0] sm:$0xff] }
 0xd46   : > { %v2459_v15 = vmax.f32 %v2453_v9, 0.0  ;;  %v2469_v17 = vsel %vm362_vm2, %v4659_v14, %v2468_v35  ;;  %v2509_v8 = vsel %vm865_vm12, %v4666_v25, %v2508_v45  ;;  %v2489_v37 = vsel %vm236_vm0, %v4654_v52, %v2488_v18  ;;  %3937 = vmatprep.subr.bf16.mxu0 %v3936_v49  ;;  %v2655_v4 = vld [vmem:[%s5821_s1 + $0x5e8] sm:$0xff] }
 0xd47   : > { %3939 = vmatpush3.bf16.msra.mxu0 %v3936_v49  ;;  %v3952_v9 = vpack.c.bf16 %v2654_v59, %v2653_v7 }
 0xd48   : > { %v2490_v62 = vrot.slane %v2459_v15, 4  ;;  %v2470_v51 = vrot.slane %v2459_v15, 2  ;;  %v2510_v61 = vrot.slane %v2459_v15, 6  ;;  %3941 = vmatprep.subr.bf16.mxu0 %v3940_v57 }
 0xd49   : > { %2476 = vrot.lane.b32.xlu0 %v2469_v17, %s4256_s7  ;;  %4174 = vrot.lane.b32.xlu1 %v4173_v2, %s4257_s8 }
 0xd4a   : > { %v2491_v14 = vsel %vm236_vm0, %v2488_v18, %v2490_v62  ;;  %v2471_v6 = vsel %vm362_vm2, %v2468_v35, %v2470_v51  ;;  %v2511_v25 = vsel %vm865_vm12, %v2508_v45, %v2510_v61  ;;  %v2656_v35 = vld [vmem:[%s5821_s1 + $0x5f0] sm:$0xff]  ;;  %v2657_v51 = vld [vmem:[%s5821_s1 + $0x5f8] sm:$0xff] }
 0xd4b   : > { %3943 = vmatpush3.bf16.msra.mxu0 %v3940_v57  ;;  %v3956_v10 = vpack.c.bf16 %v2656_v35, %v2655_v4 }
 0xd4d   : > { %2516 = vrot.lane.b32.xlu0 %v2509_v8, %s4257_s8  ;;  %2496 = vrot.lane.b32.xlu1 %v2489_v37, %s4255_s6 }
 0xd51   : > { %2498 = vrot.lane.b32.xlu0 %v2491_v14, %s4255_s6  ;;  %2478 = vrot.lane.b32.xlu1 %v2471_v6, %s4256_s7  ;;  %v2658_v14 = vld [vmem:[%s5821_s1 + $0x600] sm:$0xff] }
 0xd55   : > { %2518 = vrot.lane.b32.xlu1 %v2511_v25, %s4257_s8  ;;  %v3960_v25 = vpack.c.bf16 %v2658_v14, %v2657_v51 }
 0xdb7   : > { %v4170_v1 = vpop.permute.xlu0 %4169  ;;  %v4165_v13 = vpop.permute.xlu1 %4164 }
 0xdb8   : > { %v4166_v21 = vunpack.i.l.bf16 %v4165_v13  ;;  %v4171_v20 = vunpack.i.l.bf16 %v4170_v1  ;;  %v4167_v22 = vunpack.i.h.bf16 %v4165_v13  ;;  %v4172_v28 = vunpack.i.h.bf16 %v4170_v1 }
 0xdba   : > { %v2524_v23 = vsel %vm652_vm9, 0.0, %v4166_v21  ;;  %v2525_v32 = vsel %vm652_vm9, %v5522_v34, %v4167_v22  ;;  %v2659_v22 = vld [vmem:[%s5821_s1 + $0x608] sm:$0xff] }
 0xdbb   : > { %v2477_v60 = vpop.permute.xlu0 %2476  ;;  %v4175_v26 = vpop.permute.xlu1 %4174  ;;  %v2528_v3 = vsel %vm657_vm10, %v2524_v23, %v4171_v20  ;;  %v2529_v36 = vsel %vm657_vm10, %v2525_v32, %v4172_v28  ;;  %v2660_v23 = vld [vmem:[%s5821_s1 + $0x610] sm:$0xff] }
 0xdbc   : > { %v4176_v27 = vunpack.i.l.bf16 %v4175_v26  ;;  %v4177_v16 = vunpack.i.h.bf16 %v4175_v26  ;;  %v2526_v38 = vsel %vm652_vm9, 0.0, %v2477_v60  ;;  %v3964_v28 = vpack.c.bf16 %v2660_v23, %v2659_v22 }
 0xdbe   : > { %v2532_v19 = vsel %vm662_vm11, %v2528_v3, %v4176_v27  ;;  %v2533_v39 = vsel %vm662_vm11, %v2529_v36, %v4177_v16 }
 0xdbf   : > { %v2497_v55 = vpop.permute.xlu1 %2496  ;;  %2613 = vmatmul.mubr.f32.vlgmr.msra.gmra.mrb[32].mxu1 %v2532_v19  ;;  %v2517_v33 = vpop.permute.xlu0 %2516 }
 0xdc0   : > { %3312 = vmatprep.mubr.msk.f32.mxu1 %vm652_vm9, %v2457_v54  ;;  %v2530_v40 = vsel %vm657_vm10, %v2526_v38, %v2497_v55 }
 0xdc1   : > { %v2534_v44 = vsel %vm662_vm11, %v2530_v40, %v2517_v33 }
 0xdc3   : > { %v2479_v41 = vpop.permute.xlu1 %2478  ;;  %2618 = vmatmul.mubr.f32.gmra.mrb[34].mxu1 %v2533_v39  ;;  %v2499_v43 = vpop.permute.xlu0 %2498 }
 0xdc4   : > { %3313 = vmatprep.mubr.msk.f32.mxu1 %vm652_vm9, %v2458_v63  ;;  %v2527_v34 = vsel %vm652_vm9, %v2458_v63, %v2479_v41  ;;  %v2650_v63 = vld [vmem:[%s5821_s1 + $0x5c0] sm:$0xff] }
 0xdc5   : > { %v2531_v54 = vsel %vm657_vm10, %v2527_v34, %v2499_v43  ;;  %v3944_v0 = vpack.c.bf16 %v2650_v63, %v2649_v29 }
 0xdc7   : > { %v2519_v31 = vpop.permute.xlu1 %2518  ;;  %2623 = vmatmul.mubr.f32.gmra.mrb[36].mxu1 %v2534_v44  ;;  %3945 = vmatprep.subr.bf16.mxu0 %v3944_v0 }
 0xdc8   : > { %3314 = vmatprep.mubr.msk.f32.mxu1 %vm652_vm9, %v2459_v15  ;;  %v2535_v46 = vsel %vm662_vm11, %v2531_v54, %v2519_v31  ;;  %3947 = vmatpush3.bf16.msra.mxu0 %v3944_v0 }
 0xdc9   : > { %3949 = vmatprep.subr.bf16.mxu0 %v3948_v53 }
 0xdcb   : > { %2628 = vmatmul.mubr.f32.gmra.mrb[38].mxu1 %v2535_v46 }
 0xdcc   : > { %3951 = vmatpush3.bf16.msra.mxu0 %v3948_v53 }
 0xdcd   : > { %3953 = vmatprep.subr.bf16.mxu0 %v3952_v9 }
 0xdd0   : > { %3955 = vmatpush3.bf16.msra.mxu0 %v3952_v9 }
 0xdd1   : > { %3957 = vmatprep.subr.bf16.mxu0 %v3956_v10 }
 0xdd4   : > { %3959 = vmatpush3.bf16.msra.mxu0 %v3956_v10 }
 0xdd5   : > { %3961 = vmatprep.subr.bf16.mxu0 %v3960_v25 }
 0xdd8   : > { %3963 = vmatpush3.bf16.msra.mxu0 %v3960_v25 }
 0xdd9   : > { %3965 = vmatprep.subr.bf16.mxu0 %v3964_v28 }
 0xddc   : > { %3967 = vmatpush3.bf16.msra.mxu0 %v3964_v28 }
 0xe92   : > { %v2614_v2 = vpop.f32.mrb[32].mxu1 }
 0xe93   : > { %v2615_v15 = vadd.f32 %v3310_v11, %v2614_v2  ;;  %v2616_v17 = vpop.f32.mrb[33].mxu1 }
 0xe95   : > { %v2633_v45 = vmax.f32 %v2615_v15, 0.0 }
 0xe96   : > { %v2619_v18 = vpop.f32.mrb[34].mxu1 }
 0xe97   : > { %v5619_v8 = vadd.f32 %v2633_v45, %v5379_v47  ;;  %v2620_v37 = vadd.f32 %v3310_v11, %v2619_v18  ;;  %v2621_v62 = vpop.f32.mrb[35].mxu1 }
 0xe99   : > { %v2641_v6 = vmax.f32 %v5619_v8, 0.0  ;;  %v2634_v61 = vmax.f32 %v2620_v37, 0.0 }
 0xe9a   : > { %v2624_v1 = vpop.f32.mrb[36].mxu1 }
 0xe9b   : > { %v2683_v13 = vrot.slane %v2641_v6, 4  ;;  %v5631_v47 = vadd.f32 %v2634_v61, %v5390_v56  ;;  %v2625_v21 = vadd.f32 %v3310_v11, %v2624_v1  ;;  %v2626_v20 = vpop.f32.mrb[37].mxu1 }
 0xe9d   : > { %v2691_v60 = vsel %vm236_vm0, 0.0, %v2683_v13  ;;  %v2642_v26 = vmax.f32 %v5631_v47, 0.0  ;;  %v2635_v27 = vmax.f32 %v2625_v21, 0.0 }
 0xe9e   : > { %v2629_v56 = vpop.f32.mrb[38].mxu1  ;;  %v2695_v55 = vrot.slane %v2691_v60, 4 }
 0xe9f   : > { %v2684_v3 = vrot.slane %v2642_v26, 4  ;;  %v5644_v16 = vadd.f32 %v2635_v27, %v5406_v42  ;;  %v2630_v19 = vadd.f32 %v3310_v11, %v2629_v56  ;;  %v2631_v32 = vpop.f32.mrb[39].mxu1 }
 0xea0   : > { %v2696_v42 = vsel %vm236_vm0, %v4654_v52, %v2695_v55  ;;  %v2662_v32 = vld [vmem:[%s5821_s1 + $0x620] sm:$0xff] }
 0xea1   : > { %v2643_v33 = vmax.f32 %v5644_v16, 0.0  ;;  %v2636_v36 = vmax.f32 %v2630_v19, 0.0  ;;  %v2685_v38 = vsel %vm236_vm0, %v2683_v13, %v2684_v3  ;;  %v2727_v39 = vrot.slane %v2684_v3, 4 }
 0xea2   : > { %v4178_v40 = vpack.i.bf16 %v2685_v38, %v2691_v60  ;;  %v2697_v41 = vrot.slane %v2685_v38, 4 }
 0xea3   : > { %v2686_v43 = vrot.slane %v2643_v33, 4  ;;  %v5651_v34 = vadd.f32 %v2636_v36, %v5419_v24  ;;  %v2664_v36 = vld [vmem:[%s5821_s1 + $0x630] sm:$0xff] }
 0xea4   : > { %4179 = vrot.lane.b32.xlu1 %v4178_v40, %s4255_s6  ;;  %v2698_v44 = vsel %vm236_vm0, %v2695_v55, %v2697_v41  ;;  %v2728_v12 = vsel %vm236_vm0, %v2697_v41, %v2727_v39  ;;  %v2663_v55 = vld [vmem:[%s5821_s1 + $0x628] sm:$0xff]  ;;  %v2665_v39 = vld [vmem:[%s5821_s1 + $0x638] sm:$0xff]  ;;  %v2666_v41 = vld [vmem:[%s5821_s1 + $0x640] sm:$0xff] }
 0xea5   : > { %v2692_v31 = vsel %vm236_vm0, 0.0, %v2686_v43  ;;  %v2644_v54 = vmax.f32 %v5651_v34, 0.0  ;;  %v4183_v46 = vpack.i.bf16 %v2698_v44, %v2696_v42  ;;  %v4188_v49 = vpack.i.bf16 %v2728_v12, %v2698_v44  ;;  %v2668_v44 = vld [vmem:[%s5821_s1 + $0x650] sm:$0xff]  ;;  %v2670_v12 = vld [vmem:[%s5821_s1 + $0x660] sm:$0xff] }
 0xea6   : > { %v2699_v24 = vrot.slane %v2692_v31, 4  ;;  %v3968_v38 = vpack.c.bf16 %v2663_v55, %v2662_v32  ;;  %v3972_v40 = vpack.c.bf16 %v2665_v39, %v2664_v36  ;;  %v3025_v36 = vld [vmem:[%s5821_s1 + $0x6a8] sm:$0xff] }
 0xea7   : > { %v2687_v30 = vrot.slane %v2644_v54, 4  ;;  %4184 = vrot.lane.b32.xlu0 %v4183_v46, %s4256_s7 }
 0xea8   : > { %v2700_v29 = vsel %vm236_vm0, %v4654_v52, %v2699_v24  ;;  %3969 = vmatprep.subr.bf16.mxu0 %v3968_v38 }
 0xea9   : > { %v2688_v48 = vsel %vm236_vm0, %v2686_v43, %v2687_v30  ;;  %v2729_v57 = vrot.slane %v2687_v30, 4  ;;  %v2667_v43 = vld [vmem:[%s5821_s1 + $0x648] sm:$0xff] }
 0xeaa   : > { %v2701_v50 = vrot.slane %v2688_v48, 4  ;;  %v4193_v5 = vpack.i.bf16 %v2688_v48, %v2692_v31  ;;  %v3976_v42 = vpack.c.bf16 %v2667_v43, %v2666_v41  ;;  %v2671_v30 = vld [vmem:[%s5821_s1 + $0x668] sm:$0xff]  ;;  %v2672_v48 = vld [vmem:[%s5821_s1 + $0x670] sm:$0xff] }
 0xeab   : > { %4189 = vrot.lane.b32.xlu0 %v4188_v49, %s4257_s8  ;;  %v2673_v49 = vld [vmem:[%s5821_s1 + $0x678] sm:$0xff] }
 0xeac   : > { %v2702_v63 = vsel %vm236_vm0, %v2699_v24, %v2701_v50  ;;  %v2730_v58 = vsel %vm236_vm0, %v2701_v50, %v2729_v57  ;;  %v3984_v24 = vpack.c.bf16 %v2671_v30, %v2670_v12  ;;  %v3988_v50 = vpack.c.bf16 %v2673_v49, %v2672_v48  ;;  %v3315_v57 = vld [vmem:[%s5821_s1 + $0x618] ss:$0 sm:$0xff] }
 0xead   : > { %v4198_v0 = vpack.i.bf16 %v2702_v63, %v2700_v29  ;;  %v4203_v53 = vpack.i.bf16 %v2730_v58, %v2702_v63  ;;  %v2674_v29 = vld [vmem:[%s5821_s1 + $0x680] sm:$0xff]  ;;  %v2675_v63 = vld [vmem:[%s5821_s1 + $0x688] sm:$0xff] }
 0xeaf   : > { %4199 = vrot.lane.b32.xlu1 %v4198_v0, %s4256_s7  ;;  %4194 = vrot.lane.b32.xlu0 %v4193_v5, %s4255_s6  ;;  %v3992_v5 = vpack.c.bf16 %v2675_v63, %v2674_v29 }
 0xeb3   : > { %4204 = vrot.lane.b32.xlu1 %v4203_v53, %s4257_s8 }
 0xf16   : > { %v4180_v59 = vpop.permute.xlu1 %4179 }
 0xf17   : > { %v4182_v11 = vunpack.i.h.bf16 %v4180_v59  ;;  %v4181_v2 = vunpack.i.l.bf16 %v4180_v59 }
 0xf19   : > { %v4185_v7 = vpop.permute.xlu0 %4184 }
 0xf1a   : > { %v4187_v9 = vunpack.i.h.bf16 %v4185_v7  ;;  %v4186_v4 = vunpack.i.l.bf16 %v4185_v7 }
 0xf1c   : > { %v2744_v35 = vsel %vm652_vm9, %v2691_v60, %v4187_v9  ;;  %v2743_v10 = vsel %vm652_vm9, 0.0, %v4186_v4  ;;  %v2676_v9 = vld [vmem:[%s5821_s1 + $0x690] sm:$0xff]  ;;  %v2677_v4 = vld [vmem:[%s5821_s1 + $0x698] sm:$0xff] }
 0xf1d   : > { %v4190_v15 = vpop.permute.xlu0 %4189  ;;  %v2747_v18 = vsel %vm657_vm10, %v2743_v10, %v4181_v2  ;;  %v2748_v37 = vsel %vm657_vm10, %v2744_v35, %v4182_v11  ;;  %v3996_v10 = vpack.c.bf16 %v2677_v4, %v2676_v9 }
 0xf1e   : > { %v4192_v17 = vunpack.i.h.bf16 %v4190_v15  ;;  %v4191_v45 = vunpack.i.l.bf16 %v4190_v15 }
 0xf20   : > { %v2751_v62 = vsel %vm662_vm11, %v2747_v18, %v4191_v45  ;;  %v2752_v51 = vsel %vm662_vm11, %v2748_v37, %v4192_v17 }
 0xf21   : > { %v4200_v14 = vpop.permute.xlu1 %4199  ;;  %v4195_v61 = vpop.permute.xlu0 %4194  ;;  %3614 = vmatprep.mubr.f32.mxu0 %v2751_v62 }
 0xf22   : > { %v4202_v25 = vunpack.i.h.bf16 %v4200_v14  ;;  %v4201_v1 = vunpack.i.l.bf16 %v4200_v14  ;;  %3615 = vmatmul.mubr.f32.vlgmr.msra.gmra.mrb[36].mxu0 %v2752_v51  ;;  %v4197_v13 = vunpack.i.h.bf16 %v4195_v61  ;;  %v4196_v21 = vunpack.i.l.bf16 %v4195_v61 }
 0xf23   : > { %3971 = vmatpush3.bf16.msra.mxu0 %v3968_v38  ;;  %v3026_v38 = vld [vmem:[%s5821_s1 + $0x6b0] sm:$0xff] }
 0xf24   : > { %v2745_v20 = vsel %vm652_vm9, 0.0, %v4201_v1  ;;  %v2746_v22 = vsel %vm652_vm9, %v2692_v31, %v4202_v25  ;;  %3973 = vmatprep.subr.bf16.mxu0 %v3972_v40  ;;  %v2669_v31 = vld [vmem:[%s5821_s1 + $0x658] sm:$0xff]  ;;  %v4000_v39 = vpack.c.bf16 %v3026_v38, %v3025_v36 }
 0xf25   : > { %v4205_v23 = vpop.permute.xlu1 %4204  ;;  %v2749_v28 = vsel %vm657_vm10, %v2745_v20, %v4196_v21  ;;  %v2750_v56 = vsel %vm657_vm10, %v2746_v22, %v4197_v13  ;;  %v3980_v46 = vpack.c.bf16 %v2669_v31, %v2668_v44 }
 0xf26   : > { %v4207_v60 = vunpack.i.h.bf16 %v4205_v23  ;;  %v4206_v27 = vunpack.i.l.bf16 %v4205_v23  ;;  %4001 = vmatprep.subr.bf16.mxu1 %v4000_v39 }
 0xf27   : > { %3975 = vmatpush3.bf16.msra.mxu0 %v3972_v40  ;;  %4003 = vmatpush3.bf16.msra.mxu1 %v4000_v39 }
 0xf28   : > { %v2753_v3 = vsel %vm662_vm11, %v2749_v28, %v4206_v27  ;;  %v2754_v19 = vsel %vm662_vm11, %v2750_v56, %v4207_v60  ;;  %3977 = vmatprep.subr.bf16.mxu0 %v3976_v42 }
 0xf29   : > { %3617 = vmatprep.mubr.f32.mxu0 %v2753_v3 }
 0xf2a   : > { %3618 = vmatmul.mubr.f32.gmra.mrb[38].mxu0 %v2754_v19 }
 0xf2b   : > { %3979 = vmatpush3.bf16.msra.mxu0 %v3976_v42 }
 0xf2c   : > { %3981 = vmatprep.subr.bf16.mxu0 %v3980_v46 }
 0xf2f   : > { %3983 = vmatpush3.bf16.msra.mxu0 %v3980_v46 }
 0xf30   : > { %3985 = vmatprep.subr.bf16.mxu0 %v3984_v24 }
 0xf33   : > { %3987 = vmatpush3.bf16.msra.mxu0 %v3984_v24 }
 0xf34   : > { %3989 = vmatprep.subr.bf16.mxu0 %v3988_v50 }
 0xf37   : > { %3991 = vmatpush3.bf16.msra.mxu0 %v3988_v50 }
 0xf38   : > { %3993 = vmatprep.subr.bf16.mxu0 %v3992_v5 }
 0xf3b   : > { %3995 = vmatpush3.bf16.msra.mxu0 %v3992_v5 }
 0xf3c   : > { %3997 = vmatprep.subr.bf16.mxu0 %v3996_v10 }
 0xf3f   : > { %3999 = vmatpush3.bf16.msra.mxu0 %v3996_v10 }
 0xff5   : > { %v3616_v0 = vpop.f32.mrb[36].mxu0 }
 0xff6   : > { %v2831_v58 = vadd.f32 %v3616_v0, %v3315_v57  ;;  %v2825_v53 = vpop.f32.mrb[37].mxu0 }
 0xff7   : > { %v2826_v7 = vadd.f32 %v3315_v57, %v2825_v53 }
 0xff8   : > { %v2845_v59 = vmax.f32 %v2831_v58, 0.0 }
 0xff9   : > { %v2844_v35 = vmax.f32 %v2826_v7, 0.0 }
 0xffa   : > { %v2853_v11 = vrot.slane %v2845_v59, 4 }
 0xffb   : > { %v2852_v2 = vrot.slane %v2844_v35, 4 }
 0xffc   : > { %v2896_v15 = vrot.slane %v2853_v11, 4 }
 0xffd   : > { %v2854_v17 = vsel %vm236_vm0, %v2852_v2, %v2853_v11  ;;  %v2860_v45 = vsel %vm236_vm0, 0.0, %v2852_v2  ;;  %v3619_v18 = vpop.f32.mrb[38].mxu0 }
 0xffe   : > { %v2864_v37 = vrot.slane %v2860_v45, 4  ;;  %v4208_v62 = vpack.i.bf16 %v2854_v17, %v2860_v45  ;;  %v2866_v51 = vrot.slane %v2854_v17, 4  ;;  %v2841_v14 = vadd.f32 %v3619_v18, %v3315_v57  ;;  %v2835_v61 = vpop.f32.mrb[39].mxu0 }
 0xfff   : > { %v2836_v25 = vadd.f32 %v3315_v57, %v2835_v61  ;;  %v3028_v61 = vld [vmem:[%s5821_s1 + $0x6c0] sm:$0xff] }
0x1000   : > { %v2847_v1 = vmax.f32 %v2841_v14, 0.0  ;;  %4209 = vrot.lane.b32.xlu1 %v4208_v62, %s4255_s6  ;;  %v2865_v13 = vsel %vm236_vm0, %v4654_v52, %v2864_v37  ;;  %v2867_v21 = vsel %vm236_vm0, %v2864_v37, %v2866_v51  ;;  %v2897_v20 = vsel %vm236_vm0, %v2866_v51, %v2896_v15  ;;  %v3027_v14 = vld [vmem:[%s5821_s1 + $0x6b8] sm:$0xff] }
0x1001   : > { %v2846_v22 = vmax.f32 %v2836_v25, 0.0  ;;  %v4213_v23 = vpack.i.bf16 %v2867_v21, %v2865_v13  ;;  %v4218_v60 = vpack.i.bf16 %v2897_v20, %v2867_v21  ;;  %v4004_v25 = vpack.c.bf16 %v3028_v61, %v3027_v14 }
0x1002   : > { %v2856_v27 = vrot.slane %v2847_v1, 4  ;;  %v3316_v1 = vld [vmem:[%s5821_s1 + $0x6a0] ss:$0 sm:$0xff] }
0x1003   : > { %v2855_v28 = vrot.slane %v2846_v22, 4  ;;  %4214 = vrot.lane.b32.xlu0 %v4213_v23, %s4256_s7  ;;  %4005 = vmatprep.subr.bf16.mxu1 %v4004_v25 }
0x1004   : > { %v2898_v19 = vrot.slane %v2856_v27, 4  ;;  %4007 = vmatpush3.bf16.msra.mxu1 %v4004_v25 }
0x1005   : > { %v2857_v56 = vsel %vm236_vm0, %v2855_v28, %v2856_v27  ;;  %v2861_v3 = vsel %vm236_vm0, 0.0, %v2855_v28 }
0x1006   : > { %v2868_v32 = vrot.slane %v2861_v3, 4  ;;  %v2870_v55 = vrot.slane %v2857_v56, 4  ;;  %v4223_v42 = vpack.i.bf16 %v2857_v56, %v2861_v3 }
0x1007   : > { %4219 = vrot.lane.b32.xlu0 %v4218_v60, %s4257_s8 }
0x1008   : > { %v2869_v40 = vsel %vm236_vm0, %v4654_v52, %v2868_v32  ;;  %v2871_v41 = vsel %vm236_vm0, %v2868_v32, %v2870_v55  ;;  %v2899_v43 = vsel %vm236_vm0, %v2870_v55, %v2898_v19 }
0x1009   : > { %v4228_v44 = vpack.i.bf16 %v2871_v41, %v2869_v40  ;;  %v4233_v31 = vpack.i.bf16 %v2899_v43, %v2871_v41  ;;  %v3317_v40 = vld [vmem:[%s5821_s1 + $0x6c8] ss:$0 sm:$0xff] }
0x100b   : > { %4229 = vrot.lane.b32.xlu1 %v4228_v44, %s4256_s7  ;;  %4224 = vrot.lane.b32.xlu0 %v4223_v42, %s4255_s6  ;;  %v4239_v42 = vld [vmem:[%s4299_s18] sm:$0xff] }
0x100f   : > { %4234 = vrot.lane.b32.xlu1 %v4233_v31, %s4257_s8 }
0x1072   : > { %v4210_v12 = vpop.permute.xlu1 %4209 }
0x1073   : > { %v4212_v49 = vunpack.i.h.bf16 %v4210_v12  ;;  %v4211_v50 = vunpack.i.l.bf16 %v4210_v12 }
0x1075   : > { %v4215_v46 = vpop.permute.xlu0 %4214 }
0x1076   : > { %v4217_v30 = vunpack.i.h.bf16 %v4215_v46  ;;  %v4216_v24 = vunpack.i.l.bf16 %v4215_v46 }
0x1078   : > { %v2913_v52 = vsel %vm652_vm9, %v2860_v45, %v4217_v30  ;;  %v2912_v48 = vsel %vm652_vm9, 0.0, %v4216_v24 }
0x1079   : > { %v4220_v57 = vpop.permute.xlu0 %4219  ;;  %v2916_v0 = vsel %vm657_vm10, %v2912_v48, %v4211_v50  ;;  %v2917_v5 = vsel %vm657_vm10, %v2913_v52, %v4212_v49 }
0x107a   : > { %v4222_v29 = vunpack.i.h.bf16 %v4220_v57  ;;  %v4221_v63 = vunpack.i.l.bf16 %v4220_v57  ;;  %v4240_v57 = vld [vmem:[%s4299_s18 + $0x18] sm:$0xff] }
0x107c   : > { %v2920_v58 = vsel %vm662_vm11, %v2916_v0, %v4221_v63  ;;  %v2921_v53 = vsel %vm662_vm11, %v2917_v5, %v4222_v29  ;;  %v4241_v63 = vld [vmem:[%s4299_s18 + $0x10] sm:$0xff] }
0x107d   : > { %v4230_v7 = vpop.permute.xlu1 %4229  ;;  %v4225_v59 = vpop.permute.xlu0 %4224  ;;  %3652 = vmatprep.mubr.f32.mxu0 %v2920_v58 }
0x107e   : > { %v4232_v9 = vunpack.i.h.bf16 %v4230_v7  ;;  %v4231_v4 = vunpack.i.l.bf16 %v4230_v7  ;;  %3653 = vmatmul.mubr.f32.vlgmr.msra.gmra.mrb[40].mxu0 %v2921_v53  ;;  %v4227_v35 = vunpack.i.h.bf16 %v4225_v59  ;;  %v4226_v10 = vunpack.i.l.bf16 %v4225_v59 }
0x1080   : > { %v2914_v11 = vsel %vm652_vm9, 0.0, %v4231_v4  ;;  %v2915_v2 = vsel %vm652_vm9, %v2861_v3, %v4232_v9 }
0x1081   : > { %v4235_v15 = vpop.permute.xlu1 %4234  ;;  %v2918_v18 = vsel %vm657_vm10, %v2914_v11, %v4226_v10  ;;  %v2919_v37 = vsel %vm657_vm10, %v2915_v2, %v4227_v35 }
0x1082   : > { %v4237_v17 = vunpack.i.h.bf16 %v4235_v15  ;;  %v4236_v45 = vunpack.i.l.bf16 %v4235_v15 }
0x1084   : > { %v2922_v62 = vsel %vm662_vm11, %v2918_v18, %v4236_v45  ;;  %v2923_v51 = vsel %vm662_vm11, %v2919_v37, %v4237_v17 }
0x1085   : > { %3655 = vmatprep.mubr.f32.mxu0 %v2922_v62 }
0x1086   : > { %3656 = vmatmul.mubr.f32.gmra.mrb[42].mxu0 %v2923_v51 }
0x1151   : > { %v3654_v13 = vpop.f32.mrb[40].mxu0 }
0x1152   : > { %v3000_v21 = vadd.f32 %v3654_v13, %v3316_v1  ;;  %v2994_v20 = vpop.f32.mrb[41].mxu0 }
0x1153   : > { %v2995_v22 = vadd.f32 %v3316_v1, %v2994_v20 }
0x1154   : > { %v3014_v23 = vmax.f32 %v3000_v21, 0.0 }
0x1155   : > { %v3013_v60 = vmax.f32 %v2995_v22, 0.0 }
0x1156   : > { %v3018_v27 = vadd.f32 %v3014_v23, %v2642_v26 }
0x1157   : > { %v3017_v28 = vadd.f32 %v3013_v60, %v2641_v6 }
0x1158   : > { %v3022_v19 = vmax.f32 %v3018_v27, 0.0 }
0x1159   : > { %v3021_v56 = vmax.f32 %v3017_v28, 0.0  ;;  %v3657_v3 = vpop.f32.mrb[42].mxu0 }
0x115a   : > { %v3010_v32 = vadd.f32 %v3657_v3, %v3316_v1  ;;  %v3004_v55 = vpop.f32.mrb[43].mxu0 }
0x115b   : > { %v3005_v36 = vadd.f32 %v3316_v1, %v3004_v55  ;;  %3666 = vmatprep.mubr.msk.f32.mxu1 %vm652_vm9, %v3021_v56 }
0x115c   : > { %v3016_v38 = vmax.f32 %v3010_v32, 0.0  ;;  %3667 = vmatmul.mubr.msk.f32.vlgmr.msra.gmra.mrb[40].mxu1 %vm652_vm9, %v3022_v19 }
0x115d   : > { %v3015_v39 = vmax.f32 %v3005_v36, 0.0 }
0x115e   : > { %v3020_v47 = vadd.f32 %v3016_v38, %v2644_v54 }
0x115f   : > { %v3019_v8 = vadd.f32 %v3015_v39, %v2643_v33  ;;  %v4238_v33 = vld [vmem:[%s4299_s18 + $0x8] sm:$0xff]  ;;  %s187_s18 = scalar_lea.vmem %s5823_s3, %s5827_s13 }
0x1160   : > { %v3024_v26 = vmax.f32 %v3020_v47, 0.0 }
0x1161   : > { %v3023_v6 = vmax.f32 %v3019_v8, 0.0 }
0x1163   : > { %3669 = vmatprep.mubr.msk.f32.mxu1 %vm652_vm9, %v3023_v6 }
0x1164   : > { %3670 = vmatmul.mubr.msk.f32.gmra.mrb[42].mxu1 %vm652_vm9, %v3024_v26 }
0x122f   : > { %v3668_v34 = vpop.f32.mrb[40].mxu1 }
0x1230   : > { %v3118_v54 = vadd.f32 %v3668_v34, %v3317_v40  ;;  %v3112_v16 = vpop.f32.mrb[41].mxu1 }
0x1231   : > { %v3113_v41 = vadd.f32 %v3317_v40, %v3112_v16 }
0x1232   : > { %3132 = vst.msk [vmem:[%s183_s21 + $0x8] sm:$0xff] %vm223_vm1, %v3118_v54  ;;  %v3136_v43 = vsub.f32 %v3118_v54, %v4238_v33 }
0x1233   : > { %3131 = vst.msk [vmem:[%s183_s21] sm:$0xff] %vm223_vm1, %v3113_v41  ;;  %v3135_v44 = vsub.f32 %v3113_v41, %v4239_v42 }
0x1234   : > { %v3140_v31 = vmul.f32 %v3136_v43, %v3136_v43 }
0x1235   : > { %v3139_v46 = vmul.f32 %v3135_v44, %v3135_v44 }
0x1236   : > { %v3144_v12 = vsel %vm223_vm1, %v3140_v31, 0.0 }
0x1237   : > { %v3143_v30 = vsel %vm223_vm1, %v3139_v46, 0.0  ;;  %v3671_v24 = vpop.f32.mrb[42].mxu1 }
0x1238   : > { %v3145_v52 = vadd.f32 %v3144_v12, %v3143_v30  ;;  %v3128_v48 = vadd.f32 %v3671_v24, %v3317_v40  ;;  %v3122_v49 = vpop.f32.mrb[43].mxu1 }
0x1239   : > { %v3123_v50 = vadd.f32 %v3317_v40, %v3122_v49 }
0x123a   : > { %3134 = vst.msk [vmem:[%s183_s21 + $0x18] sm:$0xff] %vm223_vm1, %v3128_v48  ;;  %v3138_v29 = vsub.f32 %v3128_v48, %v4240_v57 }
0x123b   : > { %3133 = vst.msk [vmem:[%s183_s21 + $0x10] sm:$0xff] %vm223_vm1, %v3123_v50  ;;  %v3137_v0 = vsub.f32 %v3123_v50, %v4241_v63 }
0x123c   : > { %v3142_v5 = vmul.f32 %v3138_v29, %v3138_v29 }
0x123d   : > { %v3141_v58 = vmul.f32 %v3137_v0, %v3137_v0 }
0x123e   : > { %v3148_v59 = vsel %vm223_vm1, %v3142_v5, 0.0 }
0x123f   : > { %v3146_v53 = vsel %vm223_vm1, %v3141_v58, 0.0 }
0x1240   : > { %v3147_v7 = vadd.f32 %v3146_v53, %v3145_v52 }
0x1242   : > { %v3149_v9 = vadd.f32 %v3148_v59, %v3147_v7 }
0x1244   : > { %3150 = vadd.xlane.f32.xlu0 %v3149_v9 }
0x12d1   : > { %v3151_v4 = vpop.xlane.xlu0 %3150 }
0x12d2   : > { %v3152_v35 = vrot.slane %v3151_v4, 4 }
0x12d4   : > { %v3153_v10 = vadd.f32 %v3152_v35, %v3151_v4 }
0x12d6   : > { %v3154_v11 = vrot.slane %v3153_v10, 2 }
0x12d8   : > { %v3155_v2 = vadd.f32 %v3154_v11, %v3153_v10 }
0x12da   : > { %v3156_v15 = vrot.slane %v3155_v2, 1 }
0x12dc   : > { %v3157_v17 = vadd.f32 %v3156_v15, %v3155_v2 }
0x12de   : > { %4008 = vpush %v3157_v17 }
0x130f   : > { %s4009_s22 = spop %4008 }
0x1310   : > { %v3159_v45 = vstv %s4009_s22 }
0x1311   : > { %3161 = vst.msk [vmem:[%s187_s18] sm:$0x1] %vm3160_vm15, %v3159_v45 }
0x1312 PF: > { %s14_s12 = sadd.s32 1, %s4248_s12  }
0x1313   : > { %p11_p5 = scmp.ge.s32.totalorder %s14_s12, 4  }
0x1315   :  { %13 = sbr.rel (!%p11_p5) target bundleno = 1 (0x1), region = 70 }

</bundles_post_ra>
